<compile_context>
chip_gen: v5e
topology: v5e:2x2
jax: 0.10.0
libtpu: 0.0.40
codegen_flags: <defaults>
</compile_context>

<pallas_src>
import functools
import math

import jax
import jax.numpy as jnp
from jax.experimental import pallas as pl
from jax.experimental.pallas import tpu as pltpu


def _round_up(x, m):
    return (x + m - 1) // m * m


def _pick_chunk(T, max_chunk=32):
    """Largest chunk <= max_chunk that divides T (fully unrolled inside the kernel)."""
    c = min(T, max_chunk)
    while T % c:
        c -= 1
    return c


# --------------------- fused GRU layer (projection + recurrence) ---------------------

def _gru_layer_kernel(x_ref, wih_ref, bih_ref, whh_ref, bhh_ref, h0_ref,
                      out_ref, hlast_ref, h_scr, gx_scr, *, chunk, Bp, Hp):
    c = pl.program_id(0)

    @pl.when(c == 0)
    def _():
        h_scr[...] = h0_ref[...]

    # Batched input projection for the whole chunk: one MXU matmul, bias fused,
    # result kept in VMEM scratch (never touches HBM).
    gx_scr[...] = (jnp.dot(x_ref[...].astype(jnp.bfloat16), wih_ref[...],
                           preferred_element_type=jnp.float32)
                   + bih_ref[...])

    # Recurrent part: fully unrolled over the chunk (static slices), h carried as a
    # value within the chunk and persisted across grid steps via VMEM scratch.
    h = h_scr[...]                                            # (Bp, Hp) f32
    for t in range(chunk):
        gx = gx_scr[t * Bp:(t + 1) * Bp, :]                   # (Bp, 3Hp) f32
        gh = jnp.dot(h.astype(jnp.bfloat16), whh_ref[...],
                     preferred_element_type=jnp.float32) + bhh_ref[...]
        r = jax.nn.sigmoid(gx[:, :Hp] + gh[:, :Hp])
        z = jax.nn.sigmoid(gx[:, Hp:2 * Hp] + gh[:, Hp:2 * Hp])
        n = jnp.tanh(gx[:, 2 * Hp:] + r * gh[:, 2 * Hp:])     # b_hn inside r*(...) like torch
        h = (1.0 - z) * n + z * h
        out_ref[t * Bp:(t + 1) * Bp, :] = h.astype(out_ref.dtype)
    h_scr[...] = h
    hlast_ref[...] = h


def pallas_gru_layer(x_seq, w_ih_t, b_ih, w_hh_t, b_hh, h0, *, chunk, Bp, Hp):
    """One fused GRU layer.

    x_seq:  (T*Bp, Din) bf16   time-major, batch-padded, flattened
    w_ih_t: (Din, 3*Hp) bf16   gate-padded layout [r|z|n]
    b_ih:   (1, 3*Hp)   f32
    w_hh_t: (Hp, 3*Hp)  bf16   gate-padded
    b_hh:   (1, 3*Hp)   f32
    h0:     (Bp, Hp)    f32
    returns: out_seq (T*Bp, Hp) bf16, h_last (Bp, Hp) f32
    """
    TB, Din = x_seq.shape
    T = TB // Bp
    G3 = 3 * Hp
    num_chunks = T // chunk
    kern = functools.partial(_gru_layer_kernel, chunk=chunk, Bp=Bp, Hp=Hp)
    return pl.pallas_call(
        kern,
        out_shape=(jax.ShapeDtypeStruct((TB, Hp), jnp.bfloat16),
                   jax.ShapeDtypeStruct((Bp, Hp), jnp.float32)),
        grid_spec=pltpu.PrefetchScalarGridSpec(
            num_scalar_prefetch=0,
            grid=(num_chunks,),
            in_specs=[
                pl.BlockSpec((chunk * Bp, Din), lambda c: (c, 0)),   # x chunk
                pl.BlockSpec((Din, G3), lambda c: (0, 0)),           # W_ih^T (resident)
                pl.BlockSpec((1, G3), lambda c: (0, 0)),             # b_ih
                pl.BlockSpec((Hp, G3), lambda c: (0, 0)),            # W_hh^T (resident)
                pl.BlockSpec((1, G3), lambda c: (0, 0)),             # b_hh
                pl.BlockSpec((Bp, Hp), lambda c: (0, 0)),            # h0
            ],
            out_specs=[
                pl.BlockSpec((chunk * Bp, Hp), lambda c: (c, 0)),    # out chunk (bf16)
                pl.BlockSpec((Bp, Hp), lambda c: (0, 0)),            # final hidden (f32)
            ],
            scratch_shapes=[pltpu.VMEM((Bp, Hp), jnp.float32),       # carried h
                            pltpu.VMEM((chunk * Bp, G3), jnp.float32)]),  # gates_x
        compiler_params=pltpu.CompilerParams(
            dimension_semantics=("arbitrary",)),   # sequential carry via scratch
    )(x_seq, w_ih_t, b_ih, w_hh_t, b_hh, h0)


# ------------------------------ fused dense head -------------------------------------

def _head_kernel(h_ref, w1_ref, b1_ref, w2_ref, b2_ref, o_ref):
    y = jnp.dot(h_ref[...], w1_ref[...], preferred_element_type=jnp.float32) + b1_ref[...]
    y = jnp.maximum(y, 0.0)                                    # ReLU fused
    o_ref[...] = (jnp.dot(y, w2_ref[...], preferred_element_type=jnp.float32)
                  + b2_ref[...]).astype(o_ref.dtype)


def pallas_dense_head(h_last, w1, b1, w2, b2):
    """ReLU(h_last @ w1 + b1) @ w2 + b2 in a single pallas_call (intermediate on-chip)."""
    Bp, Hp = h_last.shape
    N1 = w1.shape[1]
    N2 = w2.shape[1]
    return pl.pallas_call(
        _head_kernel,
        out_shape=jax.ShapeDtypeStruct((Bp, N2), jnp.float32),
        grid_spec=pltpu.PrefetchScalarGridSpec(
            num_scalar_prefetch=0,
            grid=(1,),
            in_specs=[pl.BlockSpec((Bp, Hp), lambda i: (0, 0)),
                      pl.BlockSpec((Hp, N1), lambda i: (0, 0)),
                      pl.BlockSpec((1, N1), lambda i: (0, 0)),
                      pl.BlockSpec((N1, N2), lambda i: (0, 0)),
                      pl.BlockSpec((1, N2), lambda i: (0, 0))],
            out_specs=pl.BlockSpec((Bp, N2), lambda i: (0, 0))),
        compiler_params=pltpu.CompilerParams(
            dimension_semantics=("arbitrary",)),
    )(h_last, w1, b1, w2, b2)


# ----------------------------------- forward -----------------------------------------

def grunet_forward(params, x, h0):
    """Equivalent of GRUNet.forward(x, h) -> (out, h).

    x:  (B, T, input_dim)  batch_first
    h0: (n_layers, B, hidden_dim)
    """
    B, T, Din0 = x.shape
    n_layers, _, H = h0.shape
    Hp = params["gru"][0]["w_hh_t"].shape[0]
    Bp = _round_up(B, 8)
    chunk = _pick_chunk(T)

    # Single unavoidable layout pass on the raw input: batch-first -> time-major,
    # batch-pad to Bp, flatten to (T*Bp, Din), cast to bf16 (padded rows never read back).
    x_tm = jnp.pad(jnp.transpose(x, (1, 0, 2)), ((0, 0), (0, Bp - B), (0, 0)))
    layer_in = x_tm.reshape(T * Bp, Din0).astype(jnp.bfloat16)

    h0_p = jnp.pad(h0.astype(jnp.float32), ((0, 0), (0, Bp - B), (0, Hp - H)))

    h_finals = []
    h_last = None
    for l, lp in enumerate(params["gru"]):
        layer_in, h_last = pallas_gru_layer(
            layer_in, lp["w_ih_t"], lp["b_ih"], lp["w_hh_t"], lp["b_hh"], h0_p[l],
            chunk=chunk, Bp=Bp, Hp=Hp)
        h_finals.append(h_last[:B, :H])
        # layer_in (bf16, padded hidden cols exactly zero) feeds the next layer as-is.

    h_out = jnp.stack(h_finals, axis=0)          # (n_layers, B, H)

    # out[:, -1] of the top GRU layer == its final hidden state (already f32 in VMEM-shaped
    # padded form), so the dense head consumes h_last directly.
    # TODO(synk): F.dropout with p>0 omitted (module default dropout=[0,0] is identity);
    #             a nonzero rate would need pltpu.prng_seed / prng_random_bits masks.
    y = pallas_dense_head(h_last, params["d1_w_t"], params["d1_b"],
                          params["d2_w_t"], params["d2_b"])     # (Bp, output_dim)
    return y[:B], h_out


# ----------------------------- deterministic params ----------------------------------

def _xavier_uniform(key, shape):
    fan_out, fan_in = shape
    bound = math.sqrt(6.0 / (fan_in + fan_out))
    return jax.random.uniform(key, shape, jnp.float32, -bound, bound)


def _xavier_normal(key, shape):
    fan_out, fan_in = shape
    std = math.sqrt(2.0 / (fan_in + fan_out))
    return std * jax.random.normal(key, shape, jnp.float32)


def _orthogonal(key, shape):
    rows, cols = shape
    a = jax.random.normal(key, (rows, cols), jnp.float32)
    q, r = jnp.linalg.qr(a)
    d = jnp.diagonal(r)
    return q * jnp.where(d >= 0, 1.0, -1.0)


def _pad_gate_cols(w_t, H, Hp):
    """(Din, 3H) with gate blocks [r|z|n] of width H -> (Din, 3Hp) lane-aligned."""
    Din = w_t.shape[0]
    out = jnp.zeros((Din, 3 * Hp), jnp.float32)
    for g in range(3):
        out = out.at[:, g * Hp:g * Hp + H].set(w_t[:, g * H:(g + 1) * H])
    return out


def _pad_gate_vec(b, H, Hp):
    out = jnp.zeros((3 * Hp,), jnp.float32)
    for g in range(3):
        out = out.at[g * Hp:g * Hp + H].set(b[g * H:(g + 1) * H])
    return out


def init_grunet_params(key, input_dim, hidden_dim, output_dim, n_layers):
    H = hidden_dim
    Hp = _round_up(H, 128)
    keys = iter(jax.random.split(key, 4 * n_layers + 4))
    gru = []
    for l in range(n_layers):
        din = input_dim if l == 0 else hidden_dim
        w_ih = _xavier_uniform(next(keys), (3 * H, din))        # xavier_uniform_
        w_hh = _orthogonal(next(keys), (3 * H, H))              # orthogonal_
        b_ih = jnp.zeros((3 * H,), jnp.float32)                 # constant_(0)
        b_hh = jnp.zeros((3 * H,), jnp.float32)
        w_ih_t = _pad_gate_cols(w_ih.T, H, Hp)                  # (din, 3Hp)
        if l > 0:
            w_ih_t = jnp.pad(w_ih_t, ((0, Hp - H), (0, 0)))     # accept padded hidden input
        w_hh_t = jnp.pad(_pad_gate_cols(w_hh.T, H, Hp), ((0, Hp - H), (0, 0)))  # (Hp, 3Hp)
        gru.append({
            "w_ih_t": w_ih_t.astype(jnp.bfloat16),              # VMEM-resident bf16
            "b_ih": _pad_gate_vec(b_ih, H, Hp).reshape(1, 3 * Hp),
            "w_hh_t": w_hh_t.astype(jnp.bfloat16),
            "b_hh": _pad_gate_vec(b_hh, H, Hp).reshape(1, 3 * Hp),
        })
    d1_w = _xavier_normal(next(keys), (64, H))                  # xavier_normal_
    d2_w = _xavier_normal(next(keys), (output_dim, 64))
    return {
        "gru": gru,
        "d1_w_t": jnp.pad(d1_w.T, ((0, Hp - H), (0, 0))),       # (Hp, 64), zero pad rows
        "d1_b": jnp.zeros((1, 64), jnp.float32),
        "d2_w_t": d2_w.T,                                       # (64, output_dim)
        "d2_b": jnp.zeros((1, output_dim), jnp.float32),
    }


if __name__ == "__main__":
    key = jax.random.PRNGKey(0)
    kp, kx = jax.random.split(key)
    INPUT_DIM, HIDDEN_DIM, OUTPUT_DIM, N_LAYERS = 32, 64, 2, 2
    B, T = 2, 8
    params = init_grunet_params(kp, INPUT_DIM, HIDDEN_DIM, OUTPUT_DIM, N_LAYERS)
    x = jax.random.normal(kx, (B, T, INPUT_DIM), jnp.float32)
    h0 = jnp.zeros((N_LAYERS, B, HIDDEN_DIM), jnp.float32)

    out, h = jax.jit(grunet_forward)(params, x, h0)
    out = jax.block_until_ready(out)
    h = jax.block_until_ready(h)

    assert out.shape == (B, OUTPUT_DIM), out.shape
    assert h.shape == (N_LAYERS, B, HIDDEN_DIM), h.shape
    assert bool(jnp.all(jnp.isfinite(out))) and bool(jnp.all(jnp.isfinite(h)))
    print("KERNEL_OK")
</pallas_src>

<mosaic_0001>
module attributes {stable_mosaic.version = 11 : i64} {
  func.func @_gru_layer_kernel(%arg0: i32, %arg1: memref<64x128xbf16, #tpu.memory_space<vmem>>, %arg2: memref<128x384xbf16, #tpu.memory_space<vmem>>, %arg3: memref<1x384xf32, #tpu.memory_space<vmem>>, %arg4: memref<128x384xbf16, #tpu.memory_space<vmem>>, %arg5: memref<1x384xf32, #tpu.memory_space<vmem>>, %arg6: memref<8x128xf32, #tpu.memory_space<vmem>>, %arg7: memref<64x128xbf16, #tpu.memory_space<vmem>>, %arg8: memref<8x128xf32, #tpu.memory_space<vmem>>, %arg9: memref<8x128xf32, #tpu.memory_space<vmem>>, %arg10: memref<64x384xf32, #tpu.memory_space<vmem>>) attributes {dimension_semantics = [#tpu.dimension_semantics<arbitrary>], iteration_bounds = array<i64: 1>, scalar_prefetch = 0 : i64, scratch_operands = 2 : i64, tpu.core_type = #tpu.core_type<tc>, window_params = [{transform_indices = @transform_0, window_bounds = array<i64: 64, 128>}, {pipeline_mode = #tpu.pipeline_mode<synchronous>, transform_indices = @transform_1, window_bounds = array<i64: 128, 384>}, {pipeline_mode = #tpu.pipeline_mode<synchronous>, transform_indices = @transform_2, window_bounds = array<i64: 1, 384>}, {pipeline_mode = #tpu.pipeline_mode<synchronous>, transform_indices = @transform_3, window_bounds = array<i64: 128, 384>}, {pipeline_mode = #tpu.pipeline_mode<synchronous>, transform_indices = @transform_4, window_bounds = array<i64: 1, 384>}, {pipeline_mode = #tpu.pipeline_mode<synchronous>, transform_indices = @transform_5, window_bounds = array<i64: 8, 128>}, {transform_indices = @transform_6, window_bounds = array<i64: 64, 128>}, {pipeline_mode = #tpu.pipeline_mode<synchronous>, transform_indices = @transform_7, window_bounds = array<i64: 8, 128>}]} {
    %c0_i32 = arith.constant 0 : i32
    %0 = arith.cmpi eq, %arg0, %c0_i32 : i32
    %1 = arith.extui %0 : i1 to i32
    %c0_i32_0 = arith.constant 0 : i32
    %2 = arith.cmpi ne, %1, %c0_i32_0 : i32
    scf.if %2 {
      %c0_103 = arith.constant 0 : index
      %c0_104 = arith.constant 0 : index
      %293 = vector.load %arg6[%c0_103, %c0_104] : memref<8x128xf32, #tpu.memory_space<vmem>>, vector<8x128xf32>
      %c0_105 = arith.constant 0 : index
      %c0_106 = arith.constant 0 : index
      %294 = vector.load %arg9[%c0_105, %c0_106] : memref<8x128xf32, #tpu.memory_space<vmem>>, vector<8x128xf32>
      tpu.vector_store %arg9[%c0_105, %c0_106], %293 {strides = array<i32>} : memref<8x128xf32, #tpu.memory_space<vmem>>, vector<8x128xf32>,
    } else {
    }
    %c0 = arith.constant 0 : index
    %c0_1 = arith.constant 0 : index
    %3 = vector.load %arg1[%c0, %c0_1] : memref<64x128xbf16, #tpu.memory_space<vmem>>, vector<64x128xbf16>
    %c0_2 = arith.constant 0 : index
    %c0_3 = arith.constant 0 : index
    %4 = vector.load %arg2[%c0_2, %c0_3] : memref<128x384xbf16, #tpu.memory_space<vmem>>, vector<128x384xbf16>
    %cst = arith.constant dense<0.000000e+00> : vector<64x384xf32>
    %5 = tpu.matmul %3, %4, %cst {dimension_numbers = #tpu.dot_dimension_numbers<[1], [0], [0], [1], [0, 0, 1, 1], [], []>} : vector<64x128xbf16>, vector<128x384xbf16>, vector<64x384xf32> -> vector<64x384xf32>
    %c0_4 = arith.constant 0 : index
    %c0_5 = arith.constant 0 : index
    %6 = vector.load %arg3[%c0_4, %c0_5] : memref<1x384xf32, #tpu.memory_space<vmem>>, vector<1x384xf32>
    %7 = vector.broadcast %6 : vector<1x384xf32> to vector<64x384xf32>
    %8 = arith.addf %5, %7 : vector<64x384xf32>
    %c0_6 = arith.constant 0 : index
    %c0_7 = arith.constant 0 : index
    %9 = vector.load %arg10[%c0_6, %c0_7] : memref<64x384xf32, #tpu.memory_space<vmem>>, vector<64x384xf32>
    tpu.vector_store %arg10[%c0_6, %c0_7], %8 {strides = array<i32>} : memref<64x384xf32, #tpu.memory_space<vmem>>, vector<64x384xf32>,
    %c0_8 = arith.constant 0 : index
    %c0_9 = arith.constant 0 : index
    %10 = vector.load %arg9[%c0_8, %c0_9] : memref<8x128xf32, #tpu.memory_space<vmem>>, vector<8x128xf32>
    %c0_10 = arith.constant 0 : index
    %c0_11 = arith.constant 0 : index
    %11 = vector.load %arg10[%c0_10, %c0_11] : memref<64x384xf32, #tpu.memory_space<vmem>>, vector<8x384xf32>
    %12 = arith.truncf %10 : vector<8x128xf32> to vector<8x128xbf16>
    %c0_12 = arith.constant 0 : index
    %c0_13 = arith.constant 0 : index
    %13 = vector.load %arg4[%c0_12, %c0_13] : memref<128x384xbf16, #tpu.memory_space<vmem>>, vector<128x384xbf16>
    %cst_14 = arith.constant dense<0.000000e+00> : vector<8x384xf32>
    %14 = tpu.matmul %12, %13, %cst_14 {dimension_numbers = #tpu.dot_dimension_numbers<[1], [0], [0], [1], [0, 0, 1, 1], [], []>} : vector<8x128xbf16>, vector<128x384xbf16>, vector<8x384xf32> -> vector<8x384xf32>
    %c0_15 = arith.constant 0 : index
    %c0_16 = arith.constant 0 : index
    %15 = vector.load %arg5[%c0_15, %c0_16] : memref<1x384xf32, #tpu.memory_space<vmem>>, vector<1x384xf32>
    %16 = vector.broadcast %15 : vector<1x384xf32> to vector<8x384xf32>
    %17 = arith.addf %14, %16 : vector<8x384xf32>
    %18 = vector.extract_strided_slice %11 {offsets = [0, 0], sizes = [8, 128], strides = [1, 1]} : vector<8x384xf32> to vector<8x128xf32>
    %19 = vector.extract_strided_slice %17 {offsets = [0, 0], sizes = [8, 128], strides = [1, 1]} : vector<8x384xf32> to vector<8x128xf32>
    %20 = arith.addf %18, %19 : vector<8x128xf32>
    %21 = arith.negf %20 : vector<8x128xf32>
    %22 = math.exp %21 : vector<8x128xf32>
    %cst_17 = arith.constant 1.000000e+00 : f32
    %23 = vector.broadcast %cst_17 : f32 to vector<8x128xf32>
    %24 = arith.addf %23, %22 : vector<8x128xf32>
    %25 = arith.divf %23, %24 : vector<8x128xf32>
    %26 = vector.extract_strided_slice %11 {offsets = [0, 128], sizes = [8, 128], strides = [1, 1]} : vector<8x384xf32> to vector<8x128xf32>
    %27 = vector.extract_strided_slice %17 {offsets = [0, 128], sizes = [8, 128], strides = [1, 1]} : vector<8x384xf32> to vector<8x128xf32>
    %28 = arith.addf %26, %27 : vector<8x128xf32>
    %29 = arith.negf %28 : vector<8x128xf32>
    %30 = math.exp %29 : vector<8x128xf32>
    %cst_18 = arith.constant 1.000000e+00 : f32
    %31 = vector.broadcast %cst_18 : f32 to vector<8x128xf32>
    %32 = arith.addf %31, %30 : vector<8x128xf32>
    %33 = arith.divf %31, %32 : vector<8x128xf32>
    %34 = vector.extract_strided_slice %11 {offsets = [0, 256], sizes = [8, 128], strides = [1, 1]} : vector<8x384xf32> to vector<8x128xf32>
    %35 = vector.extract_strided_slice %17 {offsets = [0, 256], sizes = [8, 128], strides = [1, 1]} : vector<8x384xf32> to vector<8x128xf32>
    %36 = arith.mulf %25, %35 : vector<8x128xf32>
    %37 = arith.addf %34, %36 : vector<8x128xf32>
    %38 = math.tanh %37 : vector<8x128xf32>
    %cst_19 = arith.constant 1.000000e+00 : f32
    %39 = vector.broadcast %cst_19 : f32 to vector<8x128xf32>
    %40 = arith.subf %39, %33 : vector<8x128xf32>
    %41 = arith.mulf %40, %38 : vector<8x128xf32>
    %42 = arith.mulf %33, %10 : vector<8x128xf32>
    %43 = arith.addf %41, %42 : vector<8x128xf32>
    %44 = arith.truncf %43 : vector<8x128xf32> to vector<8x128xbf16>
    %c0_20 = arith.constant 0 : index
    %c0_21 = arith.constant 0 : index
    %45 = vector.load %arg7[%c0_20, %c0_21] : memref<64x128xbf16, #tpu.memory_space<vmem>>, vector<8x128xbf16>
    tpu.vector_store %arg7[%c0_20, %c0_21], %44 {strides = array<i32>} : memref<64x128xbf16, #tpu.memory_space<vmem>>, vector<8x128xbf16>,
    %c8 = arith.constant 8 : index
    %c0_22 = arith.constant 0 : index
    %46 = vector.load %arg10[%c8, %c0_22] : memref<64x384xf32, #tpu.memory_space<vmem>>, vector<8x384xf32>
    %47 = arith.truncf %43 : vector<8x128xf32> to vector<8x128xbf16>
    %c0_23 = arith.constant 0 : index
    %c0_24 = arith.constant 0 : index
    %48 = vector.load %arg4[%c0_23, %c0_24] : memref<128x384xbf16, #tpu.memory_space<vmem>>, vector<128x384xbf16>
    %cst_25 = arith.constant dense<0.000000e+00> : vector<8x384xf32>
    %49 = tpu.matmul %47, %48, %cst_25 {dimension_numbers = #tpu.dot_dimension_numbers<[1], [0], [0], [1], [0, 0, 1, 1], [], []>} : vector<8x128xbf16>, vector<128x384xbf16>, vector<8x384xf32> -> vector<8x384xf32>
    %c0_26 = arith.constant 0 : index
    %c0_27 = arith.constant 0 : index
    %50 = vector.load %arg5[%c0_26, %c0_27] : memref<1x384xf32, #tpu.memory_space<vmem>>, vector<1x384xf32>
    %51 = vector.broadcast %50 : vector<1x384xf32> to vector<8x384xf32>
    %52 = arith.addf %49, %51 : vector<8x384xf32>
    %53 = vector.extract_strided_slice %46 {offsets = [0, 0], sizes = [8, 128], strides = [1, 1]} : vector<8x384xf32> to vector<8x128xf32>
    %54 = vector.extract_strided_slice %52 {offsets = [0, 0], sizes = [8, 128], strides = [1, 1]} : vector<8x384xf32> to vector<8x128xf32>
    %55 = arith.addf %53, %54 : vector<8x128xf32>
    %56 = arith.negf %55 : vector<8x128xf32>
    %57 = math.exp %56 : vector<8x128xf32>
    %cst_28 = arith.constant 1.000000e+00 : f32
    %58 = vector.broadcast %cst_28 : f32 to vector<8x128xf32>
    %59 = arith.addf %58, %57 : vector<8x128xf32>
    %60 = arith.divf %58, %59 : vector<8x128xf32>
    %61 = vector.extract_strided_slice %46 {offsets = [0, 128], sizes = [8, 128], strides = [1, 1]} : vector<8x384xf32> to vector<8x128xf32>
    %62 = vector.extract_strided_slice %52 {offsets = [0, 128], sizes = [8, 128], strides = [1, 1]} : vector<8x384xf32> to vector<8x128xf32>
    %63 = arith.addf %61, %62 : vector<8x128xf32>
    %64 = arith.negf %63 : vector<8x128xf32>
    %65 = math.exp %64 : vector<8x128xf32>
    %cst_29 = arith.constant 1.000000e+00 : f32
    %66 = vector.broadcast %cst_29 : f32 to vector<8x128xf32>
    %67 = arith.addf %66, %65 : vector<8x128xf32>
    %68 = arith.divf %66, %67 : vector<8x128xf32>
    %69 = vector.extract_strided_slice %46 {offsets = [0, 256], sizes = [8, 128], strides = [1, 1]} : vector<8x384xf32> to vector<8x128xf32>
    %70 = vector.extract_strided_slice %52 {offsets = [0, 256], sizes = [8, 128], strides = [1, 1]} : vector<8x384xf32> to vector<8x128xf32>
    %71 = arith.mulf %60, %70 : vector<8x128xf32>
    %72 = arith.addf %69, %71 : vector<8x128xf32>
    %73 = math.tanh %72 : vector<8x128xf32>
    %cst_30 = arith.constant 1.000000e+00 : f32
    %74 = vector.broadcast %cst_30 : f32 to vector<8x128xf32>
    %75 = arith.subf %74, %68 : vector<8x128xf32>
    %76 = arith.mulf %75, %73 : vector<8x128xf32>
    %77 = arith.mulf %68, %43 : vector<8x128xf32>
    %78 = arith.addf %76, %77 : vector<8x128xf32>
    %79 = arith.truncf %78 : vector<8x128xf32> to vector<8x128xbf16>
    %c8_31 = arith.constant 8 : index
    %c0_32 = arith.constant 0 : index
    %80 = vector.load %arg7[%c8_31, %c0_32] : memref<64x128xbf16, #tpu.memory_space<vmem>>, vector<8x128xbf16>
    tpu.vector_store %arg7[%c8_31, %c0_32], %79 {strides = array<i32>} : memref<64x128xbf16, #tpu.memory_space<vmem>>, vector<8x128xbf16>,
    %c16 = arith.constant 16 : index
    %c0_33 = arith.constant 0 : index
    %81 = vector.load %arg10[%c16, %c0_33] : memref<64x384xf32, #tpu.memory_space<vmem>>, vector<8x384xf32>
    %82 = arith.truncf %78 : vector<8x128xf32> to vector<8x128xbf16>
    %c0_34 = arith.constant 0 : index
    %c0_35 = arith.constant 0 : index
    %83 = vector.load %arg4[%c0_34, %c0_35] : memref<128x384xbf16, #tpu.memory_space<vmem>>, vector<128x384xbf16>
    %cst_36 = arith.constant dense<0.000000e+00> : vector<8x384xf32>
    %84 = tpu.matmul %82, %83, %cst_36 {dimension_numbers = #tpu.dot_dimension_numbers<[1], [0], [0], [1], [0, 0, 1, 1], [], []>} : vector<8x128xbf16>, vector<128x384xbf16>, vector<8x384xf32> -> vector<8x384xf32>
    %c0_37 = arith.constant 0 : index
    %c0_38 = arith.constant 0 : index
    %85 = vector.load %arg5[%c0_37, %c0_38] : memref<1x384xf32, #tpu.memory_space<vmem>>, vector<1x384xf32>
    %86 = vector.broadcast %85 : vector<1x384xf32> to vector<8x384xf32>
    %87 = arith.addf %84, %86 : vector<8x384xf32>
    %88 = vector.extract_strided_slice %81 {offsets = [0, 0], sizes = [8, 128], strides = [1, 1]} : vector<8x384xf32> to vector<8x128xf32>
    %89 = vector.extract_strided_slice %87 {offsets = [0, 0], sizes = [8, 128], strides = [1, 1]} : vector<8x384xf32> to vector<8x128xf32>
    %90 = arith.addf %88, %89 : vector<8x128xf32>
    %91 = arith.negf %90 : vector<8x128xf32>
    %92 = math.exp %91 : vector<8x128xf32>
    %cst_39 = arith.constant 1.000000e+00 : f32
    %93 = vector.broadcast %cst_39 : f32 to vector<8x128xf32>
    %94 = arith.addf %93, %92 : vector<8x128xf32>
    %95 = arith.divf %93, %94 : vector<8x128xf32>
    %96 = vector.extract_strided_slice %81 {offsets = [0, 128], sizes = [8, 128], strides = [1, 1]} : vector<8x384xf32> to vector<8x128xf32>
    %97 = vector.extract_strided_slice %87 {offsets = [0, 128], sizes = [8, 128], strides = [1, 1]} : vector<8x384xf32> to vector<8x128xf32>
    %98 = arith.addf %96, %97 : vector<8x128xf32>
    %99 = arith.negf %98 : vector<8x128xf32>
    %100 = math.exp %99 : vector<8x128xf32>
    %cst_40 = arith.constant 1.000000e+00 : f32
    %101 = vector.broadcast %cst_40 : f32 to vector<8x128xf32>
    %102 = arith.addf %101, %100 : vector<8x128xf32>
    %103 = arith.divf %101, %102 : vector<8x128xf32>
    %104 = vector.extract_strided_slice %81 {offsets = [0, 256], sizes = [8, 128], strides = [1, 1]} : vector<8x384xf32> to vector<8x128xf32>
    %105 = vector.extract_strided_slice %87 {offsets = [0, 256], sizes = [8, 128], strides = [1, 1]} : vector<8x384xf32> to vector<8x128xf32>
    %106 = arith.mulf %95, %105 : vector<8x128xf32>
    %107 = arith.addf %104, %106 : vector<8x128xf32>
    %108 = math.tanh %107 : vector<8x128xf32>
    %cst_41 = arith.constant 1.000000e+00 : f32
    %109 = vector.broadcast %cst_41 : f32 to vector<8x128xf32>
    %110 = arith.subf %109, %103 : vector<8x128xf32>
    %111 = arith.mulf %110, %108 : vector<8x128xf32>
    %112 = arith.mulf %103, %78 : vector<8x128xf32>
    %113 = arith.addf %111, %112 : vector<8x128xf32>
    %114 = arith.truncf %113 : vector<8x128xf32> to vector<8x128xbf16>
    %c16_42 = arith.constant 16 : index
    %c0_43 = arith.constant 0 : index
    %115 = vector.load %arg7[%c16_42, %c0_43] : memref<64x128xbf16, #tpu.memory_space<vmem>>, vector<8x128xbf16>
    tpu.vector_store %arg7[%c16_42, %c0_43], %114 {strides = array<i32>} : memref<64x128xbf16, #tpu.memory_space<vmem>>, vector<8x128xbf16>,
    %c24 = arith.constant 24 : index
    %c0_44 = arith.constant 0 : index
    %116 = vector.load %arg10[%c24, %c0_44] : memref<64x384xf32, #tpu.memory_space<vmem>>, vector<8x384xf32>
    %117 = arith.truncf %113 : vector<8x128xf32> to vector<8x128xbf16>
    %c0_45 = arith.constant 0 : index
    %c0_46 = arith.constant 0 : index
    %118 = vector.load %arg4[%c0_45, %c0_46] : memref<128x384xbf16, #tpu.memory_space<vmem>>, vector<128x384xbf16>
    %cst_47 = arith.constant dense<0.000000e+00> : vector<8x384xf32>
    %119 = tpu.matmul %117, %118, %cst_47 {dimension_numbers = #tpu.dot_dimension_numbers<[1], [0], [0], [1], [0, 0, 1, 1], [], []>} : vector<8x128xbf16>, vector<128x384xbf16>, vector<8x384xf32> -> vector<8x384xf32>
    %c0_48 = arith.constant 0 : index
    %c0_49 = arith.constant 0 : index
    %120 = vector.load %arg5[%c0_48, %c0_49] : memref<1x384xf32, #tpu.memory_space<vmem>>, vector<1x384xf32>
    %121 = vector.broadcast %120 : vector<1x384xf32> to vector<8x384xf32>
    %122 = arith.addf %119, %121 : vector<8x384xf32>
    %123 = vector.extract_strided_slice %116 {offsets = [0, 0], sizes = [8, 128], strides = [1, 1]} : vector<8x384xf32> to vector<8x128xf32>
    %124 = vector.extract_strided_slice %122 {offsets = [0, 0], sizes = [8, 128], strides = [1, 1]} : vector<8x384xf32> to vector<8x128xf32>
    %125 = arith.addf %123, %124 : vector<8x128xf32>
    %126 = arith.negf %125 : vector<8x128xf32>
    %127 = math.exp %126 : vector<8x128xf32>
    %cst_50 = arith.constant 1.000000e+00 : f32
    %128 = vector.broadcast %cst_50 : f32 to vector<8x128xf32>
    %129 = arith.addf %128, %127 : vector<8x128xf32>
    %130 = arith.divf %128, %129 : vector<8x128xf32>
    %131 = vector.extract_strided_slice %116 {offsets = [0, 128], sizes = [8, 128], strides = [1, 1]} : vector<8x384xf32> to vector<8x128xf32>
    %132 = vector.extract_strided_slice %122 {offsets = [0, 128], sizes = [8, 128], strides = [1, 1]} : vector<8x384xf32> to vector<8x128xf32>
    %133 = arith.addf %131, %132 : vector<8x128xf32>
    %134 = arith.negf %133 : vector<8x128xf32>
    %135 = math.exp %134 : vector<8x128xf32>
    %cst_51 = arith.constant 1.000000e+00 : f32
    %136 = vector.broadcast %cst_51 : f32 to vector<8x128xf32>
    %137 = arith.addf %136, %135 : vector<8x128xf32>
    %138 = arith.divf %136, %137 : vector<8x128xf32>
    %139 = vector.extract_strided_slice %116 {offsets = [0, 256], sizes = [8, 128], strides = [1, 1]} : vector<8x384xf32> to vector<8x128xf32>
    %140 = vector.extract_strided_slice %122 {offsets = [0, 256], sizes = [8, 128], strides = [1, 1]} : vector<8x384xf32> to vector<8x128xf32>
    %141 = arith.mulf %130, %140 : vector<8x128xf32>
    %142 = arith.addf %139, %141 : vector<8x128xf32>
    %143 = math.tanh %142 : vector<8x128xf32>
    %cst_52 = arith.constant 1.000000e+00 : f32
    %144 = vector.broadcast %cst_52 : f32 to vector<8x128xf32>
    %145 = arith.subf %144, %138 : vector<8x128xf32>
    %146 = arith.mulf %145, %143 : vector<8x128xf32>
    %147 = arith.mulf %138, %113 : vector<8x128xf32>
    %148 = arith.addf %146, %147 : vector<8x128xf32>
    %149 = arith.truncf %148 : vector<8x128xf32> to vector<8x128xbf16>
    %c24_53 = arith.constant 24 : index
    %c0_54 = arith.constant 0 : index
    %150 = vector.load %arg7[%c24_53, %c0_54] : memref<64x128xbf16, #tpu.memory_space<vmem>>, vector<8x128xbf16>
    tpu.vector_store %arg7[%c24_53, %c0_54], %149 {strides = array<i32>} : memref<64x128xbf16, #tpu.memory_space<vmem>>, vector<8x128xbf16>,
    %c32 = arith.constant 32 : index
    %c0_55 = arith.constant 0 : index
    %151 = vector.load %arg10[%c32, %c0_55] : memref<64x384xf32, #tpu.memory_space<vmem>>, vector<8x384xf32>
    %152 = arith.truncf %148 : vector<8x128xf32> to vector<8x128xbf16>
    %c0_56 = arith.constant 0 : index
    %c0_57 = arith.constant 0 : index
    %153 = vector.load %arg4[%c0_56, %c0_57] : memref<128x384xbf16, #tpu.memory_space<vmem>>, vector<128x384xbf16>
    %cst_58 = arith.constant dense<0.000000e+00> : vector<8x384xf32>
    %154 = tpu.matmul %152, %153, %cst_58 {dimension_numbers = #tpu.dot_dimension_numbers<[1], [0], [0], [1], [0, 0, 1, 1], [], []>} : vector<8x128xbf16>, vector<128x384xbf16>, vector<8x384xf32> -> vector<8x384xf32>
    %c0_59 = arith.constant 0 : index
    %c0_60 = arith.constant 0 : index
    %155 = vector.load %arg5[%c0_59, %c0_60] : memref<1x384xf32, #tpu.memory_space<vmem>>, vector<1x384xf32>
    %156 = vector.broadcast %155 : vector<1x384xf32> to vector<8x384xf32>
    %157 = arith.addf %154, %156 : vector<8x384xf32>
    %158 = vector.extract_strided_slice %151 {offsets = [0, 0], sizes = [8, 128], strides = [1, 1]} : vector<8x384xf32> to vector<8x128xf32>
    %159 = vector.extract_strided_slice %157 {offsets = [0, 0], sizes = [8, 128], strides = [1, 1]} : vector<8x384xf32> to vector<8x128xf32>
    %160 = arith.addf %158, %159 : vector<8x128xf32>
    %161 = arith.negf %160 : vector<8x128xf32>
    %162 = math.exp %161 : vector<8x128xf32>
    %cst_61 = arith.constant 1.000000e+00 : f32
    %163 = vector.broadcast %cst_61 : f32 to vector<8x128xf32>
    %164 = arith.addf %163, %162 : vector<8x128xf32>
    %165 = arith.divf %163, %164 : vector<8x128xf32>
    %166 = vector.extract_strided_slice %151 {offsets = [0, 128], sizes = [8, 128], strides = [1, 1]} : vector<8x384xf32> to vector<8x128xf32>
    %167 = vector.extract_strided_slice %157 {offsets = [0, 128], sizes = [8, 128], strides = [1, 1]} : vector<8x384xf32> to vector<8x128xf32>
    %168 = arith.addf %166, %167 : vector<8x128xf32>
    %169 = arith.negf %168 : vector<8x128xf32>
    %170 = math.exp %169 : vector<8x128xf32>
    %cst_62 = arith.constant 1.000000e+00 : f32
    %171 = vector.broadcast %cst_62 : f32 to vector<8x128xf32>
    %172 = arith.addf %171, %170 : vector<8x128xf32>
    %173 = arith.divf %171, %172 : vector<8x128xf32>
    %174 = vector.extract_strided_slice %151 {offsets = [0, 256], sizes = [8, 128], strides = [1, 1]} : vector<8x384xf32> to vector<8x128xf32>
    %175 = vector.extract_strided_slice %157 {offsets = [0, 256], sizes = [8, 128], strides = [1, 1]} : vector<8x384xf32> to vector<8x128xf32>
    %176 = arith.mulf %165, %175 : vector<8x128xf32>
    %177 = arith.addf %174, %176 : vector<8x128xf32>
    %178 = math.tanh %177 : vector<8x128xf32>
    %cst_63 = arith.constant 1.000000e+00 : f32
    %179 = vector.broadcast %cst_63 : f32 to vector<8x128xf32>
    %180 = arith.subf %179, %173 : vector<8x128xf32>
    %181 = arith.mulf %180, %178 : vector<8x128xf32>
    %182 = arith.mulf %173, %148 : vector<8x128xf32>
    %183 = arith.addf %181, %182 : vector<8x128xf32>
    %184 = arith.truncf %183 : vector<8x128xf32> to vector<8x128xbf16>
    %c32_64 = arith.constant 32 : index
    %c0_65 = arith.constant 0 : index
    %185 = vector.load %arg7[%c32_64, %c0_65] : memref<64x128xbf16, #tpu.memory_space<vmem>>, vector<8x128xbf16>
    tpu.vector_store %arg7[%c32_64, %c0_65], %184 {strides = array<i32>} : memref<64x128xbf16, #tpu.memory_space<vmem>>, vector<8x128xbf16>,
    %c40 = arith.constant 40 : index
    %c0_66 = arith.constant 0 : index
    %186 = vector.load %arg10[%c40, %c0_66] : memref<64x384xf32, #tpu.memory_space<vmem>>, vector<8x384xf32>
    %187 = arith.truncf %183 : vector<8x128xf32> to vector<8x128xbf16>
    %c0_67 = arith.constant 0 : index
    %c0_68 = arith.constant 0 : index
    %188 = vector.load %arg4[%c0_67, %c0_68] : memref<128x384xbf16, #tpu.memory_space<vmem>>, vector<128x384xbf16>
    %cst_69 = arith.constant dense<0.000000e+00> : vector<8x384xf32>
    %189 = tpu.matmul %187, %188, %cst_69 {dimension_numbers = #tpu.dot_dimension_numbers<[1], [0], [0], [1], [0, 0, 1, 1], [], []>} : vector<8x128xbf16>, vector<128x384xbf16>, vector<8x384xf32> -> vector<8x384xf32>
    %c0_70 = arith.constant 0 : index
    %c0_71 = arith.constant 0 : index
    %190 = vector.load %arg5[%c0_70, %c0_71] : memref<1x384xf32, #tpu.memory_space<vmem>>, vector<1x384xf32>
    %191 = vector.broadcast %190 : vector<1x384xf32> to vector<8x384xf32>
    %192 = arith.addf %189, %191 : vector<8x384xf32>
    %193 = vector.extract_strided_slice %186 {offsets = [0, 0], sizes = [8, 128], strides = [1, 1]} : vector<8x384xf32> to vector<8x128xf32>
    %194 = vector.extract_strided_slice %192 {offsets = [0, 0], sizes = [8, 128], strides = [1, 1]} : vector<8x384xf32> to vector<8x128xf32>
    %195 = arith.addf %193, %194 : vector<8x128xf32>
    %196 = arith.negf %195 : vector<8x128xf32>
    %197 = math.exp %196 : vector<8x128xf32>
    %cst_72 = arith.constant 1.000000e+00 : f32
    %198 = vector.broadcast %cst_72 : f32 to vector<8x128xf32>
    %199 = arith.addf %198, %197 : vector<8x128xf32>
    %200 = arith.divf %198, %199 : vector<8x128xf32>
    %201 = vector.extract_strided_slice %186 {offsets = [0, 128], sizes = [8, 128], strides = [1, 1]} : vector<8x384xf32> to vector<8x128xf32>
    %202 = vector.extract_strided_slice %192 {offsets = [0, 128], sizes = [8, 128], strides = [1, 1]} : vector<8x384xf32> to vector<8x128xf32>
    %203 = arith.addf %201, %202 : vector<8x128xf32>
    %204 = arith.negf %203 : vector<8x128xf32>
    %205 = math.exp %204 : vector<8x128xf32>
    %cst_73 = arith.constant 1.000000e+00 : f32
    %206 = vector.broadcast %cst_73 : f32 to vector<8x128xf32>
    %207 = arith.addf %206, %205 : vector<8x128xf32>
    %208 = arith.divf %206, %207 : vector<8x128xf32>
    %209 = vector.extract_strided_slice %186 {offsets = [0, 256], sizes = [8, 128], strides = [1, 1]} : vector<8x384xf32> to vector<8x128xf32>
    %210 = vector.extract_strided_slice %192 {offsets = [0, 256], sizes = [8, 128], strides = [1, 1]} : vector<8x384xf32> to vector<8x128xf32>
    %211 = arith.mulf %200, %210 : vector<8x128xf32>
    %212 = arith.addf %209, %211 : vector<8x128xf32>
    %213 = math.tanh %212 : vector<8x128xf32>
    %cst_74 = arith.constant 1.000000e+00 : f32
    %214 = vector.broadcast %cst_74 : f32 to vector<8x128xf32>
    %215 = arith.subf %214, %208 : vector<8x128xf32>
    %216 = arith.mulf %215, %213 : vector<8x128xf32>
    %217 = arith.mulf %208, %183 : vector<8x128xf32>
    %218 = arith.addf %216, %217 : vector<8x128xf32>
    %219 = arith.truncf %218 : vector<8x128xf32> to vector<8x128xbf16>
    %c40_75 = arith.constant 40 : index
    %c0_76 = arith.constant 0 : index
    %220 = vector.load %arg7[%c40_75, %c0_76] : memref<64x128xbf16, #tpu.memory_space<vmem>>, vector<8x128xbf16>
    tpu.vector_store %arg7[%c40_75, %c0_76], %219 {strides = array<i32>} : memref<64x128xbf16, #tpu.memory_space<vmem>>, vector<8x128xbf16>,
    %c48 = arith.constant 48 : index
    %c0_77 = arith.constant 0 : index
    %221 = vector.load %arg10[%c48, %c0_77] : memref<64x384xf32, #tpu.memory_space<vmem>>, vector<8x384xf32>
    %222 = arith.truncf %218 : vector<8x128xf32> to vector<8x128xbf16>
    %c0_78 = arith.constant 0 : index
    %c0_79 = arith.constant 0 : index
    %223 = vector.load %arg4[%c0_78, %c0_79] : memref<128x384xbf16, #tpu.memory_space<vmem>>, vector<128x384xbf16>
    %cst_80 = arith.constant dense<0.000000e+00> : vector<8x384xf32>
    %224 = tpu.matmul %222, %223, %cst_80 {dimension_numbers = #tpu.dot_dimension_numbers<[1], [0], [0], [1], [0, 0, 1, 1], [], []>} : vector<8x128xbf16>, vector<128x384xbf16>, vector<8x384xf32> -> vector<8x384xf32>
    %c0_81 = arith.constant 0 : index
    %c0_82 = arith.constant 0 : index
    %225 = vector.load %arg5[%c0_81, %c0_82] : memref<1x384xf32, #tpu.memory_space<vmem>>, vector<1x384xf32>
    %226 = vector.broadcast %225 : vector<1x384xf32> to vector<8x384xf32>
    %227 = arith.addf %224, %226 : vector<8x384xf32>
    %228 = vector.extract_strided_slice %221 {offsets = [0, 0], sizes = [8, 128], strides = [1, 1]} : vector<8x384xf32> to vector<8x128xf32>
    %229 = vector.extract_strided_slice %227 {offsets = [0, 0], sizes = [8, 128], strides = [1, 1]} : vector<8x384xf32> to vector<8x128xf32>
    %230 = arith.addf %228, %229 : vector<8x128xf32>
    %231 = arith.negf %230 : vector<8x128xf32>
    %232 = math.exp %231 : vector<8x128xf32>
    %cst_83 = arith.constant 1.000000e+00 : f32
    %233 = vector.broadcast %cst_83 : f32 to vector<8x128xf32>
    %234 = arith.addf %233, %232 : vector<8x128xf32>
    %235 = arith.divf %233, %234 : vector<8x128xf32>
    %236 = vector.extract_strided_slice %221 {offsets = [0, 128], sizes = [8, 128], strides = [1, 1]} : vector<8x384xf32> to vector<8x128xf32>
    %237 = vector.extract_strided_slice %227 {offsets = [0, 128], sizes = [8, 128], strides = [1, 1]} : vector<8x384xf32> to vector<8x128xf32>
    %238 = arith.addf %236, %237 : vector<8x128xf32>
    %239 = arith.negf %238 : vector<8x128xf32>
    %240 = math.exp %239 : vector<8x128xf32>
    %cst_84 = arith.constant 1.000000e+00 : f32
    %241 = vector.broadcast %cst_84 : f32 to vector<8x128xf32>
    %242 = arith.addf %241, %240 : vector<8x128xf32>
    %243 = arith.divf %241, %242 : vector<8x128xf32>
    %244 = vector.extract_strided_slice %221 {offsets = [0, 256], sizes = [8, 128], strides = [1, 1]} : vector<8x384xf32> to vector<8x128xf32>
    %245 = vector.extract_strided_slice %227 {offsets = [0, 256], sizes = [8, 128], strides = [1, 1]} : vector<8x384xf32> to vector<8x128xf32>
    %246 = arith.mulf %235, %245 : vector<8x128xf32>
    %247 = arith.addf %244, %246 : vector<8x128xf32>
    %248 = math.tanh %247 : vector<8x128xf32>
    %cst_85 = arith.constant 1.000000e+00 : f32
    %249 = vector.broadcast %cst_85 : f32 to vector<8x128xf32>
    %250 = arith.subf %249, %243 : vector<8x128xf32>
    %251 = arith.mulf %250, %248 : vector<8x128xf32>
    %252 = arith.mulf %243, %218 : vector<8x128xf32>
    %253 = arith.addf %251, %252 : vector<8x128xf32>
    %254 = arith.truncf %253 : vector<8x128xf32> to vector<8x128xbf16>
    %c48_86 = arith.constant 48 : index
    %c0_87 = arith.constant 0 : index
    %255 = vector.load %arg7[%c48_86, %c0_87] : memref<64x128xbf16, #tpu.memory_space<vmem>>, vector<8x128xbf16>
    tpu.vector_store %arg7[%c48_86, %c0_87], %254 {strides = array<i32>} : memref<64x128xbf16, #tpu.memory_space<vmem>>, vector<8x128xbf16>,
    %c56 = arith.constant 56 : index
    %c0_88 = arith.constant 0 : index
    %256 = vector.load %arg10[%c56, %c0_88] : memref<64x384xf32, #tpu.memory_space<vmem>>, vector<8x384xf32>
    %257 = arith.truncf %253 : vector<8x128xf32> to vector<8x128xbf16>
    %c0_89 = arith.constant 0 : index
    %c0_90 = arith.constant 0 : index
    %258 = vector.load %arg4[%c0_89, %c0_90] : memref<128x384xbf16, #tpu.memory_space<vmem>>, vector<128x384xbf16>
    %cst_91 = arith.constant dense<0.000000e+00> : vector<8x384xf32>
    %259 = tpu.matmul %257, %258, %cst_91 {dimension_numbers = #tpu.dot_dimension_numbers<[1], [0], [0], [1], [0, 0, 1, 1], [], []>} : vector<8x128xbf16>, vector<128x384xbf16>, vector<8x384xf32> -> vector<8x384xf32>
    %c0_92 = arith.constant 0 : index
    %c0_93 = arith.constant 0 : index
    %260 = vector.load %arg5[%c0_92, %c0_93] : memref<1x384xf32, #tpu.memory_space<vmem>>, vector<1x384xf32>
    %261 = vector.broadcast %260 : vector<1x384xf32> to vector<8x384xf32>
    %262 = arith.addf %259, %261 : vector<8x384xf32>
    %263 = vector.extract_strided_slice %256 {offsets = [0, 0], sizes = [8, 128], strides = [1, 1]} : vector<8x384xf32> to vector<8x128xf32>
    %264 = vector.extract_strided_slice %262 {offsets = [0, 0], sizes = [8, 128], strides = [1, 1]} : vector<8x384xf32> to vector<8x128xf32>
    %265 = arith.addf %263, %264 : vector<8x128xf32>
    %266 = arith.negf %265 : vector<8x128xf32>
    %267 = math.exp %266 : vector<8x128xf32>
    %cst_94 = arith.constant 1.000000e+00 : f32
    %268 = vector.broadcast %cst_94 : f32 to vector<8x128xf32>
    %269 = arith.addf %268, %267 : vector<8x128xf32>
    %270 = arith.divf %268, %269 : vector<8x128xf32>
    %271 = vector.extract_strided_slice %256 {offsets = [0, 128], sizes = [8, 128], strides = [1, 1]} : vector<8x384xf32> to vector<8x128xf32>
    %272 = vector.extract_strided_slice %262 {offsets = [0, 128], sizes = [8, 128], strides = [1, 1]} : vector<8x384xf32> to vector<8x128xf32>
    %273 = arith.addf %271, %272 : vector<8x128xf32>
    %274 = arith.negf %273 : vector<8x128xf32>
    %275 = math.exp %274 : vector<8x128xf32>
    %cst_95 = arith.constant 1.000000e+00 : f32
    %276 = vector.broadcast %cst_95 : f32 to vector<8x128xf32>
    %277 = arith.addf %276, %275 : vector<8x128xf32>
    %278 = arith.divf %276, %277 : vector<8x128xf32>
    %279 = vector.extract_strided_slice %256 {offsets = [0, 256], sizes = [8, 128], strides = [1, 1]} : vector<8x384xf32> to vector<8x128xf32>
    %280 = vector.extract_strided_slice %262 {offsets = [0, 256], sizes = [8, 128], strides = [1, 1]} : vector<8x384xf32> to vector<8x128xf32>
    %281 = arith.mulf %270, %280 : vector<8x128xf32>
    %282 = arith.addf %279, %281 : vector<8x128xf32>
    %283 = math.tanh %282 : vector<8x128xf32>
    %cst_96 = arith.constant 1.000000e+00 : f32
    %284 = vector.broadcast %cst_96 : f32 to vector<8x128xf32>
    %285 = arith.subf %284, %278 : vector<8x128xf32>
    %286 = arith.mulf %285, %283 : vector<8x128xf32>
    %287 = arith.mulf %278, %253 : vector<8x128xf32>
    %288 = arith.addf %286, %287 : vector<8x128xf32>
    %289 = arith.truncf %288 : vector<8x128xf32> to vector<8x128xbf16>
    %c56_97 = arith.constant 56 : index
    %c0_98 = arith.constant 0 : index
    %290 = vector.load %arg7[%c56_97, %c0_98] : memref<64x128xbf16, #tpu.memory_space<vmem>>, vector<8x128xbf16>
    tpu.vector_store %arg7[%c56_97, %c0_98], %289 {strides = array<i32>} : memref<64x128xbf16, #tpu.memory_space<vmem>>, vector<8x128xbf16>,
    %c0_99 = arith.constant 0 : index
    %c0_100 = arith.constant 0 : index
    %291 = vector.load %arg9[%c0_99, %c0_100] : memref<8x128xf32, #tpu.memory_space<vmem>>, vector<8x128xf32>
    tpu.vector_store %arg9[%c0_99, %c0_100], %288 {strides = array<i32>} : memref<8x128xf32, #tpu.memory_space<vmem>>, vector<8x128xf32>,
    %c0_101 = arith.constant 0 : index
    %c0_102 = arith.constant 0 : index
    %292 = vector.load %arg8[%c0_101, %c0_102] : memref<8x128xf32, #tpu.memory_space<vmem>>, vector<8x128xf32>
    tpu.vector_store %arg8[%c0_101, %c0_102], %288 {strides = array<i32>} : memref<8x128xf32, #tpu.memory_space<vmem>>, vector<8x128xf32>,
    return
  }
  func.func @transform_0(%arg0: i32) -> (i32, i32) {
    %c0_i32 = arith.constant 0 : i32
    %c0_i32_0 = arith.constant 0 : i32
    return %arg0, %c0_i32 : i32, i32
  }
  func.func @transform_1(%arg0: i32) -> (i32, i32) {
    %c0_i32 = arith.constant 0 : i32
    %c0_i32_0 = arith.constant 0 : i32
    %c0_i32_1 = arith.constant 0 : i32
    return %c0_i32, %c0_i32_0 : i32, i32
  }
  func.func @transform_2(%arg0: i32) -> (i32, i32) {
    %c0_i32 = arith.constant 0 : i32
    %c0_i32_0 = arith.constant 0 : i32
    %c0_i32_1 = arith.constant 0 : i32
    return %c0_i32, %c0_i32_0 : i32, i32
  }
  func.func @transform_3(%arg0: i32) -> (i32, i32) {
    %c0_i32 = arith.constant 0 : i32
    %c0_i32_0 = arith.constant 0 : i32
    %c0_i32_1 = arith.constant 0 : i32
    return %c0_i32, %c0_i32_0 : i32, i32
  }
  func.func @transform_4(%arg0: i32) -> (i32, i32) {
    %c0_i32 = arith.constant 0 : i32
    %c0_i32_0 = arith.constant 0 : i32
    %c0_i32_1 = arith.constant 0 : i32
    return %c0_i32, %c0_i32_0 : i32, i32
  }
  func.func @transform_5(%arg0: i32) -> (i32, i32) {
    %c0_i32 = arith.constant 0 : i32
    %c0_i32_0 = arith.constant 0 : i32
    %c0_i32_1 = arith.constant 0 : i32
    return %c0_i32, %c0_i32_0 : i32, i32
  }
  func.func @transform_6(%arg0: i32) -> (i32, i32) {
    %c0_i32 = arith.constant 0 : i32
    %c0_i32_0 = arith.constant 0 : i32
    return %arg0, %c0_i32 : i32, i32
  }
  func.func @transform_7(%arg0: i32) -> (i32, i32) {
    %c0_i32 = arith.constant 0 : i32
    %c0_i32_0 = arith.constant 0 : i32
    %c0_i32_1 = arith.constant 0 : i32
    return %c0_i32, %c0_i32_0 : i32, i32
  }
}

module attributes {stable_mosaic.version = 11 : i64} {
  func.func @_gru_layer_kernel(%arg0: i32, %arg1: memref<64x32xbf16, #tpu.memory_space<vmem>>, %arg2: memref<32x384xbf16, #tpu.memory_space<vmem>>, %arg3: memref<1x384xf32, #tpu.memory_space<vmem>>, %arg4: memref<128x384xbf16, #tpu.memory_space<vmem>>, %arg5: memref<1x384xf32, #tpu.memory_space<vmem>>, %arg6: memref<8x128xf32, #tpu.memory_space<vmem>>, %arg7: memref<64x128xbf16, #tpu.memory_space<vmem>>, %arg8: memref<8x128xf32, #tpu.memory_space<vmem>>, %arg9: memref<8x128xf32, #tpu.memory_space<vmem>>, %arg10: memref<64x384xf32, #tpu.memory_space<vmem>>) attributes {dimension_semantics = [#tpu.dimension_semantics<arbitrary>], iteration_bounds = array<i64: 1>, scalar_prefetch = 0 : i64, scratch_operands = 2 : i64, tpu.core_type = #tpu.core_type<tc>, window_params = [{transform_indices = @transform_0, window_bounds = array<i64: 64, 32>}, {pipeline_mode = #tpu.pipeline_mode<synchronous>, transform_indices = @transform_1, window_bounds = array<i64: 32, 384>}, {pipeline_mode = #tpu.pipeline_mode<synchronous>, transform_indices = @transform_2, window_bounds = array<i64: 1, 384>}, {pipeline_mode = #tpu.pipeline_mode<synchronous>, transform_indices = @transform_3, window_bounds = array<i64: 128, 384>}, {pipeline_mode = #tpu.pipeline_mode<synchronous>, transform_indices = @transform_4, window_bounds = array<i64: 1, 384>}, {pipeline_mode = #tpu.pipeline_mode<synchronous>, transform_indices = @transform_5, window_bounds = array<i64: 8, 128>}, {transform_indices = @transform_6, window_bounds = array<i64: 64, 128>}, {pipeline_mode = #tpu.pipeline_mode<synchronous>, transform_indices = @transform_7, window_bounds = array<i64: 8, 128>}]} {
    %c0_i32 = arith.constant 0 : i32
    %0 = arith.cmpi eq, %arg0, %c0_i32 : i32
    %1 = arith.extui %0 : i1 to i32
    %c0_i32_0 = arith.constant 0 : i32
    %2 = arith.cmpi ne, %1, %c0_i32_0 : i32
    scf.if %2 {
      %c0_103 = arith.constant 0 : index
      %c0_104 = arith.constant 0 : index
      %293 = vector.load %arg6[%c0_103, %c0_104] : memref<8x128xf32, #tpu.memory_space<vmem>>, vector<8x128xf32>
      %c0_105 = arith.constant 0 : index
      %c0_106 = arith.constant 0 : index
      %294 = vector.load %arg9[%c0_105, %c0_106] : memref<8x128xf32, #tpu.memory_space<vmem>>, vector<8x128xf32>
      tpu.vector_store %arg9[%c0_105, %c0_106], %293 {strides = array<i32>} : memref<8x128xf32, #tpu.memory_space<vmem>>, vector<8x128xf32>,
    } else {
    }
    %c0 = arith.constant 0 : index
    %c0_1 = arith.constant 0 : index
    %3 = vector.load %arg1[%c0, %c0_1] : memref<64x32xbf16, #tpu.memory_space<vmem>>, vector<64x32xbf16>
    %c0_2 = arith.constant 0 : index
    %c0_3 = arith.constant 0 : index
    %4 = vector.load %arg2[%c0_2, %c0_3] : memref<32x384xbf16, #tpu.memory_space<vmem>>, vector<32x384xbf16>
    %cst = arith.constant dense<0.000000e+00> : vector<64x384xf32>
    %5 = tpu.matmul %3, %4, %cst {dimension_numbers = #tpu.dot_dimension_numbers<[1], [0], [0], [1], [0, 0, 1, 1], [], []>} : vector<64x32xbf16>, vector<32x384xbf16>, vector<64x384xf32> -> vector<64x384xf32>
    %c0_4 = arith.constant 0 : index
    %c0_5 = arith.constant 0 : index
    %6 = vector.load %arg3[%c0_4, %c0_5] : memref<1x384xf32, #tpu.memory_space<vmem>>, vector<1x384xf32>
    %7 = vector.broadcast %6 : vector<1x384xf32> to vector<64x384xf32>
    %8 = arith.addf %5, %7 : vector<64x384xf32>
    %c0_6 = arith.constant 0 : index
    %c0_7 = arith.constant 0 : index
    %9 = vector.load %arg10[%c0_6, %c0_7] : memref<64x384xf32, #tpu.memory_space<vmem>>, vector<64x384xf32>
    tpu.vector_store %arg10[%c0_6, %c0_7], %8 {strides = array<i32>} : memref<64x384xf32, #tpu.memory_space<vmem>>, vector<64x384xf32>,
    %c0_8 = arith.constant 0 : index
    %c0_9 = arith.constant 0 : index
    %10 = vector.load %arg9[%c0_8, %c0_9] : memref<8x128xf32, #tpu.memory_space<vmem>>, vector<8x128xf32>
    %c0_10 = arith.constant 0 : index
    %c0_11 = arith.constant 0 : index
    %11 = vector.load %arg10[%c0_10, %c0_11] : memref<64x384xf32, #tpu.memory_space<vmem>>, vector<8x384xf32>
    %12 = arith.truncf %10 : vector<8x128xf32> to vector<8x128xbf16>
    %c0_12 = arith.constant 0 : index
    %c0_13 = arith.constant 0 : index
    %13 = vector.load %arg4[%c0_12, %c0_13] : memref<128x384xbf16, #tpu.memory_space<vmem>>, vector<128x384xbf16>
    %cst_14 = arith.constant dense<0.000000e+00> : vector<8x384xf32>
    %14 = tpu.matmul %12, %13, %cst_14 {dimension_numbers = #tpu.dot_dimension_numbers<[1], [0], [0], [1], [0, 0, 1, 1], [], []>} : vector<8x128xbf16>, vector<128x384xbf16>, vector<8x384xf32> -> vector<8x384xf32>
    %c0_15 = arith.constant 0 : index
    %c0_16 = arith.constant 0 : index
    %15 = vector.load %arg5[%c0_15, %c0_16] : memref<1x384xf32, #tpu.memory_space<vmem>>, vector<1x384xf32>
    %16 = vector.broadcast %15 : vector<1x384xf32> to vector<8x384xf32>
    %17 = arith.addf %14, %16 : vector<8x384xf32>
    %18 = vector.extract_strided_slice %11 {offsets = [0, 0], sizes = [8, 128], strides = [1, 1]} : vector<8x384xf32> to vector<8x128xf32>
    %19 = vector.extract_strided_slice %17 {offsets = [0, 0], sizes = [8, 128], strides = [1, 1]} : vector<8x384xf32> to vector<8x128xf32>
    %20 = arith.addf %18, %19 : vector<8x128xf32>
    %21 = arith.negf %20 : vector<8x128xf32>
    %22 = math.exp %21 : vector<8x128xf32>
    %cst_17 = arith.constant 1.000000e+00 : f32
    %23 = vector.broadcast %cst_17 : f32 to vector<8x128xf32>
    %24 = arith.addf %23, %22 : vector<8x128xf32>
    %25 = arith.divf %23, %24 : vector<8x128xf32>
    %26 = vector.extract_strided_slice %11 {offsets = [0, 128], sizes = [8, 128], strides = [1, 1]} : vector<8x384xf32> to vector<8x128xf32>
    %27 = vector.extract_strided_slice %17 {offsets = [0, 128], sizes = [8, 128], strides = [1, 1]} : vector<8x384xf32> to vector<8x128xf32>
    %28 = arith.addf %26, %27 : vector<8x128xf32>
    %29 = arith.negf %28 : vector<8x128xf32>
    %30 = math.exp %29 : vector<8x128xf32>
    %cst_18 = arith.constant 1.000000e+00 : f32
    %31 = vector.broadcast %cst_18 : f32 to vector<8x128xf32>
    %32 = arith.addf %31, %30 : vector<8x128xf32>
    %33 = arith.divf %31, %32 : vector<8x128xf32>
    %34 = vector.extract_strided_slice %11 {offsets = [0, 256], sizes = [8, 128], strides = [1, 1]} : vector<8x384xf32> to vector<8x128xf32>
    %35 = vector.extract_strided_slice %17 {offsets = [0, 256], sizes = [8, 128], strides = [1, 1]} : vector<8x384xf32> to vector<8x128xf32>
    %36 = arith.mulf %25, %35 : vector<8x128xf32>
    %37 = arith.addf %34, %36 : vector<8x128xf32>
    %38 = math.tanh %37 : vector<8x128xf32>
    %cst_19 = arith.constant 1.000000e+00 : f32
    %39 = vector.broadcast %cst_19 : f32 to vector<8x128xf32>
    %40 = arith.subf %39, %33 : vector<8x128xf32>
    %41 = arith.mulf %40, %38 : vector<8x128xf32>
    %42 = arith.mulf %33, %10 : vector<8x128xf32>
    %43 = arith.addf %41, %42 : vector<8x128xf32>
    %44 = arith.truncf %43 : vector<8x128xf32> to vector<8x128xbf16>
    %c0_20 = arith.constant 0 : index
    %c0_21 = arith.constant 0 : index
    %45 = vector.load %arg7[%c0_20, %c0_21] : memref<64x128xbf16, #tpu.memory_space<vmem>>, vector<8x128xbf16>
    tpu.vector_store %arg7[%c0_20, %c0_21], %44 {strides = array<i32>} : memref<64x128xbf16, #tpu.memory_space<vmem>>, vector<8x128xbf16>,
    %c8 = arith.constant 8 : index
    %c0_22 = arith.constant 0 : index
    %46 = vector.load %arg10[%c8, %c0_22] : memref<64x384xf32, #tpu.memory_space<vmem>>, vector<8x384xf32>
    %47 = arith.truncf %43 : vector<8x128xf32> to vector<8x128xbf16>
    %c0_23 = arith.constant 0 : index
    %c0_24 = arith.constant 0 : index
    %48 = vector.load %arg4[%c0_23, %c0_24] : memref<128x384xbf16, #tpu.memory_space<vmem>>, vector<128x384xbf16>
    %cst_25 = arith.constant dense<0.000000e+00> : vector<8x384xf32>
    %49 = tpu.matmul %47, %48, %cst_25 {dimension_numbers = #tpu.dot_dimension_numbers<[1], [0], [0], [1], [0, 0, 1, 1], [], []>} : vector<8x128xbf16>, vector<128x384xbf16>, vector<8x384xf32> -> vector<8x384xf32>
    %c0_26 = arith.constant 0 : index
    %c0_27 = arith.constant 0 : index
    %50 = vector.load %arg5[%c0_26, %c0_27] : memref<1x384xf32, #tpu.memory_space<vmem>>, vector<1x384xf32>
    %51 = vector.broadcast %50 : vector<1x384xf32> to vector<8x384xf32>
    %52 = arith.addf %49, %51 : vector<8x384xf32>
    %53 = vector.extract_strided_slice %46 {offsets = [0, 0], sizes = [8, 128], strides = [1, 1]} : vector<8x384xf32> to vector<8x128xf32>
    %54 = vector.extract_strided_slice %52 {offsets = [0, 0], sizes = [8, 128], strides = [1, 1]} : vector<8x384xf32> to vector<8x128xf32>
    %55 = arith.addf %53, %54 : vector<8x128xf32>
    %56 = arith.negf %55 : vector<8x128xf32>
    %57 = math.exp %56 : vector<8x128xf32>
    %cst_28 = arith.constant 1.000000e+00 : f32
    %58 = vector.broadcast %cst_28 : f32 to vector<8x128xf32>
    %59 = arith.addf %58, %57 : vector<8x128xf32>
    %60 = arith.divf %58, %59 : vector<8x128xf32>
    %61 = vector.extract_strided_slice %46 {offsets = [0, 128], sizes = [8, 128], strides = [1, 1]} : vector<8x384xf32> to vector<8x128xf32>
    %62 = vector.extract_strided_slice %52 {offsets = [0, 128], sizes = [8, 128], strides = [1, 1]} : vector<8x384xf32> to vector<8x128xf32>
    %63 = arith.addf %61, %62 : vector<8x128xf32>
    %64 = arith.negf %63 : vector<8x128xf32>
    %65 = math.exp %64 : vector<8x128xf32>
    %cst_29 = arith.constant 1.000000e+00 : f32
    %66 = vector.broadcast %cst_29 : f32 to vector<8x128xf32>
    %67 = arith.addf %66, %65 : vector<8x128xf32>
    %68 = arith.divf %66, %67 : vector<8x128xf32>
    %69 = vector.extract_strided_slice %46 {offsets = [0, 256], sizes = [8, 128], strides = [1, 1]} : vector<8x384xf32> to vector<8x128xf32>
    %70 = vector.extract_strided_slice %52 {offsets = [0, 256], sizes = [8, 128], strides = [1, 1]} : vector<8x384xf32> to vector<8x128xf32>
    %71 = arith.mulf %60, %70 : vector<8x128xf32>
    %72 = arith.addf %69, %71 : vector<8x128xf32>
    %73 = math.tanh %72 : vector<8x128xf32>
    %cst_30 = arith.constant 1.000000e+00 : f32
    %74 = vector.broadcast %cst_30 : f32 to vector<8x128xf32>
    %75 = arith.subf %74, %68 : vector<8x128xf32>
    %76 = arith.mulf %75, %73 : vector<8x128xf32>
    %77 = arith.mulf %68, %43 : vector<8x128xf32>
    %78 = arith.addf %76, %77 : vector<8x128xf32>
    %79 = arith.truncf %78 : vector<8x128xf32> to vector<8x128xbf16>
    %c8_31 = arith.constant 8 : index
    %c0_32 = arith.constant 0 : index
    %80 = vector.load %arg7[%c8_31, %c0_32] : memref<64x128xbf16, #tpu.memory_space<vmem>>, vector<8x128xbf16>
    tpu.vector_store %arg7[%c8_31, %c0_32], %79 {strides = array<i32>} : memref<64x128xbf16, #tpu.memory_space<vmem>>, vector<8x128xbf16>,
    %c16 = arith.constant 16 : index
    %c0_33 = arith.constant 0 : index
    %81 = vector.load %arg10[%c16, %c0_33] : memref<64x384xf32, #tpu.memory_space<vmem>>, vector<8x384xf32>
    %82 = arith.truncf %78 : vector<8x128xf32> to vector<8x128xbf16>
    %c0_34 = arith.constant 0 : index
    %c0_35 = arith.constant 0 : index
    %83 = vector.load %arg4[%c0_34, %c0_35] : memref<128x384xbf16, #tpu.memory_space<vmem>>, vector<128x384xbf16>
    %cst_36 = arith.constant dense<0.000000e+00> : vector<8x384xf32>
    %84 = tpu.matmul %82, %83, %cst_36 {dimension_numbers = #tpu.dot_dimension_numbers<[1], [0], [0], [1], [0, 0, 1, 1], [], []>} : vector<8x128xbf16>, vector<128x384xbf16>, vector<8x384xf32> -> vector<8x384xf32>
    %c0_37 = arith.constant 0 : index
    %c0_38 = arith.constant 0 : index
    %85 = vector.load %arg5[%c0_37, %c0_38] : memref<1x384xf32, #tpu.memory_space<vmem>>, vector<1x384xf32>
    %86 = vector.broadcast %85 : vector<1x384xf32> to vector<8x384xf32>
    %87 = arith.addf %84, %86 : vector<8x384xf32>
    %88 = vector.extract_strided_slice %81 {offsets = [0, 0], sizes = [8, 128], strides = [1, 1]} : vector<8x384xf32> to vector<8x128xf32>
    %89 = vector.extract_strided_slice %87 {offsets = [0, 0], sizes = [8, 128], strides = [1, 1]} : vector<8x384xf32> to vector<8x128xf32>
    %90 = arith.addf %88, %89 : vector<8x128xf32>
    %91 = arith.negf %90 : vector<8x128xf32>
    %92 = math.exp %91 : vector<8x128xf32>
    %cst_39 = arith.constant 1.000000e+00 : f32
    %93 = vector.broadcast %cst_39 : f32 to vector<8x128xf32>
    %94 = arith.addf %93, %92 : vector<8x128xf32>
    %95 = arith.divf %93, %94 : vector<8x128xf32>
    %96 = vector.extract_strided_slice %81 {offsets = [0, 128], sizes = [8, 128], strides = [1, 1]} : vector<8x384xf32> to vector<8x128xf32>
    %97 = vector.extract_strided_slice %87 {offsets = [0, 128], sizes = [8, 128], strides = [1, 1]} : vector<8x384xf32> to vector<8x128xf32>
    %98 = arith.addf %96, %97 : vector<8x128xf32>
    %99 = arith.negf %98 : vector<8x128xf32>
    %100 = math.exp %99 : vector<8x128xf32>
    %cst_40 = arith.constant 1.000000e+00 : f32
    %101 = vector.broadcast %cst_40 : f32 to vector<8x128xf32>
    %102 = arith.addf %101, %100 : vector<8x128xf32>
    %103 = arith.divf %101, %102 : vector<8x128xf32>
    %104 = vector.extract_strided_slice %81 {offsets = [0, 256], sizes = [8, 128], strides = [1, 1]} : vector<8x384xf32> to vector<8x128xf32>
    %105 = vector.extract_strided_slice %87 {offsets = [0, 256], sizes = [8, 128], strides = [1, 1]} : vector<8x384xf32> to vector<8x128xf32>
    %106 = arith.mulf %95, %105 : vector<8x128xf32>
    %107 = arith.addf %104, %106 : vector<8x128xf32>
    %108 = math.tanh %107 : vector<8x128xf32>
    %cst_41 = arith.constant 1.000000e+00 : f32
    %109 = vector.broadcast %cst_41 : f32 to vector<8x128xf32>
    %110 = arith.subf %109, %103 : vector<8x128xf32>
    %111 = arith.mulf %110, %108 : vector<8x128xf32>
    %112 = arith.mulf %103, %78 : vector<8x128xf32>
    %113 = arith.addf %111, %112 : vector<8x128xf32>
    %114 = arith.truncf %113 : vector<8x128xf32> to vector<8x128xbf16>
    %c16_42 = arith.constant 16 : index
    %c0_43 = arith.constant 0 : index
    %115 = vector.load %arg7[%c16_42, %c0_43] : memref<64x128xbf16, #tpu.memory_space<vmem>>, vector<8x128xbf16>
    tpu.vector_store %arg7[%c16_42, %c0_43], %114 {strides = array<i32>} : memref<64x128xbf16, #tpu.memory_space<vmem>>, vector<8x128xbf16>,
    %c24 = arith.constant 24 : index
    %c0_44 = arith.constant 0 : index
    %116 = vector.load %arg10[%c24, %c0_44] : memref<64x384xf32, #tpu.memory_space<vmem>>, vector<8x384xf32>
    %117 = arith.truncf %113 : vector<8x128xf32> to vector<8x128xbf16>
    %c0_45 = arith.constant 0 : index
    %c0_46 = arith.constant 0 : index
    %118 = vector.load %arg4[%c0_45, %c0_46] : memref<128x384xbf16, #tpu.memory_space<vmem>>, vector<128x384xbf16>
    %cst_47 = arith.constant dense<0.000000e+00> : vector<8x384xf32>
    %119 = tpu.matmul %117, %118, %cst_47 {dimension_numbers = #tpu.dot_dimension_numbers<[1], [0], [0], [1], [0, 0, 1, 1], [], []>} : vector<8x128xbf16>, vector<128x384xbf16>, vector<8x384xf32> -> vector<8x384xf32>
    %c0_48 = arith.constant 0 : index
    %c0_49 = arith.constant 0 : index
    %120 = vector.load %arg5[%c0_48, %c0_49] : memref<1x384xf32, #tpu.memory_space<vmem>>, vector<1x384xf32>
    %121 = vector.broadcast %120 : vector<1x384xf32> to vector<8x384xf32>
    %122 = arith.addf %119, %121 : vector<8x384xf32>
    %123 = vector.extract_strided_slice %116 {offsets = [0, 0], sizes = [8, 128], strides = [1, 1]} : vector<8x384xf32> to vector<8x128xf32>
    %124 = vector.extract_strided_slice %122 {offsets = [0, 0], sizes = [8, 128], strides = [1, 1]} : vector<8x384xf32> to vector<8x128xf32>
    %125 = arith.addf %123, %124 : vector<8x128xf32>
    %126 = arith.negf %125 : vector<8x128xf32>
    %127 = math.exp %126 : vector<8x128xf32>
    %cst_50 = arith.constant 1.000000e+00 : f32
    %128 = vector.broadcast %cst_50 : f32 to vector<8x128xf32>
    %129 = arith.addf %128, %127 : vector<8x128xf32>
    %130 = arith.divf %128, %129 : vector<8x128xf32>
    %131 = vector.extract_strided_slice %116 {offsets = [0, 128], sizes = [8, 128], strides = [1, 1]} : vector<8x384xf32> to vector<8x128xf32>
    %132 = vector.extract_strided_slice %122 {offsets = [0, 128], sizes = [8, 128], strides = [1, 1]} : vector<8x384xf32> to vector<8x128xf32>
    %133 = arith.addf %131, %132 : vector<8x128xf32>
    %134 = arith.negf %133 : vector<8x128xf32>
    %135 = math.exp %134 : vector<8x128xf32>
    %cst_51 = arith.constant 1.000000e+00 : f32
    %136 = vector.broadcast %cst_51 : f32 to vector<8x128xf32>
    %137 = arith.addf %136, %135 : vector<8x128xf32>
    %138 = arith.divf %136, %137 : vector<8x128xf32>
    %139 = vector.extract_strided_slice %116 {offsets = [0, 256], sizes = [8, 128], strides = [1, 1]} : vector<8x384xf32> to vector<8x128xf32>
    %140 = vector.extract_strided_slice %122 {offsets = [0, 256], sizes = [8, 128], strides = [1, 1]} : vector<8x384xf32> to vector<8x128xf32>
    %141 = arith.mulf %130, %140 : vector<8x128xf32>
    %142 = arith.addf %139, %141 : vector<8x128xf32>
    %143 = math.tanh %142 : vector<8x128xf32>
    %cst_52 = arith.constant 1.000000e+00 : f32
    %144 = vector.broadcast %cst_52 : f32 to vector<8x128xf32>
    %145 = arith.subf %144, %138 : vector<8x128xf32>
    %146 = arith.mulf %145, %143 : vector<8x128xf32>
    %147 = arith.mulf %138, %113 : vector<8x128xf32>
    %148 = arith.addf %146, %147 : vector<8x128xf32>
    %149 = arith.truncf %148 : vector<8x128xf32> to vector<8x128xbf16>
    %c24_53 = arith.constant 24 : index
    %c0_54 = arith.constant 0 : index
    %150 = vector.load %arg7[%c24_53, %c0_54] : memref<64x128xbf16, #tpu.memory_space<vmem>>, vector<8x128xbf16>
    tpu.vector_store %arg7[%c24_53, %c0_54], %149 {strides = array<i32>} : memref<64x128xbf16, #tpu.memory_space<vmem>>, vector<8x128xbf16>,
    %c32 = arith.constant 32 : index
    %c0_55 = arith.constant 0 : index
    %151 = vector.load %arg10[%c32, %c0_55] : memref<64x384xf32, #tpu.memory_space<vmem>>, vector<8x384xf32>
    %152 = arith.truncf %148 : vector<8x128xf32> to vector<8x128xbf16>
    %c0_56 = arith.constant 0 : index
    %c0_57 = arith.constant 0 : index
    %153 = vector.load %arg4[%c0_56, %c0_57] : memref<128x384xbf16, #tpu.memory_space<vmem>>, vector<128x384xbf16>
    %cst_58 = arith.constant dense<0.000000e+00> : vector<8x384xf32>
    %154 = tpu.matmul %152, %153, %cst_58 {dimension_numbers = #tpu.dot_dimension_numbers<[1], [0], [0], [1], [0, 0, 1, 1], [], []>} : vector<8x128xbf16>, vector<128x384xbf16>, vector<8x384xf32> -> vector<8x384xf32>
    %c0_59 = arith.constant 0 : index
    %c0_60 = arith.constant 0 : index
    %155 = vector.load %arg5[%c0_59, %c0_60] : memref<1x384xf32, #tpu.memory_space<vmem>>, vector<1x384xf32>
    %156 = vector.broadcast %155 : vector<1x384xf32> to vector<8x384xf32>
    %157 = arith.addf %154, %156 : vector<8x384xf32>
    %158 = vector.extract_strided_slice %151 {offsets = [0, 0], sizes = [8, 128], strides = [1, 1]} : vector<8x384xf32> to vector<8x128xf32>
    %159 = vector.extract_strided_slice %157 {offsets = [0, 0], sizes = [8, 128], strides = [1, 1]} : vector<8x384xf32> to vector<8x128xf32>
    %160 = arith.addf %158, %159 : vector<8x128xf32>
    %161 = arith.negf %160 : vector<8x128xf32>
    %162 = math.exp %161 : vector<8x128xf32>
    %cst_61 = arith.constant 1.000000e+00 : f32
    %163 = vector.broadcast %cst_61 : f32 to vector<8x128xf32>
    %164 = arith.addf %163, %162 : vector<8x128xf32>
    %165 = arith.divf %163, %164 : vector<8x128xf32>
    %166 = vector.extract_strided_slice %151 {offsets = [0, 128], sizes = [8, 128], strides = [1, 1]} : vector<8x384xf32> to vector<8x128xf32>
    %167 = vector.extract_strided_slice %157 {offsets = [0, 128], sizes = [8, 128], strides = [1, 1]} : vector<8x384xf32> to vector<8x128xf32>
    %168 = arith.addf %166, %167 : vector<8x128xf32>
    %169 = arith.negf %168 : vector<8x128xf32>
    %170 = math.exp %169 : vector<8x128xf32>
    %cst_62 = arith.constant 1.000000e+00 : f32
    %171 = vector.broadcast %cst_62 : f32 to vector<8x128xf32>
    %172 = arith.addf %171, %170 : vector<8x128xf32>
    %173 = arith.divf %171, %172 : vector<8x128xf32>
    %174 = vector.extract_strided_slice %151 {offsets = [0, 256], sizes = [8, 128], strides = [1, 1]} : vector<8x384xf32> to vector<8x128xf32>
    %175 = vector.extract_strided_slice %157 {offsets = [0, 256], sizes = [8, 128], strides = [1, 1]} : vector<8x384xf32> to vector<8x128xf32>
    %176 = arith.mulf %165, %175 : vector<8x128xf32>
    %177 = arith.addf %174, %176 : vector<8x128xf32>
    %178 = math.tanh %177 : vector<8x128xf32>
    %cst_63 = arith.constant 1.000000e+00 : f32
    %179 = vector.broadcast %cst_63 : f32 to vector<8x128xf32>
    %180 = arith.subf %179, %173 : vector<8x128xf32>
    %181 = arith.mulf %180, %178 : vector<8x128xf32>
    %182 = arith.mulf %173, %148 : vector<8x128xf32>
    %183 = arith.addf %181, %182 : vector<8x128xf32>
    %184 = arith.truncf %183 : vector<8x128xf32> to vector<8x128xbf16>
    %c32_64 = arith.constant 32 : index
    %c0_65 = arith.constant 0 : index
    %185 = vector.load %arg7[%c32_64, %c0_65] : memref<64x128xbf16, #tpu.memory_space<vmem>>, vector<8x128xbf16>
    tpu.vector_store %arg7[%c32_64, %c0_65], %184 {strides = array<i32>} : memref<64x128xbf16, #tpu.memory_space<vmem>>, vector<8x128xbf16>,
    %c40 = arith.constant 40 : index
    %c0_66 = arith.constant 0 : index
    %186 = vector.load %arg10[%c40, %c0_66] : memref<64x384xf32, #tpu.memory_space<vmem>>, vector<8x384xf32>
    %187 = arith.truncf %183 : vector<8x128xf32> to vector<8x128xbf16>
    %c0_67 = arith.constant 0 : index
    %c0_68 = arith.constant 0 : index
    %188 = vector.load %arg4[%c0_67, %c0_68] : memref<128x384xbf16, #tpu.memory_space<vmem>>, vector<128x384xbf16>
    %cst_69 = arith.constant dense<0.000000e+00> : vector<8x384xf32>
    %189 = tpu.matmul %187, %188, %cst_69 {dimension_numbers = #tpu.dot_dimension_numbers<[1], [0], [0], [1], [0, 0, 1, 1], [], []>} : vector<8x128xbf16>, vector<128x384xbf16>, vector<8x384xf32> -> vector<8x384xf32>
    %c0_70 = arith.constant 0 : index
    %c0_71 = arith.constant 0 : index
    %190 = vector.load %arg5[%c0_70, %c0_71] : memref<1x384xf32, #tpu.memory_space<vmem>>, vector<1x384xf32>
    %191 = vector.broadcast %190 : vector<1x384xf32> to vector<8x384xf32>
    %192 = arith.addf %189, %191 : vector<8x384xf32>
    %193 = vector.extract_strided_slice %186 {offsets = [0, 0], sizes = [8, 128], strides = [1, 1]} : vector<8x384xf32> to vector<8x128xf32>
    %194 = vector.extract_strided_slice %192 {offsets = [0, 0], sizes = [8, 128], strides = [1, 1]} : vector<8x384xf32> to vector<8x128xf32>
    %195 = arith.addf %193, %194 : vector<8x128xf32>
    %196 = arith.negf %195 : vector<8x128xf32>
    %197 = math.exp %196 : vector<8x128xf32>
    %cst_72 = arith.constant 1.000000e+00 : f32
    %198 = vector.broadcast %cst_72 : f32 to vector<8x128xf32>
    %199 = arith.addf %198, %197 : vector<8x128xf32>
    %200 = arith.divf %198, %199 : vector<8x128xf32>
    %201 = vector.extract_strided_slice %186 {offsets = [0, 128], sizes = [8, 128], strides = [1, 1]} : vector<8x384xf32> to vector<8x128xf32>
    %202 = vector.extract_strided_slice %192 {offsets = [0, 128], sizes = [8, 128], strides = [1, 1]} : vector<8x384xf32> to vector<8x128xf32>
    %203 = arith.addf %201, %202 : vector<8x128xf32>
    %204 = arith.negf %203 : vector<8x128xf32>
    %205 = math.exp %204 : vector<8x128xf32>
    %cst_73 = arith.constant 1.000000e+00 : f32
    %206 = vector.broadcast %cst_73 : f32 to vector<8x128xf32>
    %207 = arith.addf %206, %205 : vector<8x128xf32>
    %208 = arith.divf %206, %207 : vector<8x128xf32>
    %209 = vector.extract_strided_slice %186 {offsets = [0, 256], sizes = [8, 128], strides = [1, 1]} : vector<8x384xf32> to vector<8x128xf32>
    %210 = vector.extract_strided_slice %192 {offsets = [0, 256], sizes = [8, 128], strides = [1, 1]} : vector<8x384xf32> to vector<8x128xf32>
    %211 = arith.mulf %200, %210 : vector<8x128xf32>
    %212 = arith.addf %209, %211 : vector<8x128xf32>
    %213 = math.tanh %212 : vector<8x128xf32>
    %cst_74 = arith.constant 1.000000e+00 : f32
    %214 = vector.broadcast %cst_74 : f32 to vector<8x128xf32>
    %215 = arith.subf %214, %208 : vector<8x128xf32>
    %216 = arith.mulf %215, %213 : vector<8x128xf32>
    %217 = arith.mulf %208, %183 : vector<8x128xf32>
    %218 = arith.addf %216, %217 : vector<8x128xf32>
    %219 = arith.truncf %218 : vector<8x128xf32> to vector<8x128xbf16>
    %c40_75 = arith.constant 40 : index
    %c0_76 = arith.constant 0 : index
    %220 = vector.load %arg7[%c40_75, %c0_76] : memref<64x128xbf16, #tpu.memory_space<vmem>>, vector<8x128xbf16>
    tpu.vector_store %arg7[%c40_75, %c0_76], %219 {strides = array<i32>} : memref<64x128xbf16, #tpu.memory_space<vmem>>, vector<8x128xbf16>,
    %c48 = arith.constant 48 : index
    %c0_77 = arith.constant 0 : index
    %221 = vector.load %arg10[%c48, %c0_77] : memref<64x384xf32, #tpu.memory_space<vmem>>, vector<8x384xf32>
    %222 = arith.truncf %218 : vector<8x128xf32> to vector<8x128xbf16>
    %c0_78 = arith.constant 0 : index
    %c0_79 = arith.constant 0 : index
    %223 = vector.load %arg4[%c0_78, %c0_79] : memref<128x384xbf16, #tpu.memory_space<vmem>>, vector<128x384xbf16>
    %cst_80 = arith.constant dense<0.000000e+00> : vector<8x384xf32>
    %224 = tpu.matmul %222, %223, %cst_80 {dimension_numbers = #tpu.dot_dimension_numbers<[1], [0], [0], [1], [0, 0, 1, 1], [], []>} : vector<8x128xbf16>, vector<128x384xbf16>, vector<8x384xf32> -> vector<8x384xf32>
    %c0_81 = arith.constant 0 : index
    %c0_82 = arith.constant 0 : index
    %225 = vector.load %arg5[%c0_81, %c0_82] : memref<1x384xf32, #tpu.memory_space<vmem>>, vector<1x384xf32>
    %226 = vector.broadcast %225 : vector<1x384xf32> to vector<8x384xf32>
    %227 = arith.addf %224, %226 : vector<8x384xf32>
    %228 = vector.extract_strided_slice %221 {offsets = [0, 0], sizes = [8, 128], strides = [1, 1]} : vector<8x384xf32> to vector<8x128xf32>
    %229 = vector.extract_strided_slice %227 {offsets = [0, 0], sizes = [8, 128], strides = [1, 1]} : vector<8x384xf32> to vector<8x128xf32>
    %230 = arith.addf %228, %229 : vector<8x128xf32>
    %231 = arith.negf %230 : vector<8x128xf32>
    %232 = math.exp %231 : vector<8x128xf32>
    %cst_83 = arith.constant 1.000000e+00 : f32
    %233 = vector.broadcast %cst_83 : f32 to vector<8x128xf32>
    %234 = arith.addf %233, %232 : vector<8x128xf32>
    %235 = arith.divf %233, %234 : vector<8x128xf32>
    %236 = vector.extract_strided_slice %221 {offsets = [0, 128], sizes = [8, 128], strides = [1, 1]} : vector<8x384xf32> to vector<8x128xf32>
    %237 = vector.extract_strided_slice %227 {offsets = [0, 128], sizes = [8, 128], strides = [1, 1]} : vector<8x384xf32> to vector<8x128xf32>
    %238 = arith.addf %236, %237 : vector<8x128xf32>
    %239 = arith.negf %238 : vector<8x128xf32>
    %240 = math.exp %239 : vector<8x128xf32>
    %cst_84 = arith.constant 1.000000e+00 : f32
    %241 = vector.broadcast %cst_84 : f32 to vector<8x128xf32>
    %242 = arith.addf %241, %240 : vector<8x128xf32>
    %243 = arith.divf %241, %242 : vector<8x128xf32>
    %244 = vector.extract_strided_slice %221 {offsets = [0, 256], sizes = [8, 128], strides = [1, 1]} : vector<8x384xf32> to vector<8x128xf32>
    %245 = vector.extract_strided_slice %227 {offsets = [0, 256], sizes = [8, 128], strides = [1, 1]} : vector<8x384xf32> to vector<8x128xf32>
    %246 = arith.mulf %235, %245 : vector<8x128xf32>
    %247 = arith.addf %244, %246 : vector<8x128xf32>
    %248 = math.tanh %247 : vector<8x128xf32>
    %cst_85 = arith.constant 1.000000e+00 : f32
    %249 = vector.broadcast %cst_85 : f32 to vector<8x128xf32>
    %250 = arith.subf %249, %243 : vector<8x128xf32>
    %251 = arith.mulf %250, %248 : vector<8x128xf32>
    %252 = arith.mulf %243, %218 : vector<8x128xf32>
    %253 = arith.addf %251, %252 : vector<8x128xf32>
    %254 = arith.truncf %253 : vector<8x128xf32> to vector<8x128xbf16>
    %c48_86 = arith.constant 48 : index
    %c0_87 = arith.constant 0 : index
    %255 = vector.load %arg7[%c48_86, %c0_87] : memref<64x128xbf16, #tpu.memory_space<vmem>>, vector<8x128xbf16>
    tpu.vector_store %arg7[%c48_86, %c0_87], %254 {strides = array<i32>} : memref<64x128xbf16, #tpu.memory_space<vmem>>, vector<8x128xbf16>,
    %c56 = arith.constant 56 : index
    %c0_88 = arith.constant 0 : index
    %256 = vector.load %arg10[%c56, %c0_88] : memref<64x384xf32, #tpu.memory_space<vmem>>, vector<8x384xf32>
    %257 = arith.truncf %253 : vector<8x128xf32> to vector<8x128xbf16>
    %c0_89 = arith.constant 0 : index
    %c0_90 = arith.constant 0 : index
    %258 = vector.load %arg4[%c0_89, %c0_90] : memref<128x384xbf16, #tpu.memory_space<vmem>>, vector<128x384xbf16>
    %cst_91 = arith.constant dense<0.000000e+00> : vector<8x384xf32>
    %259 = tpu.matmul %257, %258, %cst_91 {dimension_numbers = #tpu.dot_dimension_numbers<[1], [0], [0], [1], [0, 0, 1, 1], [], []>} : vector<8x128xbf16>, vector<128x384xbf16>, vector<8x384xf32> -> vector<8x384xf32>
    %c0_92 = arith.constant 0 : index
    %c0_93 = arith.constant 0 : index
    %260 = vector.load %arg5[%c0_92, %c0_93] : memref<1x384xf32, #tpu.memory_space<vmem>>, vector<1x384xf32>
    %261 = vector.broadcast %260 : vector<1x384xf32> to vector<8x384xf32>
    %262 = arith.addf %259, %261 : vector<8x384xf32>
    %263 = vector.extract_strided_slice %256 {offsets = [0, 0], sizes = [8, 128], strides = [1, 1]} : vector<8x384xf32> to vector<8x128xf32>
    %264 = vector.extract_strided_slice %262 {offsets = [0, 0], sizes = [8, 128], strides = [1, 1]} : vector<8x384xf32> to vector<8x128xf32>
    %265 = arith.addf %263, %264 : vector<8x128xf32>
    %266 = arith.negf %265 : vector<8x128xf32>
    %267 = math.exp %266 : vector<8x128xf32>
    %cst_94 = arith.constant 1.000000e+00 : f32
    %268 = vector.broadcast %cst_94 : f32 to vector<8x128xf32>
    %269 = arith.addf %268, %267 : vector<8x128xf32>
    %270 = arith.divf %268, %269 : vector<8x128xf32>
    %271 = vector.extract_strided_slice %256 {offsets = [0, 128], sizes = [8, 128], strides = [1, 1]} : vector<8x384xf32> to vector<8x128xf32>
    %272 = vector.extract_strided_slice %262 {offsets = [0, 128], sizes = [8, 128], strides = [1, 1]} : vector<8x384xf32> to vector<8x128xf32>
    %273 = arith.addf %271, %272 : vector<8x128xf32>
    %274 = arith.negf %273 : vector<8x128xf32>
    %275 = math.exp %274 : vector<8x128xf32>
    %cst_95 = arith.constant 1.000000e+00 : f32
    %276 = vector.broadcast %cst_95 : f32 to vector<8x128xf32>
    %277 = arith.addf %276, %275 : vector<8x128xf32>
    %278 = arith.divf %276, %277 : vector<8x128xf32>
    %279 = vector.extract_strided_slice %256 {offsets = [0, 256], sizes = [8, 128], strides = [1, 1]} : vector<8x384xf32> to vector<8x128xf32>
    %280 = vector.extract_strided_slice %262 {offsets = [0, 256], sizes = [8, 128], strides = [1, 1]} : vector<8x384xf32> to vector<8x128xf32>
    %281 = arith.mulf %270, %280 : vector<8x128xf32>
    %282 = arith.addf %279, %281 : vector<8x128xf32>
    %283 = math.tanh %282 : vector<8x128xf32>
    %cst_96 = arith.constant 1.000000e+00 : f32
    %284 = vector.broadcast %cst_96 : f32 to vector<8x128xf32>
    %285 = arith.subf %284, %278 : vector<8x128xf32>
    %286 = arith.mulf %285, %283 : vector<8x128xf32>
    %287 = arith.mulf %278, %253 : vector<8x128xf32>
    %288 = arith.addf %286, %287 : vector<8x128xf32>
    %289 = arith.truncf %288 : vector<8x128xf32> to vector<8x128xbf16>
    %c56_97 = arith.constant 56 : index
    %c0_98 = arith.constant 0 : index
    %290 = vector.load %arg7[%c56_97, %c0_98] : memref<64x128xbf16, #tpu.memory_space<vmem>>, vector<8x128xbf16>
    tpu.vector_store %arg7[%c56_97, %c0_98], %289 {strides = array<i32>} : memref<64x128xbf16, #tpu.memory_space<vmem>>, vector<8x128xbf16>,
    %c0_99 = arith.constant 0 : index
    %c0_100 = arith.constant 0 : index
    %291 = vector.load %arg9[%c0_99, %c0_100] : memref<8x128xf32, #tpu.memory_space<vmem>>, vector<8x128xf32>
    tpu.vector_store %arg9[%c0_99, %c0_100], %288 {strides = array<i32>} : memref<8x128xf32, #tpu.memory_space<vmem>>, vector<8x128xf32>,
    %c0_101 = arith.constant 0 : index
    %c0_102 = arith.constant 0 : index
    %292 = vector.load %arg8[%c0_101, %c0_102] : memref<8x128xf32, #tpu.memory_space<vmem>>, vector<8x128xf32>
    tpu.vector_store %arg8[%c0_101, %c0_102], %288 {strides = array<i32>} : memref<8x128xf32, #tpu.memory_space<vmem>>, vector<8x128xf32>,
    return
  }
  func.func @transform_0(%arg0: i32) -> (i32, i32) {
    %c0_i32 = arith.constant 0 : i32
    %c0_i32_0 = arith.constant 0 : i32
    return %arg0, %c0_i32 : i32, i32
  }
  func.func @transform_1(%arg0: i32) -> (i32, i32) {
    %c0_i32 = arith.constant 0 : i32
    %c0_i32_0 = arith.constant 0 : i32
    %c0_i32_1 = arith.constant 0 : i32
    return %c0_i32, %c0_i32_0 : i32, i32
  }
  func.func @transform_2(%arg0: i32) -> (i32, i32) {
    %c0_i32 = arith.constant 0 : i32
    %c0_i32_0 = arith.constant 0 : i32
    %c0_i32_1 = arith.constant 0 : i32
    return %c0_i32, %c0_i32_0 : i32, i32
  }
  func.func @transform_3(%arg0: i32) -> (i32, i32) {
    %c0_i32 = arith.constant 0 : i32
    %c0_i32_0 = arith.constant 0 : i32
    %c0_i32_1 = arith.constant 0 : i32
    return %c0_i32, %c0_i32_0 : i32, i32
  }
  func.func @transform_4(%arg0: i32) -> (i32, i32) {
    %c0_i32 = arith.constant 0 : i32
    %c0_i32_0 = arith.constant 0 : i32
    %c0_i32_1 = arith.constant 0 : i32
    return %c0_i32, %c0_i32_0 : i32, i32
  }
  func.func @transform_5(%arg0: i32) -> (i32, i32) {
    %c0_i32 = arith.constant 0 : i32
    %c0_i32_0 = arith.constant 0 : i32
    %c0_i32_1 = arith.constant 0 : i32
    return %c0_i32, %c0_i32_0 : i32, i32
  }
  func.func @transform_6(%arg0: i32) -> (i32, i32) {
    %c0_i32 = arith.constant 0 : i32
    %c0_i32_0 = arith.constant 0 : i32
    return %arg0, %c0_i32 : i32, i32
  }
  func.func @transform_7(%arg0: i32) -> (i32, i32) {
    %c0_i32 = arith.constant 0 : i32
    %c0_i32_0 = arith.constant 0 : i32
    %c0_i32_1 = arith.constant 0 : i32
    return %c0_i32, %c0_i32_0 : i32, i32
  }
}

module attributes {stable_mosaic.version = 11 : i64} {
  func.func @_head_kernel(%arg0: i32, %arg1: memref<8x128xf32, #tpu.memory_space<vmem>>, %arg2: memref<128x64xf32, #tpu.memory_space<vmem>>, %arg3: memref<1x64xf32, #tpu.memory_space<vmem>>, %arg4: memref<64x2xf32, #tpu.memory_space<vmem>>, %arg5: memref<1x2xf32, #tpu.memory_space<vmem>>, %arg6: memref<8x2xf32, #tpu.memory_space<vmem>>) attributes {dimension_semantics = [#tpu.dimension_semantics<arbitrary>], iteration_bounds = array<i64: 1>, scalar_prefetch = 0 : i64, scratch_operands = 0 : i64, tpu.core_type = #tpu.core_type<tc>, window_params = [{pipeline_mode = #tpu.pipeline_mode<synchronous>, transform_indices = @transform_0, window_bounds = array<i64: 8, 128>}, {pipeline_mode = #tpu.pipeline_mode<synchronous>, transform_indices = @transform_1, window_bounds = array<i64: 128, 64>}, {pipeline_mode = #tpu.pipeline_mode<synchronous>, transform_indices = @transform_2, window_bounds = array<i64: 1, 64>}, {pipeline_mode = #tpu.pipeline_mode<synchronous>, transform_indices = @transform_3, window_bounds = array<i64: 64, 2>}, {pipeline_mode = #tpu.pipeline_mode<synchronous>, transform_indices = @transform_4, window_bounds = array<i64: 1, 2>}, {pipeline_mode = #tpu.pipeline_mode<synchronous>, transform_indices = @transform_5, window_bounds = array<i64: 8, 2>}]} {
    %c0 = arith.constant 0 : index
    %c0_0 = arith.constant 0 : index
    %0 = vector.load %arg1[%c0, %c0_0] : memref<8x128xf32, #tpu.memory_space<vmem>>, vector<8x128xf32>
    %c0_1 = arith.constant 0 : index
    %c0_2 = arith.constant 0 : index
    %1 = vector.load %arg2[%c0_1, %c0_2] : memref<128x64xf32, #tpu.memory_space<vmem>>, vector<128x64xf32>
    %cst = arith.constant dense<0.000000e+00> : vector<8x64xf32>
    %2 = tpu.matmul %0, %1, %cst {dimension_numbers = #tpu.dot_dimension_numbers<[1], [0], [0], [1], [0, 0, 1, 1], [], []>} : vector<8x128xf32>, vector<128x64xf32>, vector<8x64xf32> -> vector<8x64xf32>
    %c0_3 = arith.constant 0 : index
    %c0_4 = arith.constant 0 : index
    %3 = vector.load %arg3[%c0_3, %c0_4] : memref<1x64xf32, #tpu.memory_space<vmem>>, vector<1x64xf32>
    %4 = vector.broadcast %3 : vector<1x64xf32> to vector<8x64xf32>
    %5 = arith.addf %2, %4 : vector<8x64xf32>
    %cst_5 = arith.constant 0.000000e+00 : f32
    %6 = vector.broadcast %cst_5 : f32 to vector<8x64xf32>
    %7 = arith.maximumf %5, %6 : vector<8x64xf32>
    %c0_6 = arith.constant 0 : index
    %c0_7 = arith.constant 0 : index
    %8 = vector.load %arg4[%c0_6, %c0_7] : memref<64x2xf32, #tpu.memory_space<vmem>>, vector<64x2xf32>
    %cst_8 = arith.constant dense<0.000000e+00> : vector<8x2xf32>
    %9 = tpu.matmul %7, %8, %cst_8 {dimension_numbers = #tpu.dot_dimension_numbers<[1], [0], [0], [1], [0, 0, 1, 1], [], []>} : vector<8x64xf32>, vector<64x2xf32>, vector<8x2xf32> -> vector<8x2xf32>
    %c0_9 = arith.constant 0 : index
    %c0_10 = arith.constant 0 : index
    %10 = vector.load %arg5[%c0_9, %c0_10] : memref<1x2xf32, #tpu.memory_space<vmem>>, vector<1x2xf32>
    %11 = vector.broadcast %10 : vector<1x2xf32> to vector<8x2xf32>
    %12 = arith.addf %9, %11 : vector<8x2xf32>
    %c0_11 = arith.constant 0 : index
    %c0_12 = arith.constant 0 : index
    %13 = vector.load %arg6[%c0_11, %c0_12] : memref<8x2xf32, #tpu.memory_space<vmem>>, vector<8x2xf32>
    tpu.vector_store %arg6[%c0_11, %c0_12], %12 {strides = array<i32>} : memref<8x2xf32, #tpu.memory_space<vmem>>, vector<8x2xf32>,
    return
  }
  func.func @transform_0(%arg0: i32) -> (i32, i32) {
    %c0_i32 = arith.constant 0 : i32
    %c0_i32_0 = arith.constant 0 : i32
    %c0_i32_1 = arith.constant 0 : i32
    return %c0_i32, %c0_i32_0 : i32, i32
  }
  func.func @transform_1(%arg0: i32) -> (i32, i32) {
    %c0_i32 = arith.constant 0 : i32
    %c0_i32_0 = arith.constant 0 : i32
    %c0_i32_1 = arith.constant 0 : i32
    return %c0_i32, %c0_i32_0 : i32, i32
  }
  func.func @transform_2(%arg0: i32) -> (i32, i32) {
    %c0_i32 = arith.constant 0 : i32
    %c0_i32_0 = arith.constant 0 : i32
    %c0_i32_1 = arith.constant 0 : i32
    return %c0_i32, %c0_i32_0 : i32, i32
  }
  func.func @transform_3(%arg0: i32) -> (i32, i32) {
    %c0_i32 = arith.constant 0 : i32
    %c0_i32_0 = arith.constant 0 : i32
    %c0_i32_1 = arith.constant 0 : i32
    return %c0_i32, %c0_i32_0 : i32, i32
  }
  func.func @transform_4(%arg0: i32) -> (i32, i32) {
    %c0_i32 = arith.constant 0 : i32
    %c0_i32_0 = arith.constant 0 : i32
    %c0_i32_1 = arith.constant 0 : i32
    return %c0_i32, %c0_i32_0 : i32, i32
  }
  func.func @transform_5(%arg0: i32) -> (i32, i32) {
    %c0_i32 = arith.constant 0 : i32
    %c0_i32_0 = arith.constant 0 : i32
    %c0_i32_1 = arith.constant 0 : i32
    return %c0_i32, %c0_i32_0 : i32, i32
  }
}

</mosaic_0001>

<bundles_post_ra>
// kernel: grunet_forward.5
= control target key start
LH: loop header
LB: loop body
LE: loop exit
PB: predicated region body
PF: predicated region fallthrough
CT: control target
= control target key end

     0   :  { %vm74_vm0 = vcmask 523264   ;;  %vm98_vm1 = vcmask 15360   ;;  %s221_s1 = inlined_call_operand.vmem [shape: f32[128,64], index: 1, kind: input, shape index: {}]   ;;  %s222_s3 = inlined_call_operand.vmem [shape: f32[64,2], index: 3, kind: input, shape index: {}]   ;;  %s223_s2 = inlined_call_operand.vmem [shape: f32[1,64], index: 2, kind: input, shape index: {}]   ;;  %s224_s0 = inlined_call_operand.vmem [shape: f32[8,128], index: 0, kind: input, shape index: {}]   ;;  %s225_s4 = inlined_call_operand.vmem [shape: f32[1,2], index: 4, kind: input, shape index: {}]   ;;  %s226_s5 = inlined_call_operand.vmem [shape: f32[8,2], index: 5, kind: output, shape index: {}]  }
   0x1   :  { %v36_v0 = vld [vmem:[%s221_s1 + $0x78] sm:$0xff]  ;;  %v35_v1 = vld [vmem:[%s221_s1 + $0x70] sm:$0xff]  ;;  %v34_v2 = vld [vmem:[%s221_s1 + $0x68] sm:$0xff] }
   0x2   :  { %41 = vmatpush.msra.mxu0 %v36_v0  ;;  %v33_v3 = vld [vmem:[%s221_s1 + $0x60] sm:$0xff]  ;;  %v69_v4 = vld [vmem:[%s222_s3 + $0x38] sm:$0xff]  ;;  %v68_v6 = vld [vmem:[%s222_s3 + $0x30] sm:$0xff] }
   0x3   :  { %v32_v5 = vld [vmem:[%s221_s1 + $0x58] sm:$0xff]  ;;  %86 = vmatpush.msra.mxu1 %v69_v4  ;;  %v67_v7 = vld [vmem:[%s222_s3 + $0x28] sm:$0xff]  ;;  %v31_v8 = vld [vmem:[%s221_s1 + $0x50] sm:$0xff] }
   0x4   :  { %42 = vmatpush.msra.mxu0 %v35_v1  ;;  %v66_v9 = vld [vmem:[%s222_s3 + $0x20] sm:$0xff]  ;;  %v30_v10 = vld [vmem:[%s221_s1 + $0x48] sm:$0xff]  ;;  %v65_v11 = vld [vmem:[%s222_s3 + $0x18] sm:$0xff] }
   0x5   :  { %87 = vmatpush.msra.mxu1 %v68_v6  ;;  %v29_v12 = vld [vmem:[%s221_s1 + $0x40] sm:$0xff]  ;;  %v28_v13 = vld [vmem:[%s221_s1 + $0x38] sm:$0xff]  ;;  %v27_v14 = vld [vmem:[%s221_s1 + $0x30] sm:$0xff] }
   0x6   :  { %43 = vmatpush.msra.mxu0 %v34_v2  ;;  %v26_v15 = vld [vmem:[%s221_s1 + $0x28] sm:$0xff]  ;;  %v25_v16 = vld [vmem:[%s221_s1 + $0x20] sm:$0xff]  ;;  %v24_v17 = vld [vmem:[%s221_s1 + $0x18] sm:$0xff] }
   0x7   :  { %88 = vmatpush.msra.mxu1 %v67_v7  ;;  %v23_v18 = vld [vmem:[%s221_s1 + $0x10] sm:$0xff]  ;;  %v22_v19 = vld [vmem:[%s221_s1 + $0x8] sm:$0xff]  ;;  %v21_v20 = vld [vmem:[%s221_s1] sm:$0xff] }
   0x8   :  { %44 = vmatpush.msra.mxu0 %v33_v3  ;;  %v20_v21 = vld [vmem:[%s224_s0] sm:$0xff]  ;;  %v64_v22 = vld [vmem:[%s222_s3 + $0x10] sm:$0xff]  ;;  %v63_v23 = vld [vmem:[%s222_s3 + $0x8] sm:$0xff] }
   0x9   :  { %89 = vmatpush.msra.mxu1 %v66_v9  ;;  %v62_v24 = vld [vmem:[%s222_s3] sm:$0xff] }
   0xa   :  { %45 = vmatpush.msra.mxu0 %v32_v5  ;;  %v105_v25 = vld [vmem:[%s223_s2] ss:$0 sm:$0xff] }
   0xb   :  { %90 = vmatpush.msra.mxu1 %v65_v11  ;;  %v106_v29 = vld [vmem:[%s225_s4] ss:$0 sm:$0xff] }
   0xc   :  { %46 = vmatpush.msra.mxu0 %v31_v8 }
   0xd   :  { %91 = vmatpush.msra.mxu1 %v64_v22 }
   0xe   :  { %47 = vmatpush.msra.mxu0 %v30_v10 }
   0xf   :  { %92 = vmatpush.msra.mxu1 %v63_v23 }
  0x10   :  { %48 = vmatpush.msra.mxu0 %v29_v12 }
  0x11   :  { %93 = vmatpush.msra.mxu1 %v62_v24 }
  0x12   :  { %49 = vmatpush.msra.mxu0 %v28_v13 }
  0x14   :  { %50 = vmatpush.msra.mxu0 %v27_v14 }
  0x16   :  { %51 = vmatpush.msra.mxu0 %v26_v15 }
  0x18   :  { %52 = vmatpush.msra.mxu0 %v25_v16 }
  0x1a   :  { %53 = vmatpush.msra.mxu0 %v24_v17 }
  0x1c   :  { %54 = vmatpush.msra.mxu0 %v23_v18 }
  0x1e   :  { %55 = vmatpush.msra.mxu0 %v22_v19 }
  0x20   :  { %56 = vmatpush.msra.mxu0 %v21_v20 }
  0x21   :  { %57 = vmatmul.f32.vlgmr.msra.gmra.mxu0 %v20_v21 }
  0x9e   :  { %v58_v26 = vpop.f32.mrf.mxu0 }
  0x9f   :  { %v59_v27 = vadd.f32 %v105_v25, %v58_v26 }
  0xa1   :  { %v61_v28 = vmax.f32 %v59_v27, 0.0 }
  0xa3   :  { %104 = vmatmul.msk.f32.vlgmr.msra.gmra.mxu1 %vm74_vm0, %v61_v28 }
 0x120   :  { %v95_v30 = vpop.f32.mrf.mxu1 }
 0x121   :  { %v96_v31 = vadd.f32 %v106_v29, %v95_v30 }
 0x123   :  { %99 = vst.msk [vmem:[%s226_s5] sm:$0xff] %vm98_vm1, %v96_v31 }

// kernel: grunet_forward.3
= control target key start
LH: loop header
LB: loop body
LE: loop exit
PB: predicated region body
PF: predicated region fallthrough
CT: control target
= control target key end

     0   :  { %13 = vsyncpa [#allocation5], 0  ;;  %s3480_s27 = smov [#allocation4]   ;;  %s3481_s29 = smov 192   ;;  %s3846_s0 = inlined_call_operand.vmem [shape: bf16[64,32], index: 0, kind: input, shape index: {}]   ;;  %s3847_s1 = inlined_call_operand.vmem [shape: bf16[32,384], index: 1, kind: input, shape index: {}]   ;;  %s3848_s2 = inlined_call_operand.vmem [shape: f32[1,384], index: 2, kind: input, shape index: {}]   ;;  %s3849_s3 = inlined_call_operand.hbm [shape: bf16[128,384], index: 3, kind: input, shape index: {}]   ;;  %s3850_s4 = inlined_call_operand.vmem [shape: f32[1,384], index: 4, kind: input, shape index: {}]   ;;  %s3851_s5 = inlined_call_operand.vmem [shape: f32[8,128], index: 5, kind: input, shape index: {}]   ;;  %s3852_s6 = inlined_call_operand.vmem [shape: bf16[64,128], index: 6, kind: output, shape index: {0}]   ;;  %s3853_s7 = inlined_call_operand.vmem [shape: f32[8,128], index: 7, kind: output, shape index: {1}]  }
   0x1   :  { %s24_s26 = sshll.u32 %s3849_s3, 4  ;;  %s26_s28 = sshll.u32 %s3480_s27, 4  ;;  %s25_s26 = int_to_ptr.hbm [resolvable:$true] %s24_s26  ;;  %s27_s28 = int_to_ptr.vmem [resolvable:$true] %s26_s28 }
   0x2   :  { %s3482_s30 = smov 12  }
   0x3   :  { %32 = dma.hbm_to_vmem [thread:$0]  %s25_s26, 3072, %s27_s28, [#allocation5], %s3481_s29, %s3481_s29, %s3482_s30  }
   0x4   :  { %3478 = dma.done.wait [#allocation5], 3072  }
   0x5   :  { %3479 = vsyncadd [#allocation5], 4294964224  ;;  %v2363_v0 = vld [vmem:[%s3847_s1 + $0x18] sm:$0xf]  ;;  %v3177_v1 = vld [vmem:[%s3847_s1 + $0x20] sm:$0xf0] }
   0x6   :  { %v2471_v2 = vld [vmem:[#allocation4 + $0xa8] sm:$0xf]  ;;  %v2364_v3 = vor.u32 %v3177_v1, %v2363_v0  ;;  %v3201_v4 = vld [vmem:[#allocation4 + $0xb0] sm:$0xf0]  ;;  %v2351_v5 = vld [vmem:[%s3847_s1] sm:$0xf] }
   0x7   :  { %v3174_v6 = vld [vmem:[%s3847_s1 + $0x8] sm:$0xf0]  ;;  %v2472_v7 = vor.u32 %v3201_v4, %v2471_v2  ;;  %v2459_v8 = vld [vmem:[#allocation4 + $0x90] sm:$0xf]  ;;  %v3198_v9 = vld [vmem:[#allocation4 + $0x98] sm:$0xf0] }
   0x8   :  { %143 = vmatpush.bf16.msra.mxu0 %v2364_v3  ;;  %v2352_v10 = vor.u32 %v3174_v6, %v2351_v5  ;;  %v2460_v11 = vor.u32 %v3198_v9, %v2459_v8  ;;  %v2447_v12 = vld [vmem:[#allocation4 + $0x78] sm:$0xf]  ;;  %v3195_v13 = vld [vmem:[#allocation4 + $0x80] sm:$0xf0]  ;;  %v2479_v15 = vld [vmem:[#allocation4 + $0xb0] sm:$0xf] }
   0x9   :  { %421 = vmatpush.bf16.msra.mxu3 %v2472_v7  ;;  %v3541_v14 = vld [vmem:[%s3846_s0] sm:$0xff]  ;;  %v3202_v16 = vld [vmem:[#allocation4 + $0xb8] sm:$0xf0]  ;;  %vm124_vm0 = vcmask 261120   ;;  %v2448_v18 = vor.u32 %v3195_v13, %v2447_v12  ;;  %v3192_v20 = vld [vmem:[#allocation4 + $0x68] sm:$0xf0] }
   0xa   :  { %v2480_v17 = vor.u32 %v3202_v16, %v2479_v15  ;;  %v2435_v19 = vld [vmem:[#allocation4 + $0x60] sm:$0xf]  ;;  %v2467_v21 = vld [vmem:[#allocation4 + $0x98] sm:$0xf]  ;;  %v3199_v22 = vld [vmem:[#allocation4 + $0xa0] sm:$0xf0] }
   0xb   :  { %v2468_v23 = vor.u32 %v3199_v22, %v2467_v21  ;;  %v2455_v24 = vld [vmem:[#allocation4 + $0x80] sm:$0xf]  ;;  %v3196_v25 = vld [vmem:[#allocation4 + $0x88] sm:$0xf0]  ;;  %v2436_v26 = vor.u32 %v3192_v20, %v2435_v19  ;;  %v2423_v27 = vld [vmem:[#allocation4 + $0x48] sm:$0xf] }
   0xc   :  { %144 = vmatpush.bf16.msra.mxu0 %v2352_v10  ;;  %v3189_v28 = vld [vmem:[#allocation4 + $0x50] sm:$0xf0]  ;;  %v2456_v29 = vor.u32 %v3196_v25, %v2455_v24  ;;  %v2411_v31 = vld [vmem:[#allocation4 + $0x30] sm:$0xf]  ;;  %v3186_v32 = vld [vmem:[#allocation4 + $0x38] sm:$0xf0] }
   0xd   :  { %422 = vmatpush.bf16.msra.mxu3 %v2460_v11  ;;  %v2424_v30 = vor.u32 %v3189_v28, %v2423_v27  ;;  %v2443_v33 = vld [vmem:[#allocation4 + $0x68] sm:$0xf]  ;;  %v3193_v34 = vld [vmem:[#allocation4 + $0x70] sm:$0xf0]  ;;  %v2412_v36 = vor.u32 %v3186_v32, %v2411_v31  ;;  %v3176_v37 = vld [vmem:[%s3847_s1 + $0x1c] sm:$0xf] }
   0xe   :  { %v2444_v35 = vor.u32 %v3193_v34, %v2443_v33  ;;  %v2365_v38 = vld [vmem:[%s3847_s1 + $0x24] sm:$0xf0]  ;;  %v2399_v39 = vld [vmem:[#allocation4 + $0x18] sm:$0xf]  ;;  %v3183_v40 = vld [vmem:[#allocation4 + $0x20] sm:$0xf0] }
   0xf   :  { %2373 = vmatmul.msk.bf16.vlgmr.msra.gmra.mxu0 %vm124_vm0, %v3541_v14  ;;  %v2368_v41 = vor.u32 %v3176_v37, %v2365_v38  ;;  %v3554_v42 = vld [vmem:[%s3846_s0 + $0x8] sm:$0xff]  ;;  %v2400_v43 = vor.u32 %v3183_v40, %v2399_v39  ;;  %v2387_v44 = vld [vmem:[#allocation4] sm:$0xf]  ;;  %v3173_v45 = vld [vmem:[%s3847_s1 + $0x4] sm:$0xf] }
  0x10   :  { %447 = vmatpush.bf16.msrb.mxu0 %v2480_v17  ;;  %v2353_v46 = vld [vmem:[%s3847_s1 + $0xc] sm:$0xf0]  ;;  %v3180_v47 = vld [vmem:[#allocation4 + $0x8] sm:$0xf0]  ;;  %v3190_v50 = vld [vmem:[#allocation4 + $0x58] sm:$0xf0] }
  0x11   :  { %423 = vmatpush.bf16.msra.mxu3 %v2448_v18  ;;  %172 = vmatpush.bf16.msra.mxu1 %v2368_v41  ;;  %v2356_v48 = vor.u32 %v3173_v45, %v2353_v46  ;;  %v2431_v49 = vld [vmem:[#allocation4 + $0x50] sm:$0xf]  ;;  %v3200_v51 = vld [vmem:[#allocation4 + $0xac] sm:$0xf]  ;;  %v2473_v52 = vld [vmem:[#allocation4 + $0xb4] sm:$0xf0]  ;;  %v2388_v54 = vor.u32 %v3180_v47, %v2387_v44 }
  0x12   :  { %v2432_v53 = vor.u32 %v3190_v50, %v2431_v49  ;;  %v3567_v55 = vld [vmem:[%s3851_s5] sm:$0xff]  ;;  %v2476_v56 = vor.u32 %v3200_v51, %v2473_v52  ;;  %v3178_v58 = vld [vmem:[%s3847_s1 + $0x28] sm:$0xf0]  ;;  %v2419_v59 = vld [vmem:[#allocation4 + $0x38] sm:$0xf] }
  0x13   :  { %v2371_v57 = vld [vmem:[%s3847_s1 + $0x20] sm:$0xf]  ;;  %v3197_v60 = vld [vmem:[#allocation4 + $0x94] sm:$0xf]  ;;  %v3187_v63 = vld [vmem:[#allocation4 + $0x40] sm:$0xf0]  ;;  %v252_v0 = vpack.c.bf16 %v3567_v55, %v3567_v55 }
  0x14   :  { %448 = vmatpush.bf16.msrb.mxu0 %v2468_v23  ;;  %v2461_v61 = vld [vmem:[#allocation4 + $0x9c] sm:$0xf0]  ;;  %v2372_v62 = vor.u32 %v3178_v58, %v2371_v57  ;;  %v2420_v1 = vor.u32 %v3187_v63, %v2419_v59  ;;  %v2359_v2 = vld [vmem:[%s3847_s1 + $0x8] sm:$0xf]  ;;  %v3175_v3 = vld [vmem:[%s3847_s1 + $0x10] sm:$0xf0] }
  0x15   :  { %424 = vmatpush.bf16.msra.mxu3 %v2436_v26  ;;  %173 = vmatpush.bf16.msra.mxu1 %v2356_v48  ;;  %v2407_v4 = vld [vmem:[#allocation4 + $0x20] sm:$0xf]  ;;  %v2464_v5 = vor.u32 %v3197_v60, %v2461_v61  ;;  %v3194_v6 = vld [vmem:[#allocation4 + $0x7c] sm:$0xf]  ;;  %v2360_v7 = vor.u32 %v3175_v3, %v2359_v2  ;;  %v3184_v8 = vld [vmem:[#allocation4 + $0x28] sm:$0xf0] }
  0x16   :  { %201 = vmatpush.bf16.msra.mxu2 %v2372_v62  ;;  %v2449_v9 = vld [vmem:[#allocation4 + $0x84] sm:$0xf0]  ;;  %v2408_v10 = vor.u32 %v3184_v8, %v2407_v4  ;;  %v3181_v12 = vld [vmem:[#allocation4 + $0x10] sm:$0xf0]  ;;  %v3191_v17 = vld [vmem:[#allocation4 + $0x64] sm:$0xf] }
  0x17   :  { %v2395_v11 = vld [vmem:[#allocation4 + $0x8] sm:$0xf]  ;;  %v2452_v13 = vor.u32 %v3194_v6, %v2449_v9  ;;  %v3171_v16 = vld [vmem:[%s3846_s0 + $0x10] sm:$0xff]  ;;  %v3188_v20 = vld [vmem:[#allocation4 + $0x4c] sm:$0xf] }
  0x18   :  { %449 = vmatpush.bf16.msrb.mxu0 %v2456_v29  ;;  %2377 = vmatmul.msk.bf16.vlgmr.msra.gmra.mxu1 %vm124_vm0, %v3541_v14  ;;  %v2396_v15 = vor.u32 %v3181_v12, %v2395_v11  ;;  %v2437_v18 = vld [vmem:[#allocation4 + $0x6c] sm:$0xf0]  ;;  %v2425_v21 = vld [vmem:[#allocation4 + $0x54] sm:$0xf0]  ;;  %v3185_v23 = vld [vmem:[#allocation4 + $0x34] sm:$0xf] }
  0x19   :  { %425 = vmatpush.bf16.msra.mxu3 %v2424_v30  ;;  %v2440_v19 = vor.u32 %v3191_v17, %v2437_v18  ;;  %v2428_v22 = vor.u32 %v3188_v20, %v2425_v21  ;;  %v2413_v24 = vld [vmem:[#allocation4 + $0x3c] sm:$0xf0]  ;;  %v3182_v26 = vld [vmem:[#allocation4 + $0x1c] sm:$0xf]  ;;  %v2401_v27 = vld [vmem:[#allocation4 + $0x24] sm:$0xf0] }
  0x1a   :  { %202 = vmatpush.bf16.msra.mxu2 %v2360_v7  ;;  %v2416_v25 = vor.u32 %v3185_v23, %v2413_v24  ;;  %v3172_v28 = vld [vmem:[%s3846_s0 + $0x18] sm:$0xff]  ;;  %v3179_v29 = vld [vmem:[#allocation4 + $0x4] sm:$0xf]  ;;  %v2389_v30 = vld [vmem:[#allocation4 + $0xc] sm:$0xf0] }
  0x1b   :  { %v2392_v31 = vor.u32 %v3179_v29, %v2389_v30  ;;  %v3606_v33 = vld [vmem:[%s3848_s2] sm:$0x7]  ;;  %v2569_v37 = vld [vmem:[#allocation4 + $0xa8] sm:$0xf]  ;;  %v3225_v38 = vld [vmem:[#allocation4 + $0xb0] sm:$0xf0] }
  0x1c   :  { %450 = vmatpush.bf16.msrb.mxu0 %v2444_v35  ;;  %v3609_v34 = vperm.slane %v3606_v33, 0  ;;  %v3224_v39 = vld [vmem:[#allocation4 + $0xac] sm:$0xf]  ;;  %v2570_v41 = vor.u32 %v3225_v38, %v2569_v37  ;;  %v3222_v44 = vld [vmem:[#allocation4 + $0x98] sm:$0xf0] }
  0x1d   :  { %426 = vmatpush.bf16.msra.mxu3 %v2412_v36  ;;  %2381 = vmatmul.msk.bf16.vlgmr.msra.gmra.mxu2 %vm124_vm0, %v3541_v14  ;;  %v2404_v14 = vor.u32 %v3182_v26, %v2401_v27  ;;  %v3221_v47 = vld [vmem:[#allocation4 + $0x94] sm:$0xf]  ;;  %v2559_v48 = vld [vmem:[#allocation4 + $0x9c] sm:$0xf0]  ;;  %v2545_v51 = vld [vmem:[#allocation4 + $0x78] sm:$0xf] }
  0x1e   :  { %680 = vmatpush.bf16.msrb.mxu1 %v2570_v41  ;;  %v2562_v50 = vor.u32 %v3221_v47, %v2559_v48  ;;  %v3219_v52 = vld [vmem:[#allocation4 + $0x80] sm:$0xf0]  ;;  %v3623_v60 = vld [vmem:[%s3850_s4] sm:$0x7]  ;;  %v3226_v6 = vld [vmem:[#allocation4 + $0xb8] sm:$0xf0] }
  0x1f   :  { %2374 = vmatmul.msk.bf16.gmra.mxu0 %vm124_vm0, %v3554_v42  ;;  %v287_v61 = vperm.slane %v3623_v60, 0  ;;  %v3223_v11 = vld [vmem:[#allocation4 + $0xa0] sm:$0xf0]  ;;  %v3220_v17 = vld [vmem:[#allocation4 + $0x88] sm:$0xf0] }
  0x20   :  { %451 = vmatpush.bf16.msrb.mxu0 %v2432_v53  ;;  %v3218_v53 = vld [vmem:[#allocation4 + $0x7c] sm:$0xf]  ;;  %v2533_v20 = vld [vmem:[#allocation4 + $0x60] sm:$0xf]  ;;  %v3216_v21 = vld [vmem:[#allocation4 + $0x68] sm:$0xf0] }
  0x21   :  { %427 = vmatpush.bf16.msra.mxu3 %v2400_v43  ;;  %v2557_v43 = vld [vmem:[#allocation4 + $0x90] sm:$0xf]  ;;  %v2534_v24 = vor.u32 %v3216_v21, %v2533_v20  ;;  %v2521_v30 = vld [vmem:[#allocation4 + $0x48] sm:$0xf]  ;;  %v2523_v37 = vld [vmem:[#allocation4 + $0x54] sm:$0xf0] }
  0x22   :  { %v2558_v49 = vor.u32 %v3222_v44, %v2557_v43  ;;  %v2529_v38 = vld [vmem:[#allocation4 + $0x50] sm:$0xf]  ;;  %v3642_v43 = vperm.slane %v3606_v33, 1  ;;  %v3210_v48 = vld [vmem:[#allocation4 + $0x38] sm:$0xf0] }
  0x23   :  { %v2509_v47 = vld [vmem:[#allocation4 + $0x30] sm:$0xf]  ;;  %v2493_v21 = vld [vmem:[#allocation4 + $0x8] sm:$0xf] }
  0x24   :  { %452 = vmatpush.bf16.msrb.mxu0 %v2420_v1  ;;  %681 = vmatpush.bf16.msrb.mxu1 %v2558_v49  ;;  %v2487_v20 = vld [vmem:[#allocation4 + $0xc] sm:$0xf0] }
  0x25   :  { %428 = vmatpush.bf16.msra.mxu3 %v2388_v54  ;;  %v2547_v54 = vld [vmem:[#allocation4 + $0x84] sm:$0xf0] }
  0x26   :  { %v2550_v57 = vor.u32 %v3218_v53, %v2547_v54  ;;  %v2517_v53 = vld [vmem:[#allocation4 + $0x38] sm:$0xf] }
  0x28   :  { %429 = vmatmul.bf16.vlgmr.msra.gmra.mxu3 %v252_v0  ;;  %453 = vmatpush.bf16.msrb.mxu0 %v2408_v10  ;;  %v2565_v10 = vld [vmem:[#allocation4 + $0x98] sm:$0xf] }
  0x29   :  { %434 = vmatpush.bf16.msrb.mxu3 %v2476_v56  ;;  %2378 = vmatmul.msk.bf16.gmra.mxu1 %vm124_vm0, %v3554_v42  ;;  %v2546_v56 = vor.u32 %v3219_v52, %v2545_v51  ;;  %v3209_v51 = vld [vmem:[#allocation4 + $0x34] sm:$0xf]  ;;  %v2511_v52 = vld [vmem:[#allocation4 + $0x3c] sm:$0xf0] }
  0x2b   :  { %682 = vmatpush.bf16.msrb.mxu1 %v2546_v56 }
  0x2c   :  { %454 = vmatpush.bf16.msrb.mxu0 %v2396_v15 }
  0x2d   :  { %435 = vmatpush.bf16.msrb.mxu3 %v2464_v5  ;;  %2382 = vmatmul.msk.bf16.gmra.mxu2 %vm124_vm0, %v3554_v42  ;;  %v2571_v42 = vld [vmem:[#allocation4 + $0xb4] sm:$0xf0]  ;;  %v2577_v5 = vld [vmem:[#allocation4 + $0xb0] sm:$0xf] }
  0x2e   :  { %v2574_v46 = vor.u32 %v3224_v39, %v2571_v42  ;;  %v2578_v7 = vor.u32 %v3226_v6, %v2577_v5  ;;  %v3214_v39 = vld [vmem:[#allocation4 + $0x58] sm:$0xf0]  ;;  %v2499_v5 = vld [vmem:[#allocation4 + $0x24] sm:$0xf0]  ;;  %v2505_v6 = vld [vmem:[#allocation4 + $0x20] sm:$0xf] }
  0x2f   :  { %2375 = vmatmul.msk.bf16.gmra.mxu0 %vm124_vm0, %v3171_v16  ;;  %683 = vmatpush.bf16.msrb.mxu1 %v2534_v24  ;;  %v2530_v41 = vor.u32 %v3214_v39, %v2529_v38 }
  0x30   :  { %693 = vmatpush.bf16.msrb.mxu2 %v2574_v46  ;;  %v288_v46 = vperm.slane %v3623_v60, 1 }
  0x31   :  { %436 = vmatpush.bf16.msrb.mxu3 %v2452_v13  ;;  %v2566_v13 = vor.u32 %v3223_v11, %v2565_v10 }
  0x34   :  { %694 = vmatpush.bf16.msrb.mxu2 %v2562_v50  ;;  %v2510_v50 = vor.u32 %v3210_v48, %v2509_v47 }
  0x35   :  { %437 = vmatpush.bf16.msrb.mxu3 %v2440_v19 }
  0x38   :  { %695 = vmatpush.bf16.msrb.mxu2 %v2550_v57  ;;  %v2514_v57 = vor.u32 %v3209_v51, %v2511_v52 }
  0x39   :  { %438 = vmatpush.bf16.msrb.mxu3 %v2428_v22  ;;  %2379 = vmatmul.msk.bf16.gmra.mxu1 %vm124_vm0, %v3171_v16  ;;  %v3215_v22 = vld [vmem:[#allocation4 + $0x64] sm:$0xf] }
  0x3d   :  { %439 = vmatpush.bf16.msrb.mxu3 %v2416_v25  ;;  %2383 = vmatmul.msk.bf16.gmra.mxu2 %vm124_vm0, %v3171_v16  ;;  %v2553_v16 = vld [vmem:[#allocation4 + $0x80] sm:$0xf]  ;;  %v2535_v25 = vld [vmem:[#allocation4 + $0x6c] sm:$0xf0] }
  0x3e   :  { %v2554_v19 = vor.u32 %v3220_v17, %v2553_v16  ;;  %v2538_v27 = vor.u32 %v3215_v22, %v2535_v25  ;;  %v3203_v16 = vld [vmem:[#allocation4 + $0x4] sm:$0xf]  ;;  %v3205_v22 = vld [vmem:[#allocation4 + $0x10] sm:$0xf0] }
  0x3f   :  { %2376 = vmatmul.msk.bf16.gmra.mxu0 %vm124_vm0, %v3172_v28  ;;  %v2490_v24 = vor.u32 %v3203_v16, %v2487_v20  ;;  %v2494_v25 = vor.u32 %v3205_v22, %v2493_v21  ;;  %v3248_v16 = vld [vmem:[#allocation4 + $0xac] sm:$0xf]  ;;  %v2675_v20 = vld [vmem:[#allocation4 + $0xb0] sm:$0xf]  ;;  %v3250_v21 = vld [vmem:[#allocation4 + $0xb8] sm:$0xf0] }
  0x40   :  { %696 = vmatpush.bf16.msrb.mxu2 %v2538_v27 }
  0x41   :  { %440 = vmatpush.bf16.msrb.mxu3 %v2404_v14  ;;  %v2541_v14 = vld [vmem:[#allocation4 + $0x68] sm:$0xf] }
  0x45   :  { %441 = vmatpush.bf16.msrb.mxu3 %v2392_v31  ;;  %v3213_v31 = vld [vmem:[#allocation4 + $0x50] sm:$0xf0] }
  0x48   :  { %442 = vmatmul.bf16.vlgmr.msrb.gmra.mxu3 %v252_v0 }
  0x49   :  { %2380 = vmatmul.msk.bf16.gmra.mxu1 %vm124_vm0, %v3172_v28  ;;  %706 = vmatpush.bf16.msra.mxu3 %v2578_v7  ;;  %v3208_v7 = vld [vmem:[#allocation4 + $0x28] sm:$0xf0] }
  0x4a   :  { %v2506_v10 = vor.u32 %v3208_v7, %v2505_v6 }
  0x4d   :  { %2384 = vmatmul.msk.bf16.gmra.mxu2 %vm124_vm0, %v3172_v28  ;;  %707 = vmatpush.bf16.msra.mxu3 %v2566_v13  ;;  %v3217_v28 = vld [vmem:[#allocation4 + $0x70] sm:$0xf0]  ;;  %v2485_v13 = vld [vmem:[#allocation4] sm:$0xf] }
  0x4e   :  { %v2542_v29 = vor.u32 %v3217_v28, %v2541_v14  ;;  %v289_v28 = vperm.slane %v3623_v60, 2  ;;  %v3660_v60 = vperm.slane %v3606_v33, 2 }
  0x4f   :  { %455 = vmatmul.bf16.vlgmr.msrb.gmra.mxu0 %v252_v0 }
  0x51   :  { %708 = vmatpush.bf16.msra.mxu3 %v2554_v19 }
  0x55   :  { %709 = vmatpush.bf16.msra.mxu3 %v2542_v29 }
  0x59   :  { %710 = vmatpush.bf16.msra.mxu3 %v2530_v41 }
  0x8c   :  { %v146_v32 = vpop.f32.mrf.mxu0 }
  0x8d   :  { %v147_v63 = vadd.f32 %v146_v32, %v3609_v34  ;;  %v3212_v32 = vld [vmem:[#allocation4 + $0x4c] sm:$0xf] }
  0x94   :  { %v148_v35 = vpop.f32.mrf.mxu0 }
  0x95   :  { %v3612_v36 = vadd.f32 %v148_v35, %v3609_v34  ;;  %v2522_v35 = vor.u32 %v3213_v31, %v2521_v30  ;;  %v175_v54 = vpop.f32.mrf.mxu1 }
  0x97   :  { %684 = vmatpush.bf16.msrb.mxu1 %v2522_v35 }
  0x9b   :  { %685 = vmatpush.bf16.msrb.mxu1 %v2510_v50 }
  0x9c   :  { %v151_v40 = vpop.f32.mrf.mxu0 }
  0x9d   :  { %v3615_v45 = vadd.f32 %v151_v40, %v3609_v34  ;;  %v2526_v40 = vor.u32 %v3212_v32, %v2523_v37 }
  0x9f   :  { %697 = vmatpush.bf16.msrb.mxu2 %v2526_v40 }
  0xa0   :  { %v204_v41 = vpop.f32.mrf.mxu2 }
  0xa1   :  { %v205_v47 = vadd.f32 %v204_v41, %v3660_v60  ;;  %v3242_v41 = vld [vmem:[#allocation4 + $0x7c] sm:$0xf] }
  0xa3   :  { %698 = vmatpush.bf16.msrb.mxu2 %v2514_v57 }
  0xa4   :  { %v153_v58 = vpop.f32.mrf.mxu0 }
  0xa5   :  { %v3618_v59 = vadd.f32 %v153_v58, %v3609_v34  ;;  %v3211_v58 = vld [vmem:[#allocation4 + $0x40] sm:$0xf0] }
  0xab   :  { %v430_v62 = vpop.f32.mrf.mxu3 }
  0xac   :  { %v431_v0 = vadd.f32 %v430_v62, %v287_v61  ;;  %v156_v1 = vpop.f32.mrf.mxu0  ;;  %v176_v61 = vadd.f32 %v175_v54, %v3642_v43  ;;  %v2518_v62 = vor.u32 %v3211_v58, %v2517_v53 }
  0xad   :  { %v3628_v2 = vadd.f32 %v156_v1, %v3609_v34  ;;  %v3207_v1 = vld [vmem:[#allocation4 + $0x20] sm:$0xf0] }
  0xae   :  { %v460_v3 = vadd.f32 %v431_v0, %v147_v63  ;;  %v2497_v0 = vld [vmem:[#allocation4 + $0x18] sm:$0xf]  ;;  %711 = vmatpush.bf16.msra.mxu3 %v2518_v62 }
  0xb0   :  { %v2481_v4 = vmul.f32 -1.442695, %v460_v3 }
  0xb2   :  { %3374 = vpow2.f32 %v2481_v4  ;;  %v2498_v4 = vor.u32 %v3207_v1, %v2497_v0  ;;  %712 = vmatpush.bf16.msra.mxu3 %v2506_v10 }
  0xb3   :  { %v432_v8 = vpop.f32.mrf.mxu3 }
  0xb4   :  { %v158_v9 = vpop.f32.mrf.mxu0  ;;  %686 = vmatpush.bf16.msrb.mxu1 %v2498_v4 }
  0xb5   :  { %v3631_v12 = vadd.f32 %v158_v9, %v3609_v34 }
  0xb6   :  { %713 = vmatpush.bf16.msra.mxu3 %v2494_v25  ;;  %v2655_v25 = vld [vmem:[#allocation4 + $0x90] sm:$0xf] }
  0xb8   :  { %v3375_v15 = vpop.eup %3374 }
  0xb9   :  { %v3633_v18 = vadd.f32 1.0, %v3375_v15  ;;  %v3204_v15 = vld [vmem:[#allocation4 + $0x8] sm:$0xf0] }
  0xba   :  { %v2486_v19 = vor.u32 %v3204_v15, %v2485_v13  ;;  %v2667_v13 = vld [vmem:[#allocation4 + $0xa8] sm:$0xf]  ;;  %v3249_v15 = vld [vmem:[#allocation4 + $0xb0] sm:$0xf0] }
  0xbb   :  { %3376 = vrcp.f32 %v3633_v18  ;;  %v476_v32 = vand.u32 2147483648, %v3633_v18  ;;  %vm470_vm2 = vweird.f32 %v3633_v18  ;;  %v474_v37 = vand.u32 2147483647, %v3633_v18 }
  0xbc   :  { %v161_v23 = vpop.f32.mrf.mxu0  ;;  %687 = vmatpush.bf16.msrb.mxu1 %v2486_v19  ;;  %v2669_v19 = vld [vmem:[#allocation4 + $0xb4] sm:$0xf0] }
  0xbd   :  { %v3637_v26 = vadd.f32 %v161_v23, %v3609_v34  ;;  %v477_v40 = vor.u32 1.1754944e-38, %v476_v32  ;;  %vm475_vm4 = vcmp.eq.f32.partialorder %v474_v37, 8.507059e+37  ;;  %v2672_v22 = vor.u32 %v3248_v16, %v2669_v19  ;;  %v3236_v16 = vld [vmem:[#allocation4 + $0x4c] sm:$0xf]  ;;  %v2621_v19 = vld [vmem:[#allocation4 + $0x54] sm:$0xf0] }
  0xc0   :  { %952 = vmatpush.bf16.msra.mxu1 %v2672_v22 }
  0xc1   :  { %v3639_v42 = vpop.eup %3376 }
  0xc2   :  { %v466_v56 = vmul.f32 %v3639_v42, %v3633_v18  ;;  %vm471_vm1 = vweird.f32 %v3639_v42 }
  0xc3   :  { %vm472_vm3 = vmor %vm470_vm2, %vm471_vm1 }
  0xc4   :  { %v163_v44 = vpop.f32.mrf.mxu0  ;;  %v467_v8 = vsub.f32 1.0, %v466_v56 }
  0xc5   :  { %v3646_v49 = vadd.f32 %v163_v44, %v3609_v34  ;;  %v3206_v34 = vld [vmem:[#allocation4 + $0x1c] sm:$0xf] }
  0xc6   :  { %v2502_v9 = vor.u32 %v3206_v34, %v2499_v5  ;;  %v468_v27 = vmul.f32 %v3639_v42, %v467_v8  ;;  %v3671_v34 = vpop.f32.mrf.mxu1 }
  0xc8   :  { %699 = vmatpush.bf16.msrb.mxu2 %v2502_v9  ;;  %v469_v29 = vadd.f32 %v3639_v42, %v468_v27  ;;  %v3246_v27 = vld [vmem:[#allocation4 + $0x98] sm:$0xf0] }
  0xca   :  { %v473_v39 = vsel %vm472_vm3, %v3639_v42, %v469_v29  ;;  %v2657_v29 = vld [vmem:[#allocation4 + $0x9c] sm:$0xf0] }
  0xcb   :  { %v443_v63 = vpop.f32.mrf.mxu3  ;;  %v478_v44 = vsel %vm475_vm4, %v477_v40, %v473_v39  ;;  %v2643_v39 = vld [vmem:[#allocation4 + $0x78] sm:$0xf]  ;;  %v3243_v40 = vld [vmem:[#allocation4 + $0x80] sm:$0xf0] }
  0xcc   :  { %v444_v3 = vadd.f32 %v443_v63, %v288_v46  ;;  %v456_v17 = vpop.f32.mrf.mxu0  ;;  %700 = vmatpush.bf16.msrb.mxu2 %v2490_v24 }
  0xcd   :  { %v457_v38 = vadd.f32 %v456_v17, %v289_v28  ;;  %v2668_v17 = vor.u32 %v3249_v15, %v2667_v13  ;;  %v2656_v28 = vor.u32 %v3246_v27, %v2655_v25  ;;  %v2619_v13 = vld [vmem:[#allocation4 + $0x48] sm:$0xf]  ;;  %v3237_v15 = vld [vmem:[#allocation4 + $0x50] sm:$0xf0]  ;;  %v2624_v25 = vor.u32 %v3236_v16, %v2621_v19 }
  0xce   :  { %v480_v11 = vadd.f32 %v444_v3, %v176_v61  ;;  %v3673_v3 = vpop.f32.mrf.mxu2  ;;  %v3675_v4 = vpop.f32.mrf.mxu1 }
  0xcf   :  { %v500_v46 = vmul.f32 %v478_v44, %v457_v38  ;;  %939 = vmatpush.bf16.msra.mxu0 %v2668_v17  ;;  %v3700_v38 = vld [vmem:[%s3850_s4] sm:$0x7]  ;;  %v2644_v44 = vor.u32 %v3243_v40, %v2643_v39  ;;  %v2620_v17 = vor.u32 %v3237_v15, %v2619_v13  ;;  %v2615_v39 = vld [vmem:[#allocation4 + $0x38] sm:$0xf]  ;;  %v178_v40 = vadd.f32 %v3671_v34, %v3642_v43  ;;  %v3228_v34 = vld [vmem:[#allocation4 + $0x8] sm:$0xf0] }
  0xd0   :  { %v2482_v23 = vmul.f32 -1.442695, %v480_v11  ;;  %v2591_v13 = vld [vmem:[#allocation4 + $0x8] sm:$0xf]  ;;  %v3229_v15 = vld [vmem:[#allocation4 + $0x10] sm:$0xf0] }
  0xd1   :  { %v501_v51 = vadd.f32 %v500_v46, %v205_v47  ;;  %v2645_v46 = vld [vmem:[#allocation4 + $0x84] sm:$0xf0]  ;;  %v2651_v47 = vld [vmem:[#allocation4 + $0x80] sm:$0xf] }
  0xd2   :  { %3378 = vpow2.f32 %v2482_v23  ;;  %v2676_v23 = vor.u32 %v3250_v21, %v2675_v20  ;;  %v2627_v20 = vld [vmem:[#allocation4 + $0x50] sm:$0xf]  ;;  %v3238_v21 = vld [vmem:[#allocation4 + $0x58] sm:$0xf0] }
  0xd3   :  { %v445_v14 = vpop.f32.mrf.mxu3  ;;  %940 = vmatpush.bf16.msra.mxu0 %v2656_v28  ;;  %v2628_v27 = vor.u32 %v3238_v21, %v2627_v20  ;;  %v2607_v28 = vld [vmem:[#allocation4 + $0x30] sm:$0xf] }
  0xd4   :  { %v458_v30 = vpop.f32.mrf.mxu0  ;;  %965 = vmatpush.bf16.msra.mxu2 %v2676_v23  ;;  %v3245_v14 = vld [vmem:[#allocation4 + $0x94] sm:$0xf]  ;;  %v547_v23 = vperm.slane %v3700_v38, 1 }
  0xd5   :  { %v2663_v30 = vld [vmem:[#allocation4 + $0x98] sm:$0xf]  ;;  %v2660_v32 = vor.u32 %v3245_v14, %v2657_v29  ;;  %v3234_v29 = vld [vmem:[#allocation4 + $0x38] sm:$0xf0] }
  0xd6   :  { %v3677_v5 = vpop.f32.mrf.mxu2 }
  0xd7   :  { %953 = vmatpush.bf16.msra.mxu1 %v2660_v32  ;;  %941 = vmatpush.bf16.msra.mxu0 %v2644_v44  ;;  %v3233_v32 = vld [vmem:[#allocation4 + $0x34] sm:$0xf] }
  0xd8   :  { %v3379_v31 = vpop.eup %3378 }
  0xd9   :  { %v484_v35 = vadd.f32 1.0, %v3379_v31  ;;  %v3247_v31 = vld [vmem:[#allocation4 + $0xa0] sm:$0xf0] }
  0xdb   :  { %3380 = vrcp.f32 %v484_v35  ;;  %v496_v18 = vand.u32 2147483648, %v484_v35  ;;  %v494_v54 = vand.u32 2147483647, %v484_v35  ;;  %vm490_vm6 = vweird.f32 %v484_v35 }
  0xdc   :  { %3382 = vtanh.f32 %v501_v51 }
  0xdd   :  { %v497_v33 = vor.u32 1.1754944e-38, %v496_v18  ;;  %vm495_vm8 = vcmp.eq.f32.partialorder %v494_v54, 8.507059e+37  ;;  %v2631_v18 = vld [vmem:[#allocation4 + $0x60] sm:$0xf]  ;;  %v3239_v54 = vld [vmem:[#allocation4 + $0x64] sm:$0xf] }
  0xde   :  { %v3681_v6 = vpop.f32.mrf.mxu2 }
  0xe1   :  { %v3381_v48 = vpop.eup %3380 }
  0xe2   :  { %v486_v50 = vmul.f32 %v3381_v48, %v484_v35  ;;  %vm491_vm5 = vweird.f32 %v3381_v48  ;;  %v3383_v61 = vpop.eup %3382  ;;  %v2664_v35 = vor.u32 %v3247_v31, %v2663_v30  ;;  %v2608_v31 = vor.u32 %v3234_v29, %v2607_v28 }
  0xe3   :  { %vm492_vm7 = vmor %vm490_vm6, %vm491_vm5 }
  0xe4   :  { %v487_v52 = vsub.f32 1.0, %v486_v50  ;;  %966 = vmatpush.bf16.msra.mxu2 %v2664_v35  ;;  %v2648_v50 = vor.u32 %v3242_v41, %v2645_v46  ;;  %v2609_v35 = vld [vmem:[#allocation4 + $0x3c] sm:$0xf0]  ;;  %v3235_v46 = vld [vmem:[#allocation4 + $0x40] sm:$0xf0] }
  0xe5   :  { %v2612_v44 = vor.u32 %v3233_v32, %v2609_v35 }
  0xe6   :  { %v488_v53 = vmul.f32 %v3381_v48, %v487_v52  ;;  %v3685_v8 = vpop.f32.mrf.mxu2  ;;  %v546_v52 = vperm.slane %v3700_v38, 0  ;;  %954 = vmatpush.bf16.msra.mxu1 %v2648_v50 }
  0xe8   :  { %v489_v42 = vadd.f32 %v3381_v48, %v488_v53  ;;  %v3240_v53 = vld [vmem:[#allocation4 + $0x68] sm:$0xf0] }
  0xea   :  { %v493_v56 = vsel %vm492_vm7, %v3381_v48, %v489_v42  ;;  %v3244_v48 = vld [vmem:[#allocation4 + $0x88] sm:$0xf0] }
  0xeb   :  { %v498_v57 = vsel %vm495_vm8, %v497_v33, %v493_v56  ;;  %v2652_v51 = vor.u32 %v3244_v48, %v2651_v47  ;;  %v2632_v33 = vor.u32 %v3240_v53, %v2631_v18  ;;  %v2633_v56 = vld [vmem:[#allocation4 + $0x6c] sm:$0xf0]  ;;  %v2595_v47 = vld [vmem:[#allocation4 + $0x18] sm:$0xf]  ;;  %v3231_v48 = vld [vmem:[#allocation4 + $0x20] sm:$0xf0] }
  0xec   :  { %v503_v58 = vsub.f32 1.0, %v498_v57  ;;  %v505_v63 = vmul.f32 %v498_v57, %v3567_v55  ;;  %v3679_v55 = vpop.f32.mrf.mxu1  ;;  %v2639_v57 = vld [vmem:[#allocation4 + $0x68] sm:$0xf]  ;;  %v3230_v18 = vld [vmem:[#allocation4 + $0x1c] sm:$0xf] }
  0xed   :  { %967 = vmatpush.bf16.msra.mxu2 %v2652_v51  ;;  %942 = vmatpush.bf16.msra.mxu0 %v2632_v33  ;;  %v2616_v51 = vor.u32 %v3235_v46, %v2615_v39  ;;  %v2597_v53 = vld [vmem:[#allocation4 + $0x24] sm:$0xf0] }
  0xee   :  { %v504_v62 = vmul.f32 %v3383_v61, %v503_v58  ;;  %v3689_v10 = vpop.f32.mrf.mxu2  ;;  %v3241_v58 = vld [vmem:[#allocation4 + $0x70] sm:$0xf0]  ;;  %v2636_v61 = vor.u32 %v3239_v54, %v2633_v56  ;;  %v2603_v54 = vld [vmem:[#allocation4 + $0x20] sm:$0xf]  ;;  %v2600_v56 = vor.u32 %v3230_v18, %v2597_v53 }
  0xf0   :  { %v3664_v0 = vadd.f32 %v505_v63, %v504_v62  ;;  %v2640_v62 = vor.u32 %v3241_v58, %v2639_v57  ;;  %955 = vmatpush.bf16.msra.mxu1 %v2636_v61  ;;  %v3232_v57 = vld [vmem:[#allocation4 + $0x28] sm:$0xf0]  ;;  %v2583_v58 = vld [vmem:[#allocation4] sm:$0xf] }
  0xf1   :  { %943 = vmatpush.bf16.msra.mxu0 %v2620_v17  ;;  %v2604_v61 = vor.u32 %v3232_v57, %v2603_v54  ;;  %v2584_v16 = vor.u32 %v3228_v34, %v2583_v58 }
  0xf2   :  { %v507_v1 = vpack.c.bf16 %v3664_v0, %v3664_v0  ;;  %968 = vmatpush.bf16.msra.mxu2 %v2640_v62  ;;  %v3227_v62 = vld [vmem:[#allocation4 + $0x4] sm:$0xf] }
  0xf4   :  { %508 = vst [vmem:[%s3852_s6] sm:$0xf] %v507_v1  ;;  %688 = vmatmul.bf16.vlgmr.msrb.gmra.mxu1 %v507_v1  ;;  %701 = vmatmul.bf16.vlgmr.msrb.gmra.mxu2 %v507_v1  ;;  %v3683_v7 = vpop.f32.mrf.mxu1 }
  0xf5   :  { %714 = vmatmul.bf16.vlgmr.msra.gmra.mxu3 %v507_v1  ;;  %956 = vmatpush.bf16.msra.mxu1 %v2624_v25 }
  0xf6   :  { %v3693_v24 = vpop.f32.mrf.mxu2  ;;  %969 = vmatpush.bf16.msra.mxu2 %v2628_v27  ;;  %944 = vmatpush.bf16.msra.mxu0 %v2608_v31  ;;  %v548_v31 = vperm.slane %v3700_v38, 2 }
  0xf9   :  { %957 = vmatpush.bf16.msra.mxu1 %v2612_v44 }
  0xfa   :  { %970 = vmatpush.bf16.msra.mxu2 %v2616_v51 }
  0xfc   :  { %v3687_v9 = vpop.f32.mrf.mxu1 }
  0xfd   :  { %958 = vmatpush.bf16.msra.mxu1 %v2600_v56 }
  0xfe   :  { %v3703_v42 = vpop.f32.mrf.mxu2  ;;  %971 = vmatpush.bf16.msra.mxu2 %v2604_v61 }
 0x104   :  { %v3691_v11 = vpop.f32.mrf.mxu1 }
 0x10c   :  { %v3695_v37 = vpop.f32.mrf.mxu1 }
 0x171   :  { %v689_v63 = vpop.f32.mrf.mxu1 }
 0x172   :  { %v690_v1 = vadd.f32 %v689_v63, %v546_v52  ;;  %v2596_v52 = vor.u32 %v3231_v48, %v2595_v47  ;;  %v2585_v63 = vld [vmem:[#allocation4 + $0xc] sm:$0xf0] }
 0x173   :  { %v2588_v19 = vor.u32 %v3227_v62, %v2585_v63 }
 0x174   :  { %v719_v22 = vadd.f32 %v690_v1, %v3612_v36  ;;  %945 = vmatpush.bf16.msra.mxu0 %v2596_v52 }
 0x175   :  { %959 = vmatpush.bf16.msra.mxu1 %v2588_v19  ;;  %v2773_v19 = vld [vmem:[#allocation4 + $0xb0] sm:$0xf] }
 0x176   :  { %v2579_v14 = vmul.f32 -1.442695, %v719_v22  ;;  %v2592_v22 = vor.u32 %v3229_v15, %v2591_v13  ;;  %v3273_v13 = vld [vmem:[#allocation4 + $0xb0] sm:$0xf0]  ;;  %v3272_v15 = vld [vmem:[#allocation4 + $0xac] sm:$0xf] }
 0x177   :  { %v702_v30 = vpop.f32.mrf.mxu2 }
 0x178   :  { %3384 = vpow2.f32 %v2579_v14  ;;  %v703_v36 = vadd.f32 %v702_v30, %v547_v23  ;;  %v715_v41 = vpop.f32.mrf.mxu3  ;;  %946 = vmatpush.bf16.msra.mxu0 %v2584_v16  ;;  %972 = vmatpush.bf16.msra.mxu2 %v2592_v22  ;;  %v2753_v22 = vld [vmem:[#allocation4 + $0x90] sm:$0xf] }
 0x179   :  { %v691_v50 = vpop.f32.mrf.mxu1  ;;  %v716_v47 = vadd.f32 %v715_v41, %v548_v31 }
 0x17a   :  { %v739_v33 = vadd.f32 %v703_v36, %v178_v40  ;;  %v207_v50 = vadd.f32 %v3673_v3, %v3660_v60 }
 0x17c   :  { %v2580_v1 = vmul.f32 -1.442695, %v739_v33 }
 0x17e   :  { %v3385_v17 = vpop.eup %3384  ;;  %3386 = vpow2.f32 %v2580_v1  ;;  %v2765_v1 = vld [vmem:[#allocation4 + $0xa8] sm:$0xf] }
 0x17f   :  { %v723_v20 = vadd.f32 1.0, %v3385_v17  ;;  %v704_v21 = vpop.f32.mrf.mxu2  ;;  %v2766_v16 = vor.u32 %v3273_v13, %v2765_v1  ;;  %v2767_v17 = vld [vmem:[#allocation4 + $0xb4] sm:$0xf0]  ;;  %v2717_v13 = vld [vmem:[#allocation4 + $0x48] sm:$0xf] }
 0x180   :  { %v717_v23 = vpop.f32.mrf.mxu3 }
 0x181   :  { %3388 = vrcp.f32 %v723_v20  ;;  %v735_v30 = vand.u32 2147483648, %v723_v20  ;;  %v733_v35 = vand.u32 2147483647, %v723_v20  ;;  %vm729_vm10 = vweird.f32 %v723_v20  ;;  %1198 = vmatpush.bf16.msrb.mxu3 %v2766_v16  ;;  %v3270_v23 = vld [vmem:[#allocation4 + $0x98] sm:$0xf0] }
 0x182   :  { %v3260_v16 = vld [vmem:[#allocation4 + $0x4c] sm:$0xf] }
 0x183   :  { %v736_v44 = vor.u32 1.1754944e-38, %v735_v30  ;;  %vm734_vm12 = vcmp.eq.f32.partialorder %v733_v35, 8.507059e+37  ;;  %v2741_v35 = vld [vmem:[#allocation4 + $0x78] sm:$0xf] }
 0x184   :  { %v3387_v25 = vpop.eup %3386 }
 0x185   :  { %v743_v27 = vadd.f32 1.0, %v3387_v25  ;;  %v3269_v25 = vld [vmem:[#allocation4 + $0x94] sm:$0xf] }
 0x187   :  { %v3389_v14 = vpop.eup %3388  ;;  %3390 = vrcp.f32 %v743_v27  ;;  %v755_v38 = vand.u32 2147483648, %v743_v27  ;;  %v753_v53 = vand.u32 2147483647, %v743_v27  ;;  %vm749_vm14 = vweird.f32 %v743_v27 }
 0x188   :  { %v725_v28 = vmul.f32 %v3389_v14, %v723_v20  ;;  %vm730_vm9 = vweird.f32 %v3389_v14  ;;  %v3274_v20 = vld [vmem:[#allocation4 + $0xb8] sm:$0xf0] }
 0x189   :  { %vm731_vm11 = vmor %vm729_vm10, %vm730_vm9  ;;  %v756_v57 = vor.u32 1.1754944e-38, %v755_v38  ;;  %vm754_vm0 = vcmp.eq.f32.partialorder %v753_v53, 8.507059e+37  ;;  %v2774_v21 = vor.u32 %v3274_v20, %v2773_v19  ;;  %v3264_v38 = vld [vmem:[#allocation4 + $0x68] sm:$0xf0]  ;;  %v3263_v53 = vld [vmem:[#allocation4 + $0x64] sm:$0xf] }
 0x18a   :  { %v726_v29 = vsub.f32 1.0, %v725_v28  ;;  %v2761_v28 = vld [vmem:[#allocation4 + $0x98] sm:$0xf]  ;;  %v2725_v20 = vld [vmem:[#allocation4 + $0x50] sm:$0xf] }
 0x18b   :  { %1224 = vmatpush.bf16.msrb.mxu1 %v2774_v21  ;;  %v2719_v19 = vld [vmem:[#allocation4 + $0x54] sm:$0xf0] }
 0x18c   :  { %v727_v32 = vmul.f32 %v3389_v14, %v726_v29  ;;  %v3271_v29 = vld [vmem:[#allocation4 + $0xa0] sm:$0xf0] }
 0x18d   :  { %v3391_v39 = vpop.eup %3390  ;;  %v2762_v31 = vor.u32 %v3271_v29, %v2761_v28  ;;  %v3258_v28 = vld [vmem:[#allocation4 + $0x38] sm:$0xf0]  ;;  %v3257_v29 = vld [vmem:[#allocation4 + $0x34] sm:$0xf] }
 0x18e   :  { %v745_v40 = vmul.f32 %v3391_v39, %v743_v27  ;;  %v728_v36 = vadd.f32 %v3389_v14, %v727_v32  ;;  %vm750_vm13 = vweird.f32 %v3391_v39  ;;  %v2754_v27 = vor.u32 %v3270_v23, %v2753_v22  ;;  %v3723_v32 = vld [vmem:[%s3850_s4] sm:$0x7] }
 0x18f   :  { %vm751_vm15 = vmor %vm749_vm14, %vm750_vm13  ;;  %1225 = vmatpush.bf16.msrb.mxu1 %v2762_v31  ;;  %v2722_v23 = vor.u32 %v3260_v16, %v2719_v19 }
 0x190   :  { %v746_v46 = vsub.f32 1.0, %v745_v40  ;;  %v732_v48 = vsel %vm731_vm11, %v3389_v14, %v728_v36  ;;  %v2755_v14 = vld [vmem:[#allocation4 + $0x9c] sm:$0xf0]  ;;  %1199 = vmatpush.bf16.msrb.mxu3 %v2754_v27  ;;  %v3266_v40 = vld [vmem:[#allocation4 + $0x7c] sm:$0xf] }
 0x191   :  { %v737_v51 = vsel %vm734_vm12, %v736_v44, %v732_v48  ;;  %v2758_v30 = vor.u32 %v3269_v25, %v2755_v14  ;;  %v2743_v44 = vld [vmem:[#allocation4 + $0x84] sm:$0xf0] }
 0x192   :  { %v747_v52 = vmul.f32 %v3391_v39, %v746_v46  ;;  %v759_v18 = vmul.f32 %v737_v51, %v716_v47  ;;  %v2749_v46 = vld [vmem:[#allocation4 + $0x80] sm:$0xf]  ;;  %v3268_v47 = vld [vmem:[#allocation4 + $0x88] sm:$0xf0]  ;;  %v2746_v48 = vor.u32 %v3266_v40, %v2743_v44  ;;  %v805_v51 = vperm.slane %v3723_v32, 0 }
 0x193   :  { %v2713_v40 = vld [vmem:[#allocation4 + $0x38] sm:$0xf] }
 0x194   :  { %v760_v54 = vadd.f32 %v759_v18, %v207_v50  ;;  %v748_v33 = vadd.f32 %v3391_v39, %v747_v52  ;;  %v2750_v50 = vor.u32 %v3268_v47, %v2749_v46  ;;  %v806_v52 = vperm.slane %v3723_v32, 1  ;;  %v2729_v18 = vld [vmem:[#allocation4 + $0x60] sm:$0xf]  ;;  %v2693_v44 = vld [vmem:[#allocation4 + $0x18] sm:$0xf] }
 0x196   :  { %3392 = vtanh.f32 %v760_v54  ;;  %v752_v56 = vsel %vm751_vm15, %v3391_v39, %v748_v33  ;;  %v3267_v39 = vld [vmem:[#allocation4 + $0x80] sm:$0xf0]  ;;  %1226 = vmatpush.bf16.msrb.mxu1 %v2750_v50  ;;  %v2730_v54 = vor.u32 %v3264_v38, %v2729_v18  ;;  %v2731_v33 = vld [vmem:[#allocation4 + $0x6c] sm:$0xf0]  ;;  %v3254_v50 = vld [vmem:[#allocation4 + $0x1c] sm:$0xf] }
 0x197   :  { %v757_v41 = vsel %vm754_vm0, %v756_v57, %v752_v56  ;;  %v2742_v36 = vor.u32 %v3267_v39, %v2741_v35  ;;  %v2737_v56 = vld [vmem:[#allocation4 + $0x68] sm:$0xf]  ;;  %v3265_v57 = vld [vmem:[#allocation4 + $0x70] sm:$0xf0]  ;;  %v2701_v38 = vld [vmem:[#allocation4 + $0x20] sm:$0xf] }
 0x198   :  { %v762_v58 = vsub.f32 1.0, %v757_v41  ;;  %v764_v3 = vmul.f32 %v757_v41, %v3664_v0  ;;  %v2770_v0 = vor.u32 %v3272_v15, %v2767_v17  ;;  %v2734_v41 = vor.u32 %v3263_v53, %v2731_v33  ;;  %v3261_v15 = vld [vmem:[#allocation4 + $0x50] sm:$0xf0]  ;;  %v3256_v53 = vld [vmem:[#allocation4 + $0x28] sm:$0xf0] }
 0x199   :  { %1200 = vmatpush.bf16.msrb.mxu3 %v2742_v36  ;;  %v2718_v17 = vor.u32 %v3261_v15, %v2717_v13  ;;  %v3259_v36 = vld [vmem:[#allocation4 + $0x40] sm:$0xf0]  ;;  %v2702_v33 = vor.u32 %v3256_v53, %v2701_v38 }
 0x19a   :  { %1211 = vmatpush.bf16.msrb.mxu0 %v2770_v0  ;;  %v3262_v0 = vld [vmem:[#allocation4 + $0x58] sm:$0xf0]  ;;  %v2714_v47 = vor.u32 %v3259_v36, %v2713_v40 }
 0x19b   :  { %v2726_v25 = vor.u32 %v3262_v0, %v2725_v20 }
 0x19c   :  { %v3393_v34 = vpop.eup %3392 }
 0x19d   :  { %v763_v61 = vmul.f32 %v3393_v34, %v762_v58  ;;  %v2738_v58 = vor.u32 %v3265_v57, %v2737_v56  ;;  %1201 = vmatpush.bf16.msrb.mxu3 %v2730_v54  ;;  %v2681_v54 = vld [vmem:[#allocation4] sm:$0xf]  ;;  %v3252_v56 = vld [vmem:[#allocation4 + $0x8] sm:$0xf0]  ;;  %v3251_v57 = vld [vmem:[#allocation4 + $0x4] sm:$0xf] }
 0x19e   :  { %1212 = vmatpush.bf16.msrb.mxu0 %v2758_v30  ;;  %v2707_v30 = vld [vmem:[#allocation4 + $0x3c] sm:$0xf0] }
 0x19f   :  { %v3713_v62 = vadd.f32 %v764_v3, %v763_v61  ;;  %v181_v3 = vadd.f32 %v3675_v4, %v3642_v43  ;;  %1227 = vmatpush.bf16.msrb.mxu1 %v2738_v58  ;;  %v2705_v4 = vld [vmem:[#allocation4 + $0x30] sm:$0xf]  ;;  %v2710_v39 = vor.u32 %v3257_v29, %v2707_v30  ;;  %v2689_v58 = vld [vmem:[#allocation4 + $0x8] sm:$0xf] }
 0x1a0   :  { %v2706_v35 = vor.u32 %v3258_v28, %v2705_v4 }
 0x1a1   :  { %v766_v63 = vpack.c.bf16 %v3713_v62, %v3713_v62  ;;  %1202 = vmatpush.bf16.msrb.mxu3 %v2718_v17 }
 0x1a2   :  { %1213 = vmatpush.bf16.msrb.mxu0 %v2746_v48  ;;  %v3255_v48 = vld [vmem:[#allocation4 + $0x20] sm:$0xf0] }
 0x1a3   :  { %767 = vst [vmem:[%s3852_s6 + $0x4] sm:$0xf] %v766_v63  ;;  %947 = vmatmul.bf16.vlgmr.msra.gmra.mxu0 %v766_v63  ;;  %960 = vmatmul.bf16.vlgmr.msra.gmra.mxu1 %v766_v63 }
 0x1a4   :  { %973 = vmatmul.bf16.vlgmr.msra.gmra.mxu2 %v766_v63  ;;  %1228 = vmatpush.bf16.msrb.mxu1 %v2726_v25 }
 0x1a5   :  { %1203 = vmatpush.bf16.msrb.mxu3 %v2706_v35 }
 0x1a6   :  { %1214 = vmatpush.bf16.msrb.mxu0 %v2734_v41  ;;  %v2683_v41 = vld [vmem:[#allocation4 + $0xc] sm:$0xf0] }
 0x1a8   :  { %1229 = vmatpush.bf16.msrb.mxu1 %v2714_v47 }
 0x1aa   :  { %1215 = vmatpush.bf16.msrb.mxu0 %v2722_v23 }
 0x1ac   :  { %1230 = vmatpush.bf16.msrb.mxu1 %v2702_v33  ;;  %v3297_v33 = vld [vmem:[#allocation4 + $0xb0] sm:$0xf0] }
 0x1ae   :  { %1216 = vmatpush.bf16.msrb.mxu0 %v2710_v39 }
 0x220   :  { %v948_v34 = vpop.f32.mrf.mxu0  ;;  %v961_v61 = vpop.f32.mrf.mxu1 }
 0x221   :  { %v949_v63 = vadd.f32 %v948_v34, %v805_v51  ;;  %v962_v1 = vadd.f32 %v961_v61, %v806_v52  ;;  %v2695_v51 = vld [vmem:[#allocation4 + $0x24] sm:$0xf0]  ;;  %v2694_v52 = vor.u32 %v3255_v48, %v2693_v44  ;;  %v3253_v34 = vld [vmem:[#allocation4 + $0x10] sm:$0xf0]  ;;  %v210_v44 = vadd.f32 %v3677_v5, %v3660_v60 }
 0x222   :  { %v2698_v18 = vor.u32 %v3254_v50, %v2695_v51  ;;  %v2690_v15 = vor.u32 %v3253_v34, %v2689_v58  ;;  %v2871_v58 = vld [vmem:[#allocation4 + $0xb0] sm:$0xf]  ;;  %v3298_v34 = vld [vmem:[#allocation4 + $0xb8] sm:$0xf0] }
 0x223   :  { %v978_v21 = vadd.f32 %v949_v63, %v3615_v45  ;;  %v998_v22 = vadd.f32 %v962_v1, %v181_v3  ;;  %1204 = vmatpush.bf16.msrb.mxu3 %v2694_v52  ;;  %v2682_v3 = vor.u32 %v3252_v56, %v2681_v54  ;;  %v2686_v63 = vor.u32 %v3251_v57, %v2683_v41  ;;  %v2863_v54 = vld [vmem:[#allocation4 + $0xa8] sm:$0xf]  ;;  %v3296_v56 = vld [vmem:[#allocation4 + $0xac] sm:$0xf]  ;;  %v2865_v41 = vld [vmem:[#allocation4 + $0xb4] sm:$0xf0] }
 0x224   :  { %1217 = vmatpush.bf16.msrb.mxu0 %v2698_v18  ;;  %1231 = vmatpush.bf16.msrb.mxu1 %v2690_v15  ;;  %v2864_v57 = vor.u32 %v3297_v33, %v2863_v54  ;;  %v3285_v54 = vld [vmem:[#allocation4 + $0x50] sm:$0xf0]  ;;  %v3284_v33 = vld [vmem:[#allocation4 + $0x4c] sm:$0xf] }
 0x225   :  { %v2677_v27 = vmul.f32 -1.442695, %v978_v21  ;;  %v2678_v14 = vmul.f32 -1.442695, %v998_v22 }
 0x226   :  { %1457 = vmatpush.bf16.msrb.mxu2 %v2864_v57 }
 0x227   :  { %3394 = vpow2.f32 %v2677_v27  ;;  %v974_v31 = vpop.f32.mrf.mxu2  ;;  %1205 = vmatpush.bf16.msrb.mxu3 %v2682_v3  ;;  %v807_v27 = vperm.slane %v3723_v32, 2  ;;  %v3744_v3 = vld [vmem:[%s3850_s4] sm:$0x7] }
 0x228   :  { %3396 = vpow2.f32 %v2678_v14  ;;  %v950_v45 = vpop.f32.mrf.mxu0  ;;  %v963_v46 = vpop.f32.mrf.mxu1  ;;  %1218 = vmatpush.bf16.msrb.mxu0 %v2686_v63  ;;  %v2851_v63 = vld [vmem:[#allocation4 + $0x90] sm:$0xf] }
 0x229   :  { %v975_v35 = vadd.f32 %v974_v31, %v807_v27 }
 0x22d   :  { %v3395_v61 = vpop.eup %3394 }
 0x22e   :  { %v3397_v1 = vpop.eup %3396  ;;  %v982_v13 = vadd.f32 1.0, %v3395_v61  ;;  %v2872_v61 = vor.u32 %v3298_v34, %v2871_v58  ;;  %v2823_v58 = vld [vmem:[#allocation4 + $0x50] sm:$0xf]  ;;  %v3286_v34 = vld [vmem:[#allocation4 + $0x58] sm:$0xf0] }
 0x22f   :  { %v1002_v16 = vadd.f32 1.0, %v3397_v1  ;;  %v976_v17 = vpop.f32.mrf.mxu2  ;;  %v3294_v1 = vld [vmem:[#allocation4 + $0x98] sm:$0xf0] }
 0x230   :  { %3398 = vrcp.f32 %v982_v13  ;;  %v994_v25 = vand.u32 2147483648, %v982_v13  ;;  %v992_v4 = vand.u32 2147483647, %v982_v13  ;;  %vm988_vm2 = vweird.f32 %v982_v13  ;;  %1483 = vmatpush.bf16.msra.mxu0 %v2872_v61  ;;  %v2859_v17 = vld [vmem:[#allocation4 + $0x98] sm:$0xf] }
 0x231   :  { %3400 = vrcp.f32 %v1002_v16  ;;  %v1014_v46 = vand.u32 2147483648, %v1002_v16  ;;  %vm1008_vm6 = vweird.f32 %v1002_v16  ;;  %v1012_v32 = vand.u32 2147483647, %v1002_v16 }
 0x232   :  { %v995_v30 = vor.u32 1.1754944e-38, %v994_v25  ;;  %vm993_vm4 = vcmp.eq.f32.partialorder %v992_v4, 8.507059e+37  ;;  %v2852_v15 = vor.u32 %v3294_v1, %v2851_v63  ;;  %v3290_v25 = vld [vmem:[#allocation4 + $0x7c] sm:$0xf]  ;;  %v2841_v4 = vld [vmem:[#allocation4 + $0x84] sm:$0xf0]  ;;  %v2824_v63 = vor.u32 %v3286_v34, %v2823_v58 }
 0x233   :  { %v1015_v50 = vor.u32 1.1754944e-38, %v1014_v46  ;;  %vm1013_vm8 = vcmp.eq.f32.partialorder %v1012_v32, 8.507059e+37  ;;  %v2827_v46 = vld [vmem:[#allocation4 + $0x60] sm:$0xf]  ;;  %v3288_v32 = vld [vmem:[#allocation4 + $0x68] sm:$0xf0] }
 0x234   :  { %1458 = vmatpush.bf16.msrb.mxu2 %v2852_v15  ;;  %v2803_v1 = vld [vmem:[#allocation4 + $0x30] sm:$0xf]  ;;  %v3281_v15 = vld [vmem:[#allocation4 + $0x34] sm:$0xf]  ;;  %v1066_v34 = vperm.slane %v3744_v3, 2 }
 0x236   :  { %v3399_v19 = vpop.eup %3398 }
 0x237   :  { %v3401_v20 = vpop.eup %3400  ;;  %v984_v0 = vmul.f32 %v3399_v19, %v982_v13  ;;  %vm989_vm1 = vweird.f32 %v3399_v19  ;;  %v3293_v13 = vld [vmem:[#allocation4 + $0x94] sm:$0xf] }
 0x238   :  { %v1004_v21 = vmul.f32 %v3401_v20, %v1002_v16  ;;  %vm990_vm3 = vmor %vm988_vm2, %vm989_vm1  ;;  %vm1009_vm5 = vweird.f32 %v3401_v20  ;;  %v2853_v16 = vld [vmem:[#allocation4 + $0x9c] sm:$0xf0] }
 0x239   :  { %v985_v22 = vsub.f32 1.0, %v984_v0  ;;  %vm1010_vm7 = vmor %vm1008_vm6, %vm1009_vm5  ;;  %v2856_v0 = vor.u32 %v3293_v13, %v2853_v16  ;;  %v3282_v13 = vld [vmem:[#allocation4 + $0x38] sm:$0xf0] }
 0x23a   :  { %v1005_v23 = vsub.f32 1.0, %v1004_v21 }
 0x23b   :  { %v986_v14 = vmul.f32 %v3399_v19, %v985_v22  ;;  %v2839_v22 = vld [vmem:[#allocation4 + $0x78] sm:$0xf] }
 0x23c   :  { %v1006_v28 = vmul.f32 %v3401_v20, %v1005_v23  ;;  %v3291_v23 = vld [vmem:[#allocation4 + $0x80] sm:$0xf0] }
 0x23d   :  { %v987_v29 = vadd.f32 %v3399_v19, %v986_v14  ;;  %v2840_v14 = vor.u32 %v3291_v23, %v2839_v22  ;;  %v2791_v22 = vld [vmem:[#allocation4 + $0x18] sm:$0xf] }
 0x23e   :  { %v1007_v36 = vadd.f32 %v3401_v20, %v1006_v28  ;;  %v2847_v28 = vld [vmem:[#allocation4 + $0x80] sm:$0xf] }
 0x23f   :  { %v991_v39 = vsel %vm990_vm3, %v3399_v19, %v987_v29  ;;  %v3295_v19 = vld [vmem:[#allocation4 + $0xa0] sm:$0xf0]  ;;  %v3292_v29 = vld [vmem:[#allocation4 + $0x88] sm:$0xf0]  ;;  %1459 = vmatpush.bf16.msrb.mxu2 %v2840_v14 }
 0x240   :  { %v996_v40 = vsel %vm993_vm4, %v995_v30, %v991_v39  ;;  %v1011_v48 = vsel %vm1010_vm7, %v3401_v20, %v1007_v36  ;;  %v1065_v20 = vperm.slane %v3744_v3, 1  ;;  %v2860_v21 = vor.u32 %v3295_v19, %v2859_v17  ;;  %v2805_v19 = vld [vmem:[#allocation4 + $0x3c] sm:$0xf0]  ;;  %v3279_v14 = vld [vmem:[#allocation4 + $0x20] sm:$0xf0] }
 0x241   :  { %v1018_v45 = vmul.f32 %v996_v40, %v975_v35  ;;  %v1016_v51 = vsel %vm1013_vm8, %v1015_v50, %v1011_v48  ;;  %v183_v30 = vadd.f32 %v3679_v55, %v3642_v43  ;;  %v2844_v40 = vor.u32 %v3290_v25, %v2841_v4  ;;  %v2829_v50 = vld [vmem:[#allocation4 + $0x6c] sm:$0xf0]  ;;  %v3278_v4 = vld [vmem:[#allocation4 + $0x1c] sm:$0xf] }
 0x242   :  { %v1021_v31 = vsub.f32 1.0, %v1016_v51  ;;  %v1023_v38 = vmul.f32 %v1016_v51, %v3713_v62  ;;  %v2868_v62 = vor.u32 %v3296_v56, %v2865_v41  ;;  %1484 = vmatpush.bf16.msra.mxu0 %v2860_v21  ;;  %v2848_v36 = vor.u32 %v3292_v29, %v2847_v28  ;;  %v2835_v51 = vld [vmem:[#allocation4 + $0x68] sm:$0xf]  ;;  %v2817_v41 = vld [vmem:[#allocation4 + $0x54] sm:$0xf0] }
 0x243   :  { %v1019_v47 = vadd.f32 %v1018_v45, %v210_v44  ;;  %v1064_v44 = vperm.slane %v3744_v3, 0  ;;  %v2828_v48 = vor.u32 %v3288_v32, %v2827_v46  ;;  %v2820_v61 = vor.u32 %v3284_v33, %v2817_v41  ;;  %v2793_v28 = vld [vmem:[#allocation4 + $0x24] sm:$0xf0]  ;;  %v2799_v29 = vld [vmem:[#allocation4 + $0x20] sm:$0xf] }
 0x244   :  { %1470 = vmatpush.bf16.msra.mxu3 %v2868_v62  ;;  %v2804_v21 = vor.u32 %v3282_v13, %v2803_v1  ;;  %v2808_v25 = vor.u32 %v3281_v15, %v2805_v19  ;;  %v2779_v46 = vld [vmem:[#allocation4] sm:$0xf]  ;;  %v3276_v32 = vld [vmem:[#allocation4 + $0x8] sm:$0xf0] }
 0x245   :  { %3402 = vtanh.f32 %v1019_v47  ;;  %v3287_v47 = vld [vmem:[#allocation4 + $0x64] sm:$0xf]  ;;  %1460 = vmatpush.bf16.msrb.mxu2 %v2828_v48  ;;  %v2781_v48 = vld [vmem:[#allocation4 + $0xc] sm:$0xf0] }
 0x246   :  { %1485 = vmatpush.bf16.msra.mxu0 %v2848_v36  ;;  %v2832_v55 = vor.u32 %v3287_v47, %v2829_v50  ;;  %v2792_v36 = vor.u32 %v3279_v14, %v2791_v22  ;;  %v3275_v47 = vld [vmem:[#allocation4 + $0x4] sm:$0xf]  ;;  %v2787_v50 = vld [vmem:[#allocation4 + $0x8] sm:$0xf] }
 0x248   :  { %1471 = vmatpush.bf16.msra.mxu3 %v2856_v0  ;;  %v3283_v0 = vld [vmem:[#allocation4 + $0x40] sm:$0xf0] }
 0x24b   :  { %v3403_v52 = vpop.eup %3402 }
 0x24c   :  { %v1022_v18 = vmul.f32 %v3403_v52, %v1021_v31  ;;  %1472 = vmatpush.bf16.msra.mxu3 %v2844_v40  ;;  %v3289_v31 = vld [vmem:[#allocation4 + $0x70] sm:$0xf0] }
 0x24e   :  { %v3734_v53 = vadd.f32 %v1023_v38, %v1022_v18  ;;  %v2836_v18 = vor.u32 %v3289_v31, %v2835_v51  ;;  %v3277_v51 = vld [vmem:[#allocation4 + $0x10] sm:$0xf0]  ;;  %v2780_v31 = vor.u32 %v3276_v32, %v2779_v46  ;;  %v2949_v32 = vld [vmem:[#allocation4 + $0x90] sm:$0xf] }
 0x250   :  { %v1025_v5 = vpack.c.bf16 %v3734_v53, %v3734_v53  ;;  %1473 = vmatpush.bf16.msra.mxu3 %v2832_v55  ;;  %1486 = vmatpush.bf16.msra.mxu0 %v2836_v18  ;;  %v2784_v55 = vor.u32 %v3275_v47, %v2781_v48  ;;  %v2788_v18 = vor.u32 %v3277_v51, %v2787_v50  ;;  %v3318_v47 = vld [vmem:[#allocation4 + $0x98] sm:$0xf0]  ;;  %v3317_v48 = vld [vmem:[#allocation4 + $0x94] sm:$0xf]  ;;  %v2951_v51 = vld [vmem:[#allocation4 + $0x9c] sm:$0xf0] }
 0x251   :  { %v2950_v50 = vor.u32 %v3318_v47, %v2949_v32  ;;  %v2903_v47 = vld [vmem:[#allocation4 + $0x3c] sm:$0xf0] }
 0x252   :  { %1026 = vst [vmem:[%s3852_s6 + $0x8] sm:$0xf] %v1025_v5  ;;  %1206 = vmatmul.bf16.vlgmr.msrb.gmra.mxu3 %v1025_v5  ;;  %1219 = vmatmul.bf16.vlgmr.msrb.gmra.mxu0 %v1025_v5 }
 0x253   :  { %1232 = vmatmul.bf16.vlgmr.msrb.gmra.mxu1 %v1025_v5  ;;  %v2815_v5 = vld [vmem:[#allocation4 + $0x48] sm:$0xf] }
 0x254   :  { %v2816_v57 = vor.u32 %v3285_v54, %v2815_v5  ;;  %1474 = vmatpush.bf16.msra.mxu3 %v2820_v61  ;;  %1487 = vmatpush.bf16.msra.mxu0 %v2824_v63 }
 0x256   :  { %1461 = vmatpush.bf16.msrb.mxu2 %v2816_v57 }
 0x258   :  { %1475 = vmatpush.bf16.msra.mxu3 %v2808_v25 }
 0x25a   :  { %1462 = vmatpush.bf16.msrb.mxu2 %v2804_v21 }
 0x25e   :  { %1463 = vmatpush.bf16.msrb.mxu2 %v2792_v36  ;;  %v2963_v36 = vld [vmem:[#allocation4 + $0xb4] sm:$0xf0] }
 0x262   :  { %1464 = vmatpush.bf16.msrb.mxu2 %v2780_v31  ;;  %v2957_v31 = vld [vmem:[#allocation4 + $0x98] sm:$0xf] }
 0x2cf   :  { %v1220_v27 = vpop.f32.mrf.mxu0 }
 0x2d0   :  { %v1221_v35 = vadd.f32 %v1220_v27, %v1065_v20  ;;  %v3749_v39 = vpop.f32.mrf.mxu1  ;;  %v2811_v20 = vld [vmem:[#allocation4 + $0x38] sm:$0xf] }
 0x2d1   :  { %v2812_v27 = vor.u32 %v3283_v0, %v2811_v20  ;;  %v1234_v15 = vadd.f32 %v3749_v39, %v1066_v34  ;;  %v212_v20 = vadd.f32 %v3681_v6, %v3660_v60 }
 0x2d2   :  { %v1257_v45 = vadd.f32 %v1221_v35, %v183_v30  ;;  %v3280_v30 = vld [vmem:[#allocation4 + $0x28] sm:$0xf0] }
 0x2d3   :  { %1488 = vmatpush.bf16.msra.mxu0 %v2812_v27 }
 0x2d4   :  { %v2776_v52 = vmul.f32 -1.442695, %v1257_v45  ;;  %v2800_v45 = vor.u32 %v3280_v30, %v2799_v29  ;;  %v2961_v30 = vld [vmem:[#allocation4 + $0xa8] sm:$0xf] }
 0x2d5   :  { %v1207_v38 = vpop.f32.mrf.mxu3 }
 0x2d6   :  { %3404 = vpow2.f32 %v2776_v52  ;;  %v1208_v56 = vadd.f32 %v1207_v38, %v1064_v44  ;;  %v2796_v44 = vor.u32 %v3278_v4, %v2793_v28 }
 0x2d7   :  { %v1222_v62 = vpop.f32.mrf.mxu0  ;;  %1489 = vmatpush.bf16.msra.mxu0 %v2800_v45  ;;  %v3322_v45 = vld [vmem:[#allocation4 + $0xb8] sm:$0xf0] }
 0x2d8   :  { %v1237_v16 = vadd.f32 %v1208_v56, %v3618_v59  ;;  %v1235_v17 = vpop.f32.mrf.mxu1  ;;  %1476 = vmatpush.bf16.msra.mxu3 %v2796_v44  ;;  %v2969_v44 = vld [vmem:[#allocation4 + $0xb0] sm:$0xf] }
 0x2d9   :  { %v2970_v46 = vor.u32 %v3322_v45, %v2969_v44  ;;  %v2901_v44 = vld [vmem:[#allocation4 + $0x30] sm:$0xf]  ;;  %v3306_v45 = vld [vmem:[#allocation4 + $0x38] sm:$0xf0] }
 0x2da   :  { %v2775_v23 = vmul.f32 -1.442695, %v1237_v16 }
 0x2db   :  { %1490 = vmatpush.bf16.msra.mxu0 %v2788_v18 }
 0x2dc   :  { %v3405_v35 = vpop.eup %3404  ;;  %3406 = vpow2.f32 %v2775_v23  ;;  %1477 = vmatpush.bf16.msra.mxu3 %v2784_v55  ;;  %v2954_v55 = vor.u32 %v3317_v48, %v2951_v51  ;;  %v2909_v48 = vld [vmem:[#allocation4 + $0x38] sm:$0xf]  ;;  %v2902_v51 = vor.u32 %v3306_v45, %v2901_v44 }
 0x2dd   :  { %v1261_v59 = vadd.f32 1.0, %v3405_v35  ;;  %v1209_v40 = vpop.f32.mrf.mxu3  ;;  %v3321_v35 = vld [vmem:[#allocation4 + $0xb0] sm:$0xf0] }
 0x2de   :  { %v2962_v40 = vor.u32 %v3321_v35, %v2961_v30  ;;  %v2915_v30 = vld [vmem:[#allocation4 + $0x54] sm:$0xf0]  ;;  %v2921_v35 = vld [vmem:[#allocation4 + $0x50] sm:$0xf] }
 0x2df   :  { %3408 = vrcp.f32 %v1261_v59  ;;  %v1273_v0 = vand.u32 2147483648, %v1261_v59  ;;  %vm1267_vm14 = vweird.f32 %v1261_v59  ;;  %v1271_v21 = vand.u32 2147483647, %v1261_v59 }
 0x2e0   :  { %1716 = vmatpush.bf16.msra.mxu1 %v2962_v40  ;;  %1742 = vmatpush.bf16.msrb.mxu3 %v2970_v46 }
 0x2e1   :  { %v1274_v25 = vor.u32 1.1754944e-38, %v1273_v0  ;;  %vm1272_vm0 = vcmp.eq.f32.partialorder %v1271_v21, 8.507059e+37  ;;  %v3313_v0 = vld [vmem:[#allocation4 + $0x70] sm:$0xf0] }
 0x2e2   :  { %v3407_v52 = vpop.eup %3406 }
 0x2e3   :  { %v1241_v38 = vadd.f32 1.0, %v3407_v52  ;;  %v3319_v52 = vld [vmem:[#allocation4 + $0xa0] sm:$0xf0] }
 0x2e4   :  { %v2958_v18 = vor.u32 %v3319_v52, %v2957_v31  ;;  %1717 = vmatpush.bf16.msra.mxu1 %v2950_v50  ;;  %v3307_v50 = vld [vmem:[#allocation4 + $0x40] sm:$0xf0]  ;;  %v2889_v31 = vld [vmem:[#allocation4 + $0x18] sm:$0xf] }
 0x2e5   :  { %3410 = vrcp.f32 %v1241_v38  ;;  %v3409_v5 = vpop.eup %3408  ;;  %v1253_v58 = vand.u32 2147483648, %v1241_v38  ;;  %v1251_v61 = vand.u32 2147483647, %v1241_v38  ;;  %vm1247_vm10 = vweird.f32 %v1241_v38  ;;  %v3303_v52 = vld [vmem:[#allocation4 + $0x20] sm:$0xf0] }
 0x2e6   :  { %v1263_v54 = vmul.f32 %v3409_v5, %v1261_v59  ;;  %vm1268_vm13 = vweird.f32 %v3409_v5  ;;  %v3320_v59 = vld [vmem:[#allocation4 + $0xac] sm:$0xf]  ;;  %1743 = vmatpush.bf16.msrb.mxu3 %v2958_v18 }
 0x2e7   :  { %v1254_v13 = vor.u32 1.1754944e-38, %v1253_v58  ;;  %vm1252_vm12 = vcmp.eq.f32.partialorder %v1251_v61, 8.507059e+37  ;;  %vm1269_vm15 = vmor %vm1267_vm14, %vm1268_vm13  ;;  %v3768_v58 = vld [vmem:[%s3850_s4] sm:$0x7] }
 0x2e8   :  { %v1264_v57 = vsub.f32 1.0, %v1263_v54  ;;  %v3314_v54 = vld [vmem:[#allocation4 + $0x7c] sm:$0xf] }
 0x2ea   :  { %v1265_v63 = vmul.f32 %v3409_v5, %v1264_v57  ;;  %v2945_v57 = vld [vmem:[#allocation4 + $0x80] sm:$0xf] }
 0x2eb   :  { %v3411_v33 = vpop.eup %3410 }
 0x2ec   :  { %v1243_v56 = vmul.f32 %v3411_v33, %v1241_v38  ;;  %vm1248_vm9 = vweird.f32 %v3411_v33  ;;  %v1266_v19 = vadd.f32 %v3409_v5, %v1265_v63  ;;  %v2937_v38 = vld [vmem:[#allocation4 + $0x78] sm:$0xf]  ;;  %v1323_v63 = vperm.slane %v3768_v58, 0 }
 0x2ed   :  { %vm1249_vm11 = vmor %vm1247_vm10, %vm1248_vm9 }
 0x2ee   :  { %v1244_v41 = vsub.f32 1.0, %v1243_v56  ;;  %v1270_v23 = vsel %vm1269_vm15, %v3409_v5, %v1266_v19  ;;  %v3315_v5 = vld [vmem:[#allocation4 + $0x80] sm:$0xf0]  ;;  %v2939_v56 = vld [vmem:[#allocation4 + $0x84] sm:$0xf0] }
 0x2ef   :  { %v1275_v27 = vsel %vm1272_vm0, %v1274_v25, %v1270_v23  ;;  %v2927_v19 = vld [vmem:[#allocation4 + $0x6c] sm:$0xf0] }
 0x2f0   :  { %v1245_v62 = vmul.f32 %v3411_v33, %v1244_v41  ;;  %v1280_v39 = vsub.f32 1.0, %v1275_v27  ;;  %v1282_v28 = vmul.f32 %v1275_v27, %v3734_v53  ;;  %v2966_v53 = vor.u32 %v3320_v59, %v2963_v36  ;;  %v3316_v41 = vld [vmem:[#allocation4 + $0x88] sm:$0xf0]  ;;  %v2913_v27 = vld [vmem:[#allocation4 + $0x48] sm:$0xf] }
 0x2f1   :  { %v2946_v61 = vor.u32 %v3316_v41, %v2945_v57  ;;  %v3310_v59 = vld [vmem:[#allocation4 + $0x58] sm:$0xf0]  ;;  %v3304_v57 = vld [vmem:[#allocation4 + $0x28] sm:$0xf0] }
 0x2f2   :  { %v1246_v1 = vadd.f32 %v3411_v33, %v1245_v62  ;;  %1729 = vmatpush.bf16.msra.mxu2 %v2966_v53  ;;  %v2942_v62 = vor.u32 %v3314_v54, %v2939_v56  ;;  %v2922_v36 = vor.u32 %v3310_v59, %v2921_v35  ;;  %v3305_v53 = vld [vmem:[#allocation4 + $0x34] sm:$0xf]  ;;  %v3302_v54 = vld [vmem:[#allocation4 + $0x1c] sm:$0xf]  ;;  %v2897_v56 = vld [vmem:[#allocation4 + $0x20] sm:$0xf] }
 0x2f3   :  { %1744 = vmatpush.bf16.msrb.mxu3 %v2946_v61  ;;  %v1325_v35 = vperm.slane %v3768_v58, 2 }
 0x2f4   :  { %v1250_v16 = vsel %vm1249_vm11, %v3411_v33, %v1246_v1  ;;  %v2938_v33 = vor.u32 %v3315_v5, %v2937_v38  ;;  %v1324_v1 = vperm.slane %v3768_v58, 1  ;;  %v2906_v38 = vor.u32 %v3305_v53, %v2903_v47 }
 0x2f5   :  { %v1255_v17 = vsel %vm1252_vm12, %v1254_v13, %v1250_v16  ;;  %v2925_v13 = vld [vmem:[#allocation4 + $0x60] sm:$0xf]  ;;  %v3311_v16 = vld [vmem:[#allocation4 + $0x64] sm:$0xf]  ;;  %v2910_v5 = vor.u32 %v3307_v50, %v2909_v48  ;;  %v215_v47 = vadd.f32 %v3685_v8, %v3660_v60 }
 0x2f6   :  { %v1277_v3 = vmul.f32 %v1255_v17, %v1234_v15  ;;  %1730 = vmatpush.bf16.msra.mxu2 %v2954_v55  ;;  %1718 = vmatpush.bf16.msra.mxu1 %v2938_v33  ;;  %v3312_v15 = vld [vmem:[#allocation4 + $0x68] sm:$0xf0]  ;;  %v2891_v33 = vld [vmem:[#allocation4 + $0x24] sm:$0xf0] }
 0x2f7   :  { %v2926_v17 = vor.u32 %v3312_v15, %v2925_v13  ;;  %v2894_v61 = vor.u32 %v3302_v54, %v2891_v33  ;;  %v3300_v13 = vld [vmem:[#allocation4 + $0x8] sm:$0xf0]  ;;  %v3299_v15 = vld [vmem:[#allocation4 + $0x4] sm:$0xf]  ;;  %v3059_v33 = vld [vmem:[#allocation4 + $0xa8] sm:$0xf] }
 0x2f8   :  { %v1278_v22 = vadd.f32 %v1277_v3, %v212_v20  ;;  %v2933_v20 = vld [vmem:[#allocation4 + $0x68] sm:$0xf]  ;;  %v2930_v3 = vor.u32 %v3311_v16, %v2927_v19  ;;  %v2879_v16 = vld [vmem:[#allocation4 + $0xc] sm:$0xf0]  ;;  %v3301_v19 = vld [vmem:[#allocation4 + $0x10] sm:$0xf0] }
 0x2f9   :  { %v2934_v21 = vor.u32 %v3313_v0, %v2933_v20 }
 0x2fa   :  { %3412 = vtanh.f32 %v1278_v22  ;;  %1731 = vmatpush.bf16.msra.mxu2 %v2942_v62  ;;  %v186_v22 = vadd.f32 %v3683_v7, %v3642_v43  ;;  %1719 = vmatpush.bf16.msra.mxu1 %v2926_v17  ;;  %v2890_v62 = vor.u32 %v3303_v52, %v2889_v31  ;;  %v2885_v17 = vld [vmem:[#allocation4 + $0x8] sm:$0xf] }
 0x2fb   :  { %1745 = vmatpush.bf16.msrb.mxu3 %v2934_v21  ;;  %v2886_v21 = vor.u32 %v3301_v19, %v2885_v17  ;;  %v3049_v17 = vld [vmem:[#allocation4 + $0x9c] sm:$0xf0]  ;;  %v3055_v19 = vld [vmem:[#allocation4 + $0x98] sm:$0xf] }
 0x2fe   :  { %1732 = vmatpush.bf16.msra.mxu2 %v2930_v3  ;;  %v2882_v3 = vor.u32 %v3299_v15, %v2879_v16  ;;  %v3341_v15 = vld [vmem:[#allocation4 + $0x94] sm:$0xf] }
 0x2ff   :  { %1746 = vmatpush.bf16.msrb.mxu3 %v2922_v36 }
 0x300   :  { %v3413_v14 = vpop.eup %3412 }
 0x301   :  { %v1281_v4 = vmul.f32 %v3413_v14, %v1280_v39  ;;  %v3309_v39 = vld [vmem:[#allocation4 + $0x50] sm:$0xf0]  ;;  %v3308_v14 = vld [vmem:[#allocation4 + $0x4c] sm:$0xf] }
 0x302   :  { %v2918_v40 = vor.u32 %v3308_v14, %v2915_v30 }
 0x303   :  { %v3758_v29 = vadd.f32 %v1282_v28, %v1281_v4  ;;  %1747 = vmatpush.bf16.msrb.mxu3 %v2910_v5 }
 0x304   :  { %1733 = vmatpush.bf16.msra.mxu2 %v2918_v40 }
 0x305   :  { %v1284_v6 = vpack.c.bf16 %v3758_v29, %v3758_v29 }
 0x307   :  { %1285 = vst [vmem:[%s3852_s6 + $0xc] sm:$0xf] %v1284_v6  ;;  %1465 = vmatmul.bf16.vlgmr.msrb.gmra.mxu2 %v1284_v6  ;;  %1478 = vmatmul.bf16.vlgmr.msra.gmra.mxu3 %v1284_v6 }
 0x308   :  { %1491 = vmatmul.bf16.vlgmr.msra.gmra.mxu0 %v1284_v6  ;;  %v2914_v6 = vor.u32 %v3309_v39, %v2913_v27  ;;  %1734 = vmatpush.bf16.msra.mxu2 %v2906_v38 }
 0x30a   :  { %1720 = vmatpush.bf16.msra.mxu1 %v2914_v6 }
 0x30c   :  { %1735 = vmatpush.bf16.msra.mxu2 %v2894_v61  ;;  %v3346_v61 = vld [vmem:[#allocation4 + $0xb8] sm:$0xf0] }
 0x30e   :  { %1721 = vmatpush.bf16.msra.mxu1 %v2902_v51 }
 0x310   :  { %1736 = vmatpush.bf16.msra.mxu2 %v2882_v3 }
 0x312   :  { %1722 = vmatpush.bf16.msra.mxu1 %v2890_v62  ;;  %v3067_v62 = vld [vmem:[#allocation4 + $0xb0] sm:$0xf] }
 0x385   :  { %v3770_v34 = vpop.f32.mrf.mxu0 }
 0x386   :  { %v1493_v53 = vadd.f32 %v3770_v34, %v1325_v35  ;;  %v3023_v35 = vld [vmem:[#allocation4 + $0x60] sm:$0xf] }
 0x38a   :  { %v1466_v23 = vpop.f32.mrf.mxu2  ;;  %v1479_v25 = vpop.f32.mrf.mxu3 }
 0x38b   :  { %v1467_v4 = vadd.f32 %v1466_v23, %v1323_v63  ;;  %v1480_v28 = vadd.f32 %v1479_v25, %v1324_v1  ;;  %v2898_v63 = vor.u32 %v3304_v57, %v2897_v56  ;;  %v2877_v1 = vld [vmem:[#allocation4] sm:$0xf]  ;;  %v3345_v56 = vld [vmem:[#allocation4 + $0xb0] sm:$0xf0]  ;;  %v3344_v57 = vld [vmem:[#allocation4 + $0xac] sm:$0xf] }
 0x38c   :  { %v2878_v20 = vor.u32 %v3300_v13, %v2877_v1  ;;  %v3047_v1 = vld [vmem:[#allocation4 + $0x90] sm:$0xf]  ;;  %v3342_v13 = vld [vmem:[#allocation4 + $0x98] sm:$0xf0] }
 0x38d   :  { %v1496_v7 = vadd.f32 %v1467_v4, %v3628_v2  ;;  %v1516_v46 = vadd.f32 %v1480_v28, %v186_v22  ;;  %v1494_v32 = vpop.f32.mrf.mxu0  ;;  %1748 = vmatpush.bf16.msrb.mxu3 %v2898_v63  ;;  %v3068_v63 = vor.u32 %v3346_v61, %v3067_v62  ;;  %v3048_v16 = vor.u32 %v3342_v13, %v3047_v1  ;;  %v3001_v62 = vld [vmem:[#allocation4 + $0x3c] sm:$0xf0]  ;;  %v3007_v61 = vld [vmem:[#allocation4 + $0x38] sm:$0xf]  ;;  %v3331_v13 = vld [vmem:[#allocation4 + $0x40] sm:$0xf0] }
 0x38e   :  { %1723 = vmatpush.bf16.msra.mxu1 %v2878_v20  ;;  %v3343_v20 = vld [vmem:[#allocation4 + $0xa0] sm:$0xf0] }
 0x38f   :  { %v2873_v55 = vmul.f32 -1.442695, %v1496_v7  ;;  %v2874_v18 = vmul.f32 -1.442695, %v1516_v46  ;;  %2001 = vmatpush.bf16.msrb.mxu2 %v3068_v63  ;;  %v3056_v3 = vor.u32 %v3343_v20, %v3055_v19  ;;  %v3008_v19 = vor.u32 %v3331_v13, %v3007_v61 }
 0x391   :  { %3414 = vpow2.f32 %v2873_v55  ;;  %1749 = vmatpush.bf16.msrb.mxu3 %v2886_v21  ;;  %v3792_v21 = vld [vmem:[%s3850_s4] sm:$0x7] }
 0x392   :  { %3416 = vpow2.f32 %v2874_v18  ;;  %v1468_v2 = vpop.f32.mrf.mxu2  ;;  %v1481_v41 = vpop.f32.mrf.mxu3 }
 0x393   :  { %v3060_v2 = vor.u32 %v3345_v56, %v3059_v33  ;;  %v3061_v41 = vld [vmem:[#allocation4 + $0xb4] sm:$0xf0]  ;;  %2002 = vmatpush.bf16.msrb.mxu2 %v3056_v3  ;;  %v2999_v33 = vld [vmem:[#allocation4 + $0x30] sm:$0xf]  ;;  %v3330_v56 = vld [vmem:[#allocation4 + $0x38] sm:$0xf0] }
 0x394   :  { %v2989_v3 = vld [vmem:[#allocation4 + $0x24] sm:$0xf0] }
 0x395   :  { %1975 = vmatpush.bf16.msrb.mxu0 %v3060_v2  ;;  %v3000_v2 = vor.u32 %v3330_v56, %v2999_v33  ;;  %v217_v56 = vadd.f32 %v3689_v10, %v3660_v60 }
 0x397   :  { %v3415_v0 = vpop.eup %3414 }
 0x398   :  { %v3417_v22 = vpop.eup %3416  ;;  %v1500_v23 = vadd.f32 1.0, %v3415_v0  ;;  %v3052_v0 = vor.u32 %v3341_v15, %v3049_v17  ;;  %v2987_v15 = vld [vmem:[#allocation4 + $0x18] sm:$0xf] }
 0x399   :  { %v1520_v25 = vadd.f32 1.0, %v3417_v22  ;;  %1976 = vmatpush.bf16.msrb.mxu0 %v3048_v16  ;;  %v3035_v22 = vld [vmem:[#allocation4 + $0x78] sm:$0xf]  ;;  %v3327_v16 = vld [vmem:[#allocation4 + $0x20] sm:$0xf0] }
 0x39a   :  { %3418 = vrcp.f32 %v1500_v23  ;;  %v1512_v6 = vand.u32 2147483648, %v1500_v23  ;;  %v1510_v40 = vand.u32 2147483647, %v1500_v23  ;;  %vm1506_vm2 = vweird.f32 %v1500_v23 }
 0x39b   :  { %3420 = vrcp.f32 %v1520_v25  ;;  %v1532_v48 = vand.u32 2147483648, %v1520_v25  ;;  %vm1526_vm6 = vweird.f32 %v1520_v25  ;;  %v1530_v50 = vand.u32 2147483647, %v1520_v25 }
 0x39c   :  { %v1513_v45 = vor.u32 1.1754944e-38, %v1512_v6  ;;  %vm1511_vm4 = vcmp.eq.f32.partialorder %v1510_v40, 8.507059e+37  ;;  %v3335_v40 = vld [vmem:[#allocation4 + $0x64] sm:$0xf]  ;;  %v2988_v20 = vor.u32 %v3327_v16, %v2987_v15 }
 0x39d   :  { %v1533_v52 = vor.u32 1.1754944e-38, %v1532_v48  ;;  %vm1531_vm8 = vcmp.eq.f32.partialorder %v1530_v50, 8.507059e+37  ;;  %v3011_v48 = vld [vmem:[#allocation4 + $0x48] sm:$0xf]  ;;  %v3332_v50 = vld [vmem:[#allocation4 + $0x4c] sm:$0xf] }
 0x3a0   :  { %v3419_v27 = vpop.eup %3418 }
 0x3a1   :  { %v3421_v39 = vpop.eup %3420  ;;  %v1502_v14 = vmul.f32 %v3419_v27, %v1500_v23  ;;  %vm1507_vm1 = vweird.f32 %v3419_v27  ;;  %v3339_v23 = vld [vmem:[#allocation4 + $0x80] sm:$0xf0] }
 0x3a2   :  { %v1522_v4 = vmul.f32 %v3421_v39, %v1520_v25  ;;  %vm1508_vm3 = vmor %vm1506_vm2, %vm1507_vm1  ;;  %vm1527_vm5 = vweird.f32 %v3421_v39  ;;  %v3338_v25 = vld [vmem:[#allocation4 + $0x7c] sm:$0xf] }
 0x3a3   :  { %v1503_v28 = vsub.f32 1.0, %v1502_v14  ;;  %vm1528_vm7 = vmor %vm1526_vm6, %vm1527_vm5  ;;  %v3043_v14 = vld [vmem:[#allocation4 + $0x80] sm:$0xf] }
 0x3a4   :  { %v1523_v30 = vsub.f32 1.0, %v1522_v4  ;;  %v3340_v4 = vld [vmem:[#allocation4 + $0x88] sm:$0xf0] }
 0x3a5   :  { %v1504_v59 = vmul.f32 %v3419_v27, %v1503_v28  ;;  %v3044_v6 = vor.u32 %v3340_v4, %v3043_v14  ;;  %v3323_v4 = vld [vmem:[#allocation4 + $0x4] sm:$0xf] }
 0x3a6   :  { %v1524_v36 = vmul.f32 %v3421_v39, %v1523_v30  ;;  %v1582_v30 = vperm.slane %v3792_v21, 0 }
 0x3a7   :  { %v1505_v44 = vadd.f32 %v3419_v27, %v1504_v59  ;;  %2003 = vmatpush.bf16.msrb.mxu2 %v3044_v6  ;;  %v3336_v59 = vld [vmem:[#allocation4 + $0x68] sm:$0xf0] }
 0x3a8   :  { %v1525_v32 = vadd.f32 %v3421_v39, %v1524_v36  ;;  %v3024_v36 = vor.u32 %v3336_v59, %v3023_v35  ;;  %v3325_v35 = vld [vmem:[#allocation4 + $0x10] sm:$0xf0] }
 0x3a9   :  { %v1509_v7 = vsel %vm1508_vm3, %v3419_v27, %v1505_v44  ;;  %v3036_v27 = vor.u32 %v3339_v23, %v3035_v22  ;;  %v3025_v44 = vld [vmem:[#allocation4 + $0x6c] sm:$0xf0]  ;;  %v2995_v22 = vld [vmem:[#allocation4 + $0x20] sm:$0xf] }
 0x3aa   :  { %v1514_v46 = vsel %vm1511_vm4, %v1513_v45, %v1509_v7  ;;  %v1529_v31 = vsel %vm1528_vm7, %v3421_v39, %v1525_v32  ;;  %v3037_v39 = vld [vmem:[#allocation4 + $0x84] sm:$0xf0]  ;;  %v3028_v7 = vor.u32 %v3335_v40, %v3025_v44 }
 0x3ab   :  { %v1536_v58 = vmul.f32 %v1514_v46, %v1493_v53  ;;  %v1534_v55 = vsel %vm1531_vm8, %v1533_v52, %v1529_v31  ;;  %v3040_v28 = vor.u32 %v3338_v25, %v3037_v39  ;;  %1977 = vmatpush.bf16.msrb.mxu0 %v3036_v27  ;;  %v3031_v45 = vld [vmem:[#allocation4 + $0x68] sm:$0xf]  ;;  %v3337_v53 = vld [vmem:[#allocation4 + $0x70] sm:$0xf0]  ;;  %v3013_v31 = vld [vmem:[#allocation4 + $0x54] sm:$0xf0] }
 0x3ac   :  { %v1539_v34 = vsub.f32 1.0, %v1534_v55  ;;  %v1541_v5 = vmul.f32 %v1534_v55, %v3758_v29  ;;  %v3064_v29 = vor.u32 %v3344_v57, %v3061_v41  ;;  %v3032_v46 = vor.u32 %v3337_v53, %v3031_v45  ;;  %v3019_v52 = vld [vmem:[#allocation4 + $0x50] sm:$0xf]  ;;  %v3334_v55 = vld [vmem:[#allocation4 + $0x58] sm:$0xf0] }
 0x3ad   :  { %v1537_v51 = vadd.f32 %v1536_v58, %v215_v47  ;;  %v3333_v58 = vld [vmem:[#allocation4 + $0x50] sm:$0xf0]  ;;  %v3328_v27 = vld [vmem:[#allocation4 + $0x28] sm:$0xf0]  ;;  %v2975_v39 = vld [vmem:[#allocation4] sm:$0xf] }
 0x3ae   :  { %1988 = vmatpush.bf16.msrb.mxu1 %v3064_v29  ;;  %2004 = vmatpush.bf16.msrb.mxu2 %v3032_v46  ;;  %v3329_v41 = vld [vmem:[#allocation4 + $0x34] sm:$0xf]  ;;  %v188_v29 = vadd.f32 %v3687_v9, %v3642_v43  ;;  %v3324_v9 = vld [vmem:[#allocation4 + $0x8] sm:$0xf0]  ;;  %v2996_v14 = vor.u32 %v3328_v27, %v2995_v22  ;;  %v3370_v27 = vld [vmem:[#allocation4 + $0xb8] sm:$0xf0] }
 0x3af   :  { %3422 = vtanh.f32 %v1537_v51  ;;  %1978 = vmatpush.bf16.msrb.mxu0 %v3024_v36  ;;  %v3012_v51 = vor.u32 %v3333_v58, %v3011_v48  ;;  %v3004_v1 = vor.u32 %v3329_v41, %v3001_v62  ;;  %v2976_v59 = vor.u32 %v3324_v9, %v2975_v39  ;;  %v3145_v9 = vld [vmem:[#allocation4 + $0x90] sm:$0xf] }
 0x3b2   :  { %1989 = vmatpush.bf16.msrb.mxu1 %v3052_v0  ;;  %v3326_v0 = vld [vmem:[#allocation4 + $0x1c] sm:$0xf] }
 0x3b3   :  { %1979 = vmatpush.bf16.msrb.mxu0 %v3012_v51  ;;  %v2992_v25 = vor.u32 %v3326_v0, %v2989_v3  ;;  %v1584_v51 = vperm.slane %v3792_v21, 2  ;;  %v3369_v0 = vld [vmem:[#allocation4 + $0xb0] sm:$0xf0]  ;;  %v3368_v3 = vld [vmem:[#allocation4 + $0xac] sm:$0xf] }
 0x3b5   :  { %v3423_v18 = vpop.eup %3422 }
 0x3b6   :  { %v1540_v38 = vmul.f32 %v3423_v18, %v1539_v34  ;;  %1990 = vmatpush.bf16.msrb.mxu1 %v3040_v28  ;;  %v1583_v18 = vperm.slane %v3792_v21, 1  ;;  %v2977_v28 = vld [vmem:[#allocation4 + $0xc] sm:$0xf0] }
 0x3b7   :  { %1980 = vmatpush.bf16.msrb.mxu0 %v3000_v2  ;;  %v2980_v36 = vor.u32 %v3323_v4, %v2977_v28  ;;  %v3365_v4 = vld [vmem:[#allocation4 + $0x94] sm:$0xf] }
 0x3b8   :  { %v3782_v54 = vadd.f32 %v1541_v5, %v1540_v38  ;;  %v3016_v38 = vor.u32 %v3332_v50, %v3013_v31  ;;  %v3020_v5 = vor.u32 %v3334_v55, %v3019_v52 }
 0x3ba   :  { %v1543_v8 = vpack.c.bf16 %v3782_v54, %v3782_v54  ;;  %1991 = vmatpush.bf16.msrb.mxu1 %v3028_v7  ;;  %2005 = vmatpush.bf16.msrb.mxu2 %v3020_v5 }
 0x3bb   :  { %1981 = vmatpush.bf16.msrb.mxu0 %v2988_v20  ;;  %v3157_v20 = vld [vmem:[#allocation4 + $0xa8] sm:$0xf] }
 0x3bc   :  { %1544 = vst [vmem:[%s3852_s6 + $0x10] sm:$0xf] %v1543_v8  ;;  %1724 = vmatmul.bf16.vlgmr.msra.gmra.mxu1 %v1543_v8  ;;  %1737 = vmatmul.bf16.vlgmr.msra.gmra.mxu2 %v1543_v8  ;;  %v3158_v22 = vor.u32 %v3369_v0, %v3157_v20 }
 0x3bd   :  { %1750 = vmatmul.bf16.vlgmr.msrb.gmra.mxu3 %v1543_v8 }
 0x3be   :  { %1992 = vmatpush.bf16.msrb.mxu1 %v3016_v38  ;;  %2006 = vmatpush.bf16.msrb.mxu2 %v3008_v19 }
 0x3bf   :  { %1982 = vmatpush.bf16.msrb.mxu0 %v2976_v59  ;;  %2234 = vmatpush.bf16.msra.mxu3 %v3158_v22  ;;  %v3353_v22 = vld [vmem:[#allocation4 + $0x34] sm:$0xf] }
 0x3c2   :  { %1993 = vmatpush.bf16.msrb.mxu1 %v3004_v1  ;;  %2007 = vmatpush.bf16.msrb.mxu2 %v2996_v14  ;;  %v3366_v14 = vld [vmem:[#allocation4 + $0x98] sm:$0xf0] }
 0x3c3   :  { %v3146_v28 = vor.u32 %v3366_v14, %v3145_v9  ;;  %v3355_v9 = vld [vmem:[#allocation4 + $0x40] sm:$0xf0]  ;;  %v3085_v14 = vld [vmem:[#allocation4 + $0x18] sm:$0xf] }
 0x3c5   :  { %2235 = vmatpush.bf16.msra.mxu3 %v3146_v28 }
 0x3c6   :  { %1994 = vmatpush.bf16.msrb.mxu1 %v2992_v25  ;;  %v3165_v25 = vld [vmem:[#allocation4 + $0xb0] sm:$0xf] }
 0x3c7   :  { %v3166_v39 = vor.u32 %v3370_v27, %v3165_v25 }
 0x3ca   :  { %1995 = vmatpush.bf16.msrb.mxu1 %v2980_v36  ;;  %v3813_v36 = vld [vmem:[%s3850_s4] sm:$0x7] }
 0x3ce   :  { %2260 = vmatpush.bf16.msra.mxu1 %v3166_v39  ;;  %v3105_v39 = vld [vmem:[#allocation4 + $0x38] sm:$0xf] }
 0x3cf   :  { %v3106_v28 = vor.u32 %v3355_v9, %v3105_v39  ;;  %v2098_v9 = vld [vmem:[%s3850_s4] sm:$0x7] }
 0x439   :  { %v1725_v32 = vpop.f32.mrf.mxu1 }
 0x43a   :  { %v1726_v47 = vadd.f32 %v1725_v32, %v1582_v30  ;;  %v2983_v30 = vld [vmem:[#allocation4 + $0x8] sm:$0xf] }
 0x43b   :  { %v2984_v53 = vor.u32 %v3325_v35, %v2983_v30  ;;  %v3153_v30 = vld [vmem:[#allocation4 + $0x98] sm:$0xf]  ;;  %v3367_v35 = vld [vmem:[#allocation4 + $0xa0] sm:$0xf0] }
 0x43c   :  { %v1755_v34 = vadd.f32 %v1726_v47, %v3631_v12 }
 0x43d   :  { %2008 = vmatpush.bf16.msrb.mxu2 %v2984_v53  ;;  %v3362_v53 = vld [vmem:[#allocation4 + $0x7c] sm:$0xf] }
 0x43e   :  { %v2971_v8 = vmul.f32 -1.442695, %v1755_v34 }
 0x43f   :  { %v1738_v57 = vpop.f32.mrf.mxu2 }
 0x440   :  { %3424 = vpow2.f32 %v2971_v8  ;;  %v1739_v12 = vadd.f32 %v1738_v57, %v1583_v18  ;;  %v1751_v63 = vpop.f32.mrf.mxu3 }
 0x441   :  { %v1727_v17 = vpop.f32.mrf.mxu1  ;;  %v1752_v8 = vadd.f32 %v1751_v63, %v1584_v51  ;;  %v1842_v51 = vperm.slane %v3813_v36, 1 }
 0x442   :  { %v1775_v23 = vadd.f32 %v1739_v12, %v188_v29 }
 0x444   :  { %v2972_v6 = vmul.f32 -1.442695, %v1775_v23  ;;  %v3159_v23 = vld [vmem:[#allocation4 + $0xb4] sm:$0xf0] }
 0x446   :  { %v3425_v40 = vpop.eup %3424  ;;  %3426 = vpow2.f32 %v2972_v6  ;;  %v3147_v6 = vld [vmem:[#allocation4 + $0x9c] sm:$0xf0] }
 0x447   :  { %v1759_v44 = vadd.f32 1.0, %v3425_v40  ;;  %v1740_v45 = vpop.f32.mrf.mxu2  ;;  %v3150_v59 = vor.u32 %v3365_v4, %v3147_v6  ;;  %v3154_v40 = vor.u32 %v3367_v35, %v3153_v30  ;;  %v3351_v6 = vld [vmem:[#allocation4 + $0x20] sm:$0xf0]  ;;  %v3350_v30 = vld [vmem:[#allocation4 + $0x1c] sm:$0xf] }
 0x448   :  { %v1753_v7 = vpop.f32.mrf.mxu3  ;;  %v3363_v45 = vld [vmem:[#allocation4 + $0x80] sm:$0xf0]  ;;  %v3087_v35 = vld [vmem:[#allocation4 + $0x24] sm:$0xf0] }
 0x449   :  { %3428 = vrcp.f32 %v1759_v44  ;;  %v1771_v50 = vand.u32 2147483648, %v1759_v44  ;;  %v1769_v52 = vand.u32 2147483647, %v1759_v44  ;;  %vm1765_vm10 = vweird.f32 %v1759_v44  ;;  %2261 = vmatpush.bf16.msra.mxu1 %v3154_v40 }
 0x44a   :  { %v3090_v40 = vor.u32 %v3350_v30, %v3087_v35  ;;  %v2100_v30 = vperm.slane %v2098_v9, 0 }
 0x44b   :  { %v1772_v38 = vor.u32 1.1754944e-38, %v1771_v50  ;;  %vm1770_vm12 = vcmp.eq.f32.partialorder %v1769_v52, 8.507059e+37  ;;  %v1841_v50 = vperm.slane %v3813_v36, 0  ;;  %v3360_v52 = vld [vmem:[#allocation4 + $0x68] sm:$0xf0] }
 0x44c   :  { %v3427_v46 = vpop.eup %3426 }
 0x44d   :  { %v1779_v32 = vadd.f32 1.0, %v3427_v46  ;;  %v3135_v46 = vld [vmem:[#allocation4 + $0x84] sm:$0xf0] }
 0x44f   :  { %v3429_v47 = vpop.eup %3428  ;;  %3430 = vrcp.f32 %v1779_v32  ;;  %v1791_v21 = vand.u32 2147483648, %v1779_v32  ;;  %v1789_v62 = vand.u32 2147483647, %v1779_v32  ;;  %vm1785_vm14 = vweird.f32 %v1779_v32 }
 0x450   :  { %v1761_v48 = vmul.f32 %v3429_v47, %v1759_v44  ;;  %vm1766_vm9 = vweird.f32 %v3429_v47  ;;  %v3133_v44 = vld [vmem:[#allocation4 + $0x78] sm:$0xf] }
 0x451   :  { %vm1767_vm11 = vmor %vm1765_vm10, %vm1766_vm9  ;;  %v1792_v1 = vor.u32 1.1754944e-38, %v1791_v21  ;;  %vm1790_vm0 = vcmp.eq.f32.partialorder %v1789_v62, 8.507059e+37  ;;  %v3134_v7 = vor.u32 %v3363_v45, %v3133_v44  ;;  %v3109_v62 = vld [vmem:[#allocation4 + $0x48] sm:$0xf]  ;;  %v3093_v44 = vld [vmem:[#allocation4 + $0x20] sm:$0xf] }
 0x452   :  { %v1762_v58 = vsub.f32 1.0, %v1761_v48  ;;  %v3138_v48 = vor.u32 %v3362_v53, %v3135_v46  ;;  %v3352_v45 = vld [vmem:[#allocation4 + $0x28] sm:$0xf0]  ;;  %v3073_v53 = vld [vmem:[#allocation4] sm:$0xf] }
 0x453   :  { %2236 = vmatpush.bf16.msra.mxu3 %v3134_v7  ;;  %v3094_v7 = vor.u32 %v3352_v45, %v3093_v44  ;;  %v3348_v46 = vld [vmem:[#allocation4 + $0x8] sm:$0xf0] }
 0x454   :  { %v1763_v31 = vmul.f32 %v3429_v47, %v1762_v58 }
 0x455   :  { %v3431_v55 = vpop.eup %3430 }
 0x456   :  { %v1781_v34 = vmul.f32 %v3431_v55, %v1779_v32  ;;  %v1764_v18 = vadd.f32 %v3429_v47, %v1763_v31  ;;  %vm1786_vm13 = vweird.f32 %v3431_v55  ;;  %v3141_v32 = vld [vmem:[#allocation4 + $0x80] sm:$0xf] }
 0x457   :  { %vm1787_vm15 = vmor %vm1785_vm14, %vm1786_vm13  ;;  %v3121_v31 = vld [vmem:[#allocation4 + $0x60] sm:$0xf] }
 0x458   :  { %v1782_v5 = vsub.f32 1.0, %v1781_v34  ;;  %v1768_v33 = vsel %vm1767_vm11, %v3429_v47, %v1764_v18  ;;  %v3364_v47 = vld [vmem:[#allocation4 + $0x88] sm:$0xf0]  ;;  %v3122_v34 = vor.u32 %v3360_v52, %v3121_v31  ;;  %v3123_v18 = vld [vmem:[#allocation4 + $0x6c] sm:$0xf0] }
 0x459   :  { %v1773_v57 = vsel %vm1770_vm12, %v1772_v38, %v1768_v33  ;;  %v3142_v58 = vor.u32 %v3364_v47, %v3141_v32  ;;  %v3129_v38 = vld [vmem:[#allocation4 + $0x68] sm:$0xf]  ;;  %v3347_v32 = vld [vmem:[#allocation4 + $0x4] sm:$0xf]  ;;  %v3075_v47 = vld [vmem:[#allocation4 + $0xc] sm:$0xf0] }
 0x45a   :  { %v1783_v2 = vmul.f32 %v3431_v55, %v1782_v5  ;;  %v1795_v41 = vmul.f32 %v1773_v57, %v1752_v8  ;;  %v3361_v5 = vld [vmem:[#allocation4 + $0x70] sm:$0xf0]  ;;  %2237 = vmatpush.bf16.msra.mxu3 %v3122_v34  ;;  %v3078_v31 = vor.u32 %v3347_v32, %v3075_v47 }
 0x45b   :  { %2262 = vmatpush.bf16.msra.mxu1 %v3142_v58  ;;  %v3130_v33 = vor.u32 %v3361_v5, %v3129_v38  ;;  %v3349_v58 = vld [vmem:[#allocation4 + $0x10] sm:$0xf0] }
 0x45c   :  { %v1796_v61 = vadd.f32 %v1795_v41, %v217_v56  ;;  %v1784_v29 = vadd.f32 %v3431_v55, %v1783_v2  ;;  %v191_v2 = vadd.f32 %v3691_v11, %v3642_v43  ;;  %v3097_v11 = vld [vmem:[#allocation4 + $0x30] sm:$0xf] }
 0x45e   :  { %3432 = vtanh.f32 %v1796_v61  ;;  %v1788_v12 = vsel %vm1787_vm15, %v3431_v55, %v1784_v29  ;;  %v3359_v55 = vld [vmem:[#allocation4 + $0x64] sm:$0xf]  ;;  %v3357_v61 = vld [vmem:[#allocation4 + $0x50] sm:$0xf0]  ;;  %v3356_v29 = vld [vmem:[#allocation4 + $0x4c] sm:$0xf] }
 0x45f   :  { %v1793_v63 = vsel %vm1790_vm0, %v1792_v1, %v1788_v12  ;;  %v3126_v8 = vor.u32 %v3359_v55, %v3123_v18  ;;  %2263 = vmatpush.bf16.msra.mxu1 %v3130_v33  ;;  %v3110_v12 = vor.u32 %v3357_v61, %v3109_v62  ;;  %v3111_v1 = vld [vmem:[#allocation4 + $0x54] sm:$0xf0] }
 0x460   :  { %v1798_v13 = vsub.f32 1.0, %v1793_v63  ;;  %v1800_v10 = vmul.f32 %v1793_v63, %v3782_v54  ;;  %v3162_v54 = vor.u32 %v3368_v3, %v3159_v23  ;;  %v3117_v63 = vld [vmem:[#allocation4 + $0x50] sm:$0xf]  ;;  %v3354_v3 = vld [vmem:[#allocation4 + $0x38] sm:$0xf0] }
 0x461   :  { %2238 = vmatpush.bf16.msra.mxu3 %v3110_v12  ;;  %v3099_v23 = vld [vmem:[#allocation4 + $0x3c] sm:$0xf0]  ;;  %v3098_v27 = vor.u32 %v3354_v3, %v3097_v11 }
 0x462   :  { %2247 = vmatpush.bf16.msra.mxu0 %v3162_v54  ;;  %v3102_v54 = vor.u32 %v3353_v22, %v3099_v23 }
 0x464   :  { %v3433_v15 = vpop.eup %3432 }
 0x465   :  { %v1799_v16 = vmul.f32 %v3433_v15, %v1798_v13  ;;  %v3358_v13 = vld [vmem:[#allocation4 + $0x58] sm:$0xf0]  ;;  %2239 = vmatpush.bf16.msra.mxu3 %v3098_v27 }
 0x466   :  { %2248 = vmatpush.bf16.msra.mxu0 %v3150_v59  ;;  %v3086_v59 = vor.u32 %v3351_v6, %v3085_v14  ;;  %v2101_v14 = vperm.slane %v2098_v9, 1 }
 0x467   :  { %v3803_v17 = vadd.f32 %v1800_v10, %v1799_v16  ;;  %v3114_v10 = vor.u32 %v3356_v29, %v3111_v1 }
 0x469   :  { %v1802_v19 = vpack.c.bf16 %v3803_v17, %v3803_v17  ;;  %2240 = vmatpush.bf16.msra.mxu3 %v3086_v59 }
 0x46a   :  { %2249 = vmatpush.bf16.msra.mxu0 %v3138_v48  ;;  %v3081_v48 = vld [vmem:[#allocation4 + $0x8] sm:$0xf] }
 0x46b   :  { %1803 = vst [vmem:[%s3852_s6 + $0x14] sm:$0xf] %v1802_v19  ;;  %1983 = vmatmul.bf16.vlgmr.msrb.gmra.mxu0 %v1802_v19  ;;  %1996 = vmatmul.bf16.vlgmr.msrb.gmra.mxu1 %v1802_v19  ;;  %v3082_v34 = vor.u32 %v3349_v58, %v3081_v48 }
 0x46c   :  { %2009 = vmatmul.bf16.vlgmr.msrb.gmra.mxu2 %v1802_v19  ;;  %v3118_v19 = vor.u32 %v3358_v13, %v3117_v63 }
 0x46e   :  { %2250 = vmatpush.bf16.msra.mxu0 %v3126_v8  ;;  %2264 = vmatpush.bf16.msra.mxu1 %v3118_v19 }
 0x472   :  { %2251 = vmatpush.bf16.msra.mxu0 %v3114_v10  ;;  %2265 = vmatpush.bf16.msra.mxu1 %v3106_v28  ;;  %v220_v10 = vadd.f32 %v3693_v24, %v3660_v60 }
 0x476   :  { %2252 = vmatpush.bf16.msra.mxu0 %v3102_v54  ;;  %2266 = vmatpush.bf16.msra.mxu1 %v3094_v7 }
 0x47a   :  { %2253 = vmatpush.bf16.msra.mxu0 %v3090_v40  ;;  %2267 = vmatpush.bf16.msra.mxu1 %v3082_v34  ;;  %v2102_v34 = vperm.slane %v2098_v9, 2 }
 0x47e   :  { %2254 = vmatpush.bf16.msra.mxu0 %v3078_v31 }
 0x4e8   :  { %v1984_v56 = vpop.f32.mrf.mxu0  ;;  %v1997_v57 = vpop.f32.mrf.mxu1 }
 0x4e9   :  { %v1985_v41 = vadd.f32 %v1984_v56, %v1841_v50  ;;  %v1998_v21 = vadd.f32 %v1997_v57, %v1842_v51  ;;  %v3074_v51 = vor.u32 %v3348_v46, %v3073_v53 }
 0x4eb   :  { %v2014_v15 = vadd.f32 %v1985_v41, %v3637_v26  ;;  %v2034_v16 = vadd.f32 %v1998_v21, %v191_v2  ;;  %2241 = vmatpush.bf16.msra.mxu3 %v3074_v51  ;;  %v1843_v21 = vperm.slane %v3813_v36, 2 }
 0x4ed   :  { %v3069_v20 = vmul.f32 -1.442695, %v2014_v15  ;;  %v3070_v0 = vmul.f32 -1.442695, %v2034_v16 }
 0x4ef   :  { %3434 = vpow2.f32 %v3069_v20  ;;  %v2010_v25 = vpop.f32.mrf.mxu2 }
 0x4f0   :  { %3436 = vpow2.f32 %v3070_v0  ;;  %v1986_v26 = vpop.f32.mrf.mxu0  ;;  %v1999_v4 = vpop.f32.mrf.mxu1  ;;  %v2011_v63 = vadd.f32 %v2010_v25, %v1843_v21 }
 0x4f5   :  { %v3435_v50 = vpop.eup %3434 }
 0x4f6   :  { %v3437_v52 = vpop.eup %3436  ;;  %v2018_v55 = vadd.f32 1.0, %v3435_v50 }
 0x4f7   :  { %v2038_v18 = vadd.f32 1.0, %v3437_v52  ;;  %v2012_v38 = vpop.f32.mrf.mxu2 }
 0x4f8   :  { %3438 = vrcp.f32 %v2018_v55  ;;  %v2030_v41 = vand.u32 2147483648, %v2018_v55  ;;  %v2028_v61 = vand.u32 2147483647, %v2018_v55  ;;  %vm2024_vm2 = vweird.f32 %v2018_v55 }
 0x4f9   :  { %3440 = vrcp.f32 %v2038_v18  ;;  %v2050_v20 = vand.u32 2147483648, %v2038_v18  ;;  %vm2044_vm6 = vweird.f32 %v2038_v18  ;;  %v2048_v36 = vand.u32 2147483647, %v2038_v18 }
 0x4fa   :  { %v2031_v1 = vor.u32 1.1754944e-38, %v2030_v41  ;;  %vm2029_vm4 = vcmp.eq.f32.partialorder %v2028_v61, 8.507059e+37  ;;  %v222_v41 = vadd.f32 %v3703_v42, %v3660_v60 }
 0x4fb   :  { %v2051_v3 = vor.u32 1.1754944e-38, %v2050_v20  ;;  %vm2049_vm8 = vcmp.eq.f32.partialorder %v2048_v36, 8.507059e+37 }
 0x4fe   :  { %v3439_v5 = vpop.eup %3438 }
 0x4ff   :  { %v3441_v8 = vpop.eup %3440  ;;  %v2020_v33 = vmul.f32 %v3439_v5, %v2018_v55  ;;  %vm2025_vm1 = vweird.f32 %v3439_v5 }
 0x500   :  { %v2040_v56 = vmul.f32 %v3441_v8, %v2038_v18  ;;  %vm2026_vm3 = vmor %vm2024_vm2, %vm2025_vm1  ;;  %vm2045_vm5 = vweird.f32 %v3441_v8 }
 0x501   :  { %v2021_v57 = vsub.f32 1.0, %v2020_v33  ;;  %vm2046_vm7 = vmor %vm2044_vm6, %vm2045_vm5 }
 0x502   :  { %v2041_v2 = vsub.f32 1.0, %v2040_v56 }
 0x503   :  { %v2022_v62 = vmul.f32 %v3439_v5, %v2021_v57 }
 0x504   :  { %v2042_v29 = vmul.f32 %v3441_v8, %v2041_v2 }
 0x505   :  { %v2023_v12 = vadd.f32 %v3439_v5, %v2022_v62 }
 0x506   :  { %v2043_v16 = vadd.f32 %v3441_v8, %v2042_v29 }
 0x507   :  { %v2027_v13 = vsel %vm2026_vm3, %v3439_v5, %v2023_v12 }
 0x508   :  { %v2032_v15 = vsel %vm2029_vm4, %v2031_v1, %v2027_v13  ;;  %v2047_v11 = vsel %vm2046_vm7, %v3441_v8, %v2043_v16 }
 0x509   :  { %v2054_v19 = vmul.f32 %v2032_v15, %v2011_v63  ;;  %v2052_v22 = vsel %vm2049_vm8, %v2051_v3, %v2047_v11 }
 0x50a   :  { %v2057_v23 = vsub.f32 1.0, %v2052_v22  ;;  %v2059_v54 = vmul.f32 %v2052_v22, %v3803_v17  ;;  %v193_v17 = vadd.f32 %v3695_v37, %v3642_v43 }
 0x50b   :  { %v2055_v0 = vadd.f32 %v2054_v19, %v220_v10 }
 0x50d   :  { %3442 = vtanh.f32 %v2055_v0 }
 0x513   :  { %v3443_v25 = vpop.eup %3442 }
 0x514   :  { %v2058_v27 = vmul.f32 %v3443_v25, %v2057_v23 }
 0x516   :  { %v3824_v39 = vadd.f32 %v2059_v54, %v2058_v27 }
 0x518   :  { %v2061_v24 = vpack.c.bf16 %v3824_v39, %v3824_v39 }
 0x51a   :  { %2062 = vst [vmem:[%s3852_s6 + $0x18] sm:$0xf] %v2061_v24  ;;  %2242 = vmatmul.bf16.vlgmr.msra.gmra.mxu3 %v2061_v24  ;;  %2255 = vmatmul.bf16.vlgmr.msra.gmra.mxu0 %v2061_v24 }
 0x51b   :  { %2268 = vmatmul.bf16.vlgmr.msra.gmra.mxu1 %v2061_v24 }
 0x597   :  { %v2256_v26 = vpop.f32.mrf.mxu0 }
 0x598   :  { %v2257_v4 = vadd.f32 %v2256_v26, %v2101_v14  ;;  %v2269_v28 = vpop.f32.mrf.mxu1 }
 0x599   :  { %v2270_v33 = vadd.f32 %v2269_v28, %v2102_v34 }
 0x59a   :  { %v2293_v6 = vadd.f32 %v2257_v4, %v193_v17 }
 0x59c   :  { %v3168_v35 = vmul.f32 -1.442695, %v2293_v6 }
 0x59d   :  { %v2243_v59 = vpop.f32.mrf.mxu3 }
 0x59e   :  { %3444 = vpow2.f32 %v3168_v35  ;;  %v2244_v40 = vadd.f32 %v2243_v59, %v2100_v30 }
 0x59f   :  { %v2258_v44 = vpop.f32.mrf.mxu0 }
 0x5a0   :  { %v2273_v45 = vadd.f32 %v2244_v40, %v3646_v49  ;;  %v2271_v53 = vpop.f32.mrf.mxu1 }
 0x5a2   :  { %v3167_v7 = vmul.f32 -1.442695, %v2273_v45 }
 0x5a4   :  { %v3445_v46 = vpop.eup %3444  ;;  %3446 = vpow2.f32 %v3167_v7 }
 0x5a5   :  { %v2297_v32 = vadd.f32 1.0, %v3445_v46  ;;  %v2245_v47 = vpop.f32.mrf.mxu3 }
 0x5a7   :  { %3448 = vrcp.f32 %v2297_v32  ;;  %v2309_v21 = vand.u32 2147483648, %v2297_v32  ;;  %vm2303_vm14 = vweird.f32 %v2297_v32  ;;  %v2307_v61 = vand.u32 2147483647, %v2297_v32 }
 0x5a9   :  { %v2310_v1 = vor.u32 1.1754944e-38, %v2309_v21  ;;  %vm2308_vm0 = vcmp.eq.f32.partialorder %v2307_v61, 8.507059e+37 }
 0x5aa   :  { %v3447_v48 = vpop.eup %3446 }
 0x5ab   :  { %v2277_v43 = vadd.f32 1.0, %v3447_v48 }
 0x5ad   :  { %3450 = vrcp.f32 %v2277_v43  ;;  %v3449_v37 = vpop.eup %3448  ;;  %v2289_v55 = vand.u32 2147483648, %v2277_v43  ;;  %v2287_v49 = vand.u32 2147483647, %v2277_v43  ;;  %vm2283_vm10 = vweird.f32 %v2277_v43 }
 0x5ae   :  { %v2299_v58 = vmul.f32 %v3449_v37, %v2297_v32  ;;  %vm2304_vm13 = vweird.f32 %v3449_v37 }
 0x5af   :  { %v2290_v8 = vor.u32 1.1754944e-38, %v2289_v55  ;;  %vm2288_vm12 = vcmp.eq.f32.partialorder %v2287_v49, 8.507059e+37  ;;  %vm2305_vm15 = vmor %vm2303_vm14, %vm2304_vm13 }
 0x5b0   :  { %v2300_v31 = vsub.f32 1.0, %v2299_v58 }
 0x5b2   :  { %v2301_v38 = vmul.f32 %v3449_v37, %v2300_v31 }
 0x5b3   :  { %v3451_v50 = vpop.eup %3450 }
 0x5b4   :  { %v2279_v51 = vmul.f32 %v3451_v50, %v2277_v43  ;;  %vm2284_vm9 = vweird.f32 %v3451_v50  ;;  %v2302_v57 = vadd.f32 %v3449_v37, %v2301_v38 }
 0x5b5   :  { %vm2285_vm11 = vmor %vm2283_vm10, %vm2284_vm9 }
 0x5b6   :  { %v2280_v52 = vsub.f32 1.0, %v2279_v51  ;;  %v2306_v12 = vsel %vm2305_vm15, %v3449_v37, %v2302_v57 }
 0x5b7   :  { %v2311_v63 = vsel %vm2308_vm0, %v2310_v1, %v2306_v12 }
 0x5b8   :  { %v2281_v18 = vmul.f32 %v3451_v50, %v2280_v52  ;;  %v2316_v13 = vsub.f32 1.0, %v2311_v63  ;;  %v2318_v16 = vmul.f32 %v2311_v63, %v3824_v39 }
 0x5ba   :  { %v2282_v5 = vadd.f32 %v3451_v50, %v2281_v18 }
 0x5bc   :  { %v2286_v56 = vsel %vm2285_vm11, %v3451_v50, %v2282_v5 }
 0x5bd   :  { %v2291_v2 = vsel %vm2288_vm12, %v2290_v8, %v2286_v56 }
 0x5be   :  { %v2313_v62 = vmul.f32 %v2291_v2, %v2270_v33 }
 0x5c0   :  { %v2314_v29 = vadd.f32 %v2313_v62, %v222_v41 }
 0x5c2   :  { %3452 = vtanh.f32 %v2314_v29 }
 0x5c8   :  { %v3453_v15 = vpop.eup %3452 }
 0x5c9   :  { %v2317_v10 = vmul.f32 %v3453_v15, %v2316_v13 }
 0x5cb   :  { %v2319_v19 = vadd.f32 %v2318_v16, %v2317_v10 }
 0x5cd   :  { %v2320_v20 = vpack.c.bf16 %v2319_v19, %v2319_v19  ;;  %2323 = vst [vmem:[%s3853_s7] sm:$0xff] %v2319_v19 }
 0x5cf   :  { %2321 = vst [vmem:[%s3852_s6 + $0x1c] sm:$0xf] %v2320_v20 }
 0x5d0   :  { %2332 = vsyncpa [#allocation5], 1 }

// kernel: grunet_forward.4
= control target key start
LH: loop header
LB: loop body
LE: loop exit
PB: predicated region body
PF: predicated region fallthrough
CT: control target
= control target key end

     0   :  { %13 = vsyncpa [#allocation5], 0  ;;  %s4070_s0 = inlined_call_operand.vmem [shape: bf16[64,128], index: 0, kind: input, shape index: {}]   ;;  %s4071_s1 = inlined_call_operand.hbm [shape: bf16[128,384], index: 1, kind: input, shape index: {}]   ;;  %s4072_s2 = inlined_call_operand.vmem [shape: f32[1,384], index: 2, kind: input, shape index: {}]   ;;  %s4073_s3 = inlined_call_operand.hbm [shape: bf16[128,384], index: 3, kind: input, shape index: {}]   ;;  %s4074_s4 = inlined_call_operand.vmem [shape: f32[1,384], index: 4, kind: input, shape index: {}]   ;;  %s4075_s5 = inlined_call_operand.vmem [shape: f32[8,128], index: 5, kind: input, shape index: {}]   ;;  %s4076_s6 = inlined_call_operand.hbm [shape: bf16[64,128], index: 6, kind: output, shape index: {0}]   ;;  %s4077_s7 = inlined_call_operand.vmem [shape: f32[8,128], index: 7, kind: output, shape index: {1}]  }
   0x1   :  { %14 = vsyncpa [#allocation8], 0 }
   0x2   :  { %15 = vsyncpa [#allocation6], 0  ;;  %s22_s26 = sshll.u32 %s4071_s1, 4  ;;  %s3756_s27 = smov [#allocation4]   ;;  %s23_s26 = int_to_ptr.hbm [resolvable:$true] %s22_s26 }
   0x3   :  { %s24_s28 = sshll.u32 %s3756_s27, 4  ;;  %s37_s8 = sshll.u32 %s4073_s3, 4  ;;  %s25_s28 = int_to_ptr.vmem [resolvable:$true] %s24_s28  ;;  %s38_s8 = int_to_ptr.hbm [resolvable:$true] %s37_s8 }
   0x4   :  { %s3757_s9 = smov 192   ;;  %s3758_s10 = smov 12  }
   0x5   :  { %30 = dma.hbm_to_vmem [thread:$0]  %s23_s26, 3072, %s25_s28, [#allocation5], %s3757_s9, %s3757_s9, %s3758_s10  }
   0x6   :  { %s3759_s11 = smov [#allocation7]  }
   0x7   :  { %s39_s12 = sshll.u32 %s3759_s11, 4  ;;  %s40_s12 = int_to_ptr.vmem [resolvable:$true] %s39_s12 }
   0x8   :  { %45 = dma.hbm_to_vmem [thread:$0]  %s38_s8, 3072, %s40_s12, [#allocation8], %s3757_s9, %s3757_s9, %s3758_s10  }
   0x9   :  { %3750 = dma.done.wait [#allocation5], 3072  }
   0xa   :  { %3751 = vsyncadd [#allocation5], 4294964224 }
   0xb   :  { %3752 = dma.done.wait [#allocation8], 3072  }
   0xc   :  { %3753 = vsyncadd [#allocation8], 4294964224  ;;  %v2577_v0 = vld [vmem:[#allocation4 + $0xa8] sm:$0xf]  ;;  %v3397_v1 = vld [vmem:[#allocation4 + $0xb0] sm:$0xf0] }
   0xd   :  { %v2673_v2 = vld [vmem:[#allocation7 + $0xa8] sm:$0xf]  ;;  %v2578_v3 = vor.u32 %v3397_v1, %v2577_v0  ;;  %v3421_v4 = vld [vmem:[#allocation7 + $0xb0] sm:$0xf0]  ;;  %v2565_v5 = vld [vmem:[#allocation4 + $0x90] sm:$0xf] }
   0xe   :  { %v3394_v6 = vld [vmem:[#allocation4 + $0x98] sm:$0xf0]  ;;  %v2674_v7 = vor.u32 %v3421_v4, %v2673_v2  ;;  %v2661_v8 = vld [vmem:[#allocation7 + $0x90] sm:$0xf]  ;;  %v2553_v12 = vld [vmem:[#allocation4 + $0x78] sm:$0xf] }
   0xf   :  { %v3418_v9 = vld [vmem:[#allocation7 + $0x98] sm:$0xf0]  ;;  %264 = vmatpush.bf16.msra.mxu0 %v2578_v3  ;;  %v2566_v10 = vor.u32 %v3394_v6, %v2565_v5  ;;  %v3391_v13 = vld [vmem:[#allocation4 + $0x80] sm:$0xf0]  ;;  %v2649_v14 = vld [vmem:[#allocation7 + $0x78] sm:$0xf] }
  0x10   :  { %548 = vmatpush.bf16.msra.mxu3 %v2674_v7  ;;  %v2662_v11 = vor.u32 %v3418_v9, %v2661_v8  ;;  %v3415_v15 = vld [vmem:[#allocation7 + $0x80] sm:$0xf0]  ;;  %v2554_v16 = vor.u32 %v3391_v13, %v2553_v12  ;;  %v2541_v18 = vld [vmem:[#allocation4 + $0x60] sm:$0xf]  ;;  %v3388_v19 = vld [vmem:[#allocation4 + $0x68] sm:$0xf0] }
  0x11   :  { %v2650_v17 = vor.u32 %v3415_v15, %v2649_v14  ;;  %v2637_v20 = vld [vmem:[#allocation7 + $0x60] sm:$0xf]  ;;  %v3412_v21 = vld [vmem:[#allocation7 + $0x68] sm:$0xf0]  ;;  %v2542_v22 = vor.u32 %v3388_v19, %v2541_v18  ;;  %v2529_v24 = vld [vmem:[#allocation4 + $0x48] sm:$0xf] }
  0x12   :  { %v2638_v23 = vor.u32 %v3412_v21, %v2637_v20  ;;  %v3385_v25 = vld [vmem:[#allocation4 + $0x50] sm:$0xf0]  ;;  %v2625_v26 = vld [vmem:[#allocation7 + $0x48] sm:$0xf]  ;;  %v3396_v28 = vld [vmem:[#allocation4 + $0xac] sm:$0xf] }
  0x13   :  { %265 = vmatpush.bf16.msra.mxu0 %v2566_v10  ;;  %v3409_v27 = vld [vmem:[#allocation7 + $0x50] sm:$0xf0]  ;;  %v2579_v29 = vld [vmem:[#allocation4 + $0xb4] sm:$0xf0]  ;;  %v2530_v32 = vor.u32 %v3385_v25, %v2529_v24  ;;  %v2567_v33 = vld [vmem:[#allocation4 + $0x9c] sm:$0xf0] }
  0x14   :  { %549 = vmatpush.bf16.msra.mxu3 %v2662_v11  ;;  %v2582_v30 = vor.u32 %v3396_v28, %v2579_v29  ;;  %v3393_v31 = vld [vmem:[#allocation4 + $0x94] sm:$0xf]  ;;  %v2626_v34 = vor.u32 %v3409_v27, %v2625_v26  ;;  %v2517_v35 = vld [vmem:[#allocation4 + $0x30] sm:$0xf]  ;;  %v3382_v36 = vld [vmem:[#allocation4 + $0x38] sm:$0xf0] }
  0x15   :  { %v2613_v37 = vld [vmem:[#allocation7 + $0x30] sm:$0xf]  ;;  %v2570_v38 = vor.u32 %v3393_v31, %v2567_v33  ;;  %v3406_v39 = vld [vmem:[#allocation7 + $0x38] sm:$0xf0]  ;;  %v2555_v41 = vld [vmem:[#allocation4 + $0x84] sm:$0xf0]  ;;  %v2518_v42 = vor.u32 %v3382_v36, %v2517_v35 }
  0x16   :  { %293 = vmatpush.bf16.msra.mxu1 %v2582_v30  ;;  %v3390_v40 = vld [vmem:[#allocation4 + $0x7c] sm:$0xf]  ;;  %v2505_v43 = vld [vmem:[#allocation4 + $0x18] sm:$0xf]  ;;  %v3379_v44 = vld [vmem:[#allocation4 + $0x20] sm:$0xf0]  ;;  %v2614_v45 = vor.u32 %v3406_v39, %v2613_v37 }
  0x17   :  { %266 = vmatpush.bf16.msra.mxu0 %v2554_v16  ;;  %v2601_v46 = vld [vmem:[#allocation7 + $0x18] sm:$0xf]  ;;  %v3403_v47 = vld [vmem:[#allocation7 + $0x20] sm:$0xf0]  ;;  %v2558_v48 = vor.u32 %v3390_v40, %v2555_v41  ;;  %v2543_v50 = vld [vmem:[#allocation4 + $0x6c] sm:$0xf0]  ;;  %v2506_v54 = vor.u32 %v3379_v44, %v2505_v43 }
  0x18   :  { %550 = vmatpush.bf16.msra.mxu3 %v2650_v17  ;;  %v3387_v49 = vld [vmem:[#allocation4 + $0x64] sm:$0xf]  ;;  %v2585_v51 = vld [vmem:[#allocation4 + $0xb0] sm:$0xf]  ;;  %v3398_v52 = vld [vmem:[#allocation4 + $0xb8] sm:$0xf0]  ;;  %v2602_v58 = vor.u32 %v3403_v47, %v2601_v46 }
  0x19   :  { %v2586_v53 = vor.u32 %v3398_v52, %v2585_v51  ;;  %v2493_v55 = vld [vmem:[#allocation4] sm:$0xf]  ;;  %v3376_v56 = vld [vmem:[#allocation4 + $0x8] sm:$0xf0]  ;;  %v2675_v61 = vld [vmem:[#allocation7 + $0xb4] sm:$0xf0]  ;;  %v2546_v62 = vor.u32 %v3387_v49, %v2543_v50 }
  0x1a   :  { %294 = vmatpush.bf16.msra.mxu1 %v2570_v38  ;;  %v2589_v57 = vld [vmem:[#allocation7] sm:$0xf]  ;;  %v3400_v59 = vld [vmem:[#allocation7 + $0x8] sm:$0xf0]  ;;  %v2681_v63 = vld [vmem:[#allocation7 + $0xb0] sm:$0xf]  ;;  %v2494_v5 = vor.u32 %v3376_v56, %v2493_v55 }
  0x1b   :  { %267 = vmatpush.bf16.msra.mxu0 %v2542_v22  ;;  %v3420_v60 = vld [vmem:[#allocation7 + $0xac] sm:$0xf]  ;;  %v3422_v0 = vld [vmem:[#allocation7 + $0xb8] sm:$0xf0]  ;;  %322 = vmatpush.bf16.msra.mxu2 %v2586_v53  ;;  %v2573_v1 = vld [vmem:[#allocation4 + $0x98] sm:$0xf]  ;;  %v2590_v7 = vor.u32 %v3400_v59, %v2589_v57 }
  0x1c   :  { %551 = vmatpush.bf16.msra.mxu3 %v2638_v23  ;;  %v3384_v2 = vld [vmem:[#allocation4 + $0x4c] sm:$0xf]  ;;  %v2531_v3 = vld [vmem:[#allocation4 + $0x54] sm:$0xf0]  ;;  %v3395_v4 = vld [vmem:[#allocation4 + $0xa0] sm:$0xf0]  ;;  %v2682_v10 = vor.u32 %v3422_v0, %v2681_v63  ;;  %v2678_v13 = vor.u32 %v3420_v60, %v2675_v61 }
  0x1d   :  { %v2574_v6 = vor.u32 %v3395_v4, %v2573_v1  ;;  %v3812_v8 = vld [vmem:[%s4070_s0] sm:$0xff]  ;;  %v3417_v11 = vld [vmem:[#allocation7 + $0x94] sm:$0xf]  ;;  %v2669_v12 = vld [vmem:[#allocation7 + $0x98] sm:$0xf]  ;;  %v2534_v15 = vor.u32 %v3384_v2, %v2531_v3  ;;  %s2457_s14 = sshll.u32 %s4076_s6, 4  ;;  %s2458_s14 = int_to_ptr.hbm [resolvable:$true] %s2457_s14 }
  0x1e   :  { %295 = vmatpush.bf16.msra.mxu1 %v2558_v48  ;;  %v3817_v9 = vld [vmem:[%s4075_s5] sm:$0xff]  ;;  %v3392_v17 = vld [vmem:[#allocation4 + $0x88] sm:$0xf0]  ;;  %v3381_v19 = vld [vmem:[#allocation4 + $0x34] sm:$0xf]  ;;  %s3761_s16 = smov 64  }
  0x1f   :  { %268 = vmatpush.bf16.msra.mxu0 %v2530_v32  ;;  %v3419_v14 = vld [vmem:[#allocation7 + $0xa0] sm:$0xf0]  ;;  %323 = vmatpush.bf16.msra.mxu2 %v2574_v6  ;;  %v2561_v16 = vld [vmem:[#allocation4 + $0x80] sm:$0xf]  ;;  %v3821_v22 = vpack.c.bf16 %v3817_v9, %v3817_v9  ;;  %v3414_v23 = vld [vmem:[#allocation7 + $0x7c] sm:$0xf] }
  0x20   :  { %552 = vmatpush.bf16.msra.mxu3 %v2626_v34  ;;  %v2663_v18 = vld [vmem:[#allocation7 + $0x9c] sm:$0xf0]  ;;  %v2562_v21 = vor.u32 %v3392_v17, %v2561_v16  ;;  %v2670_v24 = vor.u32 %v3419_v14, %v2669_v12  ;;  %v3416_v27 = vld [vmem:[#allocation7 + $0x88] sm:$0xf0]  ;;  %v2549_v29 = vld [vmem:[#allocation4 + $0x68] sm:$0xf] }
  0x21   :  { %v2519_v20 = vld [vmem:[#allocation4 + $0x3c] sm:$0xf0]  ;;  %v2666_v26 = vor.u32 %v3417_v11, %v2663_v18  ;;  %v3389_v30 = vld [vmem:[#allocation4 + $0x70] sm:$0xf0]  ;;  %v2651_v31 = vld [vmem:[#allocation7 + $0x84] sm:$0xf0] }
  0x22   :  { %296 = vmatpush.bf16.msra.mxu1 %v2546_v62  ;;  %v2657_v25 = vld [vmem:[#allocation7 + $0x80] sm:$0xf]  ;;  %v2522_v28 = vor.u32 %v3381_v19, %v2519_v20  ;;  %v3378_v32 = vld [vmem:[#allocation4 + $0x1c] sm:$0xf]  ;;  %v2507_v33 = vld [vmem:[#allocation4 + $0x24] sm:$0xf0]  ;;  %v2550_v34 = vor.u32 %v3389_v30, %v2549_v29  ;;  %v2654_v38 = vor.u32 %v3414_v23, %v2651_v31 }
  0x23   :  { %269 = vmatpush.bf16.msra.mxu0 %v2518_v42  ;;  %324 = vmatpush.bf16.msra.mxu2 %v2562_v21  ;;  %v2537_v35 = vld [vmem:[#allocation4 + $0x50] sm:$0xf]  ;;  %v3386_v36 = vld [vmem:[#allocation4 + $0x58] sm:$0xf0]  ;;  %v2658_v37 = vor.u32 %v3416_v27, %v2657_v25  ;;  %v3411_v39 = vld [vmem:[#allocation7 + $0x64] sm:$0xf]  ;;  %v2510_v42 = vor.u32 %v3378_v32, %v2507_v33 }
  0x24   :  { %553 = vmatpush.bf16.msra.mxu3 %v2614_v45  ;;  %v2645_v40 = vld [vmem:[#allocation7 + $0x68] sm:$0xf]  ;;  %v3413_v41 = vld [vmem:[#allocation7 + $0x70] sm:$0xf0]  ;;  %v2639_v43 = vld [vmem:[#allocation7 + $0x6c] sm:$0xf0]  ;;  %v2538_v46 = vor.u32 %v3386_v36, %v2537_v35 }
  0x25   :  { %v3375_v44 = vld [vmem:[#allocation4 + $0x4] sm:$0xf]  ;;  %v2495_v45 = vld [vmem:[#allocation4 + $0xc] sm:$0xf0]  ;;  %v2525_v47 = vld [vmem:[#allocation4 + $0x38] sm:$0xf]  ;;  %v2646_v49 = vor.u32 %v3413_v41, %v2645_v40  ;;  %v2642_v50 = vor.u32 %v3411_v39, %v2639_v43 }
  0x26   :  { %297 = vmatpush.bf16.msra.mxu1 %v2534_v15  ;;  %v3383_v48 = vld [vmem:[#allocation4 + $0x40] sm:$0xf0]  ;;  %v2498_v51 = vor.u32 %v3375_v44, %v2495_v45  ;;  %v2633_v52 = vld [vmem:[#allocation7 + $0x50] sm:$0xf]  ;;  %v3410_v53 = vld [vmem:[#allocation7 + $0x58] sm:$0xf0] }
  0x27   :  { %270 = vmatpush.bf16.msra.mxu0 %v2506_v54  ;;  %325 = vmatpush.bf16.msra.mxu2 %v2550_v34  ;;  %v3408_v54 = vld [vmem:[#allocation7 + $0x4c] sm:$0xf]  ;;  %v2627_v55 = vld [vmem:[#allocation7 + $0x54] sm:$0xf0]  ;;  %v2526_v56 = vor.u32 %v3383_v48, %v2525_v47  ;;  %v2513_v57 = vld [vmem:[#allocation4 + $0x20] sm:$0xf]  ;;  %v2634_v59 = vor.u32 %v3410_v53, %v2633_v52 }
  0x28   :  { %554 = vmatpush.bf16.msra.mxu3 %v2602_v58  ;;  %v3380_v58 = vld [vmem:[#allocation4 + $0x28] sm:$0xf0]  ;;  %v2630_v60 = vor.u32 %v3408_v54, %v2627_v55  ;;  %v2621_v61 = vld [vmem:[#allocation7 + $0x38] sm:$0xf]  ;;  %v3407_v62 = vld [vmem:[#allocation7 + $0x40] sm:$0xf0] }
  0x29   :  { %v3372_v63 = vld [vmem:[%s4070_s0 + $0x8] sm:$0xff]  ;;  %v3405_v0 = vld [vmem:[#allocation7 + $0x34] sm:$0xf]  ;;  %v2615_v1 = vld [vmem:[#allocation7 + $0x3c] sm:$0xf0]  ;;  %v2514_v2 = vor.u32 %v3380_v58, %v2513_v57  ;;  %v2622_v3 = vor.u32 %v3407_v62, %v2621_v61  ;;  %s3762_s17 = smov 4  }
  0x2a   :  { %298 = vmatpush.bf16.msra.mxu1 %v2522_v28  ;;  %v2618_v4 = vor.u32 %v3405_v0, %v2615_v1  ;;  %v2501_v6 = vld [vmem:[#allocation4 + $0x8] sm:$0xf]  ;;  %v2609_v11 = vld [vmem:[#allocation7 + $0x20] sm:$0xf]  ;;  %v3404_v12 = vld [vmem:[#allocation7 + $0x28] sm:$0xf0] }
  0x2b   :  { %271 = vmatpush.bf16.msra.mxu0 %v2494_v5  ;;  %326 = vmatpush.bf16.msra.mxu2 %v2538_v46  ;;  %v3402_v5 = vld [vmem:[#allocation7 + $0x1c] sm:$0xf]  ;;  %v2610_v14 = vor.u32 %v3404_v12, %v2609_v11  ;;  %v2597_v16 = vld [vmem:[#allocation7 + $0x8] sm:$0xf]  ;;  %v3401_v17 = vld [vmem:[#allocation7 + $0x10] sm:$0xf0] }
  0x2c   :  { %555 = vmatpush.bf16.msra.mxu3 %v2590_v7  ;;  %v3377_v7 = vld [vmem:[#allocation4 + $0x10] sm:$0xf0]  ;;  %v3399_v18 = vld [vmem:[#allocation7 + $0x4] sm:$0xf]  ;;  %v2591_v19 = vld [vmem:[#allocation7 + $0xc] sm:$0xf0]  ;;  %v2598_v20 = vor.u32 %v3401_v17, %v2597_v16 }
  0x2d   :  { %v2594_v21 = vor.u32 %v3399_v18, %v2591_v19  ;;  %v3373_v23 = vld [vmem:[%s4070_s0 + $0x10] sm:$0xff]  ;;  %v2773_v28 = vld [vmem:[#allocation7 + $0xb4] sm:$0xf0]  ;;  %v3442_v31 = vld [vmem:[#allocation7 + $0x98] sm:$0xf0] }
  0x2e   :  { %272 = vmatmul.bf16.vlgmr.msra.gmra.mxu0 %v3812_v8  ;;  %299 = vmatpush.bf16.msra.mxu1 %v2510_v42  ;;  %v3445_v25 = vld [vmem:[#allocation7 + $0xb0] sm:$0xf0]  ;;  %v2759_v30 = vld [vmem:[#allocation7 + $0x90] sm:$0xf]  ;;  %v2761_v34 = vld [vmem:[#allocation7 + $0x9c] sm:$0xf0] }
  0x2f   :  { %574 = vmatpush.bf16.msrb.mxu0 %v2682_v10  ;;  %556 = vmatmul.bf16.vlgmr.msra.gmra.mxu3 %v3821_v22  ;;  %v2603_v10 = vld [vmem:[#allocation7 + $0x24] sm:$0xf0]  ;;  %v3441_v32 = vld [vmem:[#allocation7 + $0x94] sm:$0xf]  ;;  %v2760_v33 = vor.u32 %v3442_v31, %v2759_v30  ;;  %v2767_v53 = vld [vmem:[#allocation7 + $0x98] sm:$0xf] }
  0x30   :  { %561 = vmatpush.bf16.msrb.mxu3 %v2678_v13  ;;  %327 = vmatpush.bf16.msra.mxu2 %v2526_v56  ;;  %v2502_v13 = vor.u32 %v3377_v7, %v2501_v6  ;;  %v2606_v15 = vor.u32 %v3402_v5, %v2603_v10  ;;  %v2764_v35 = vor.u32 %v3441_v32, %v2761_v34  ;;  %v3443_v54 = vld [vmem:[#allocation7 + $0xa0] sm:$0xf0]  ;;  %v2747_v58 = vld [vmem:[#allocation7 + $0x78] sm:$0xf]  ;;  %v2749_v62 = vld [vmem:[#allocation7 + $0x84] sm:$0xf0] }
  0x31   :  { %v2768_v56 = vor.u32 %v3443_v54, %v2767_v53  ;;  %v3440_v0 = vld [vmem:[#allocation7 + $0x88] sm:$0xf0]  ;;  %v2735_v6 = vld [vmem:[#allocation7 + $0x60] sm:$0xf]  ;;  %v3435_v10 = vld [vmem:[#allocation7 + $0x64] sm:$0xf] }
  0x32   :  { %300 = vmatpush.bf16.msra.mxu1 %v2498_v51  ;;  %v3436_v7 = vld [vmem:[#allocation7 + $0x68] sm:$0xf0]  ;;  %v3433_v16 = vld [vmem:[#allocation7 + $0x50] sm:$0xf0]  ;;  %v2713_v32 = vld [vmem:[#allocation7 + $0x3c] sm:$0xf0] }
  0x33   :  { %575 = vmatpush.bf16.msrb.mxu0 %v2670_v24  ;;  %v3374_v24 = vld [vmem:[%s4070_s0 + $0x18] sm:$0xff]  ;;  %v3429_v31 = vld [vmem:[#allocation7 + $0x34] sm:$0xf]  ;;  %v3431_v53 = vld [vmem:[#allocation7 + $0x40] sm:$0xf0] }
  0x34   :  { %562 = vmatpush.bf16.msrb.mxu3 %v2666_v26  ;;  %328 = vmatpush.bf16.msra.mxu2 %v2514_v2  ;;  %v3444_v26 = vld [vmem:[#allocation7 + $0xac] sm:$0xf] }
  0x35   :  { %301 = vmatmul.bf16.vlgmr.msra.gmra.mxu1 %v3812_v8  ;;  %v2776_v29 = vor.u32 %v3444_v26, %v2773_v28  ;;  %v3430_v28 = vld [vmem:[#allocation7 + $0x38] sm:$0xf0] }
  0x37   :  { %576 = vmatpush.bf16.msrb.mxu0 %v2658_v37  ;;  %v3844_v37 = vld [vmem:[%s4074_s4] sm:$0x7] }
  0x38   :  { %563 = vmatpush.bf16.msrb.mxu3 %v2654_v38  ;;  %329 = vmatpush.bf16.msra.mxu2 %v2502_v13  ;;  %v414_v41 = vperm.slane %v3844_v37, 0  ;;  %v2736_v13 = vor.u32 %v3436_v7, %v2735_v6  ;;  %v415_v18 = vperm.slane %v3844_v37, 1 }
  0x3b   :  { %577 = vmatpush.bf16.msrb.mxu0 %v2646_v49  ;;  %330 = vmatmul.bf16.vlgmr.msra.gmra.mxu2 %v3812_v8  ;;  %v2771_v8 = vld [vmem:[#allocation7 + $0xa8] sm:$0xf]  ;;  %v2779_v49 = vld [vmem:[#allocation7 + $0xb0] sm:$0xf] }
  0x3c   :  { %564 = vmatpush.bf16.msrb.mxu3 %v2642_v50  ;;  %v2772_v27 = vor.u32 %v3445_v25, %v2771_v8  ;;  %820 = vmatpush.bf16.msrb.mxu2 %v2776_v29  ;;  %v3446_v50 = vld [vmem:[#allocation7 + $0xb8] sm:$0xf0]  ;;  %v2743_v29 = vld [vmem:[#allocation7 + $0x68] sm:$0xf] }
  0x3d   :  { %v2780_v51 = vor.u32 %v3446_v50, %v2779_v49 }
  0x3e   :  { %277 = vmatmul.bf16.gmra.mxu0 %v3372_v63  ;;  %807 = vmatpush.bf16.msrb.mxu1 %v2772_v27  ;;  %v2711_v27 = vld [vmem:[#allocation7 + $0x30] sm:$0xf] }
  0x3f   :  { %578 = vmatpush.bf16.msrb.mxu0 %v2634_v59  ;;  %v3439_v59 = vld [vmem:[#allocation7 + $0x80] sm:$0xf0] }
  0x40   :  { %565 = vmatpush.bf16.msrb.mxu3 %v2630_v60  ;;  %821 = vmatpush.bf16.msrb.mxu2 %v2764_v35  ;;  %v3438_v60 = vld [vmem:[#allocation7 + $0x7c] sm:$0xf]  ;;  %v2748_v61 = vor.u32 %v3439_v59, %v2747_v58 }
  0x41   :  { %v2752_v1 = vor.u32 %v3438_v60, %v2749_v62  ;;  %v2687_v60 = vld [vmem:[#allocation7] sm:$0xf] }
  0x42   :  { %808 = vmatpush.bf16.msrb.mxu1 %v2760_v33  ;;  %v3437_v33 = vld [vmem:[#allocation7 + $0x70] sm:$0xf0]  ;;  %v2707_v62 = vld [vmem:[#allocation7 + $0x20] sm:$0xf] }
  0x43   :  { %579 = vmatpush.bf16.msrb.mxu0 %v2622_v3  ;;  %v2744_v35 = vor.u32 %v3437_v33, %v2743_v29  ;;  %v416_v33 = vperm.slane %v3844_v37, 2 }
  0x44   :  { %566 = vmatpush.bf16.msrb.mxu3 %v2618_v4  ;;  %822 = vmatpush.bf16.msrb.mxu2 %v2752_v1  ;;  %v3428_v1 = vld [vmem:[#allocation7 + $0x28] sm:$0xf0] }
  0x45   :  { %306 = vmatmul.bf16.gmra.mxu1 %v3372_v63 }
  0x46   :  { %809 = vmatpush.bf16.msrb.mxu1 %v2748_v61  ;;  %v3424_v61 = vld [vmem:[#allocation7 + $0x8] sm:$0xf0] }
  0x47   :  { %580 = vmatpush.bf16.msrb.mxu0 %v2610_v14  ;;  %v2737_v14 = vld [vmem:[#allocation7 + $0x6c] sm:$0xf0]  ;;  %v2688_v6 = vor.u32 %v3424_v61, %v2687_v60 }
  0x48   :  { %567 = vmatpush.bf16.msrb.mxu3 %v2606_v15  ;;  %v2723_v15 = vld [vmem:[#allocation7 + $0x48] sm:$0xf]  ;;  %v2740_v19 = vor.u32 %v3435_v10, %v2737_v14  ;;  %v2708_v10 = vor.u32 %v3428_v1, %v2707_v62  ;;  %v3425_v14 = vld [vmem:[#allocation7 + $0x10] sm:$0xf0] }
  0x4a   :  { %810 = vmatpush.bf16.msrb.mxu1 %v2736_v13  ;;  %823 = vmatpush.bf16.msrb.mxu2 %v2740_v19  ;;  %v2695_v13 = vld [vmem:[#allocation7 + $0x8] sm:$0xf] }
  0x4b   :  { %581 = vmatpush.bf16.msrb.mxu0 %v2598_v20  ;;  %335 = vmatmul.bf16.gmra.mxu2 %v3372_v63  ;;  %v2755_v63 = vld [vmem:[#allocation7 + $0x80] sm:$0xf]  ;;  %v3432_v20 = vld [vmem:[#allocation7 + $0x4c] sm:$0xf] }
  0x4c   :  { %568 = vmatpush.bf16.msrb.mxu3 %v2594_v21  ;;  %v2756_v3 = vor.u32 %v3440_v0, %v2755_v63  ;;  %v2725_v21 = vld [vmem:[#allocation7 + $0x54] sm:$0xf0] }
  0x4d   :  { %v2728_v26 = vor.u32 %v3432_v20, %v2725_v21  ;;  %v2696_v20 = vor.u32 %v3425_v14, %v2695_v13  ;;  %v3469_v13 = vld [vmem:[#allocation7 + $0xb0] sm:$0xf0]  ;;  %v3468_v14 = vld [vmem:[#allocation7 + $0xac] sm:$0xf] }
  0x4e   :  { %282 = vmatmul.bf16.gmra.mxu0 %v3373_v23 }
  0x4f   :  { %569 = vmatmul.bf16.vlgmr.msrb.gmra.mxu3 %v3821_v22  ;;  %824 = vmatpush.bf16.msrb.mxu2 %v2728_v26 }
  0x50   :  { %833 = vmatpush.bf16.msra.mxu3 %v2780_v51  ;;  %v2701_v51 = vld [vmem:[#allocation7 + $0x24] sm:$0xf0] }
  0x54   :  { %834 = vmatpush.bf16.msra.mxu3 %v2768_v56 }
  0x55   :  { %311 = vmatmul.bf16.gmra.mxu1 %v3373_v23 }
  0x58   :  { %835 = vmatpush.bf16.msra.mxu3 %v2756_v3  ;;  %v3423_v3 = vld [vmem:[#allocation7 + $0x4] sm:$0xf] }
  0x5b   :  { %340 = vmatmul.bf16.gmra.mxu2 %v3373_v23 }
  0x5c   :  { %836 = vmatpush.bf16.msra.mxu3 %v2744_v35 }
  0x5e   :  { %287 = vmatmul.bf16.gmra.mxu0 %v3374_v24 }
  0x65   :  { %316 = vmatmul.bf16.gmra.mxu1 %v3374_v24 }
  0x6b   :  { %345 = vmatmul.bf16.gmra.mxu2 %v3374_v24  ;;  %v2724_v24 = vor.u32 %v3433_v16, %v2723_v15 }
  0x6d   :  { %811 = vmatpush.bf16.msrb.mxu1 %v2724_v24 }
  0x6e   :  { %582 = vmatmul.bf16.vlgmr.msrb.gmra.mxu0 %v3821_v22  ;;  %v104_v22 = vld [vmem:[%s4072_s2] sm:$0x7] }
  0x6f   :  { %v3846_v38 = vperm.slane %v104_v22, 0  ;;  %v3861_v4 = vperm.slane %v104_v22, 1  ;;  %v3869_v8 = vperm.slane %v104_v22, 2  ;;  %v2731_v22 = vld [vmem:[#allocation7 + $0x50] sm:$0xf] }
  0xab   :  { %v273_v36 = vpop.f32.mrf.mxu0 }
  0xac   :  { %v274_v44 = vadd.f32 %v273_v36, %v3846_v38  ;;  %v2712_v36 = vor.u32 %v3430_v28, %v2711_v27 }
  0xae   :  { %812 = vmatpush.bf16.msrb.mxu1 %v2712_v36 }
  0xb2   :  { %v557_v39 = vpop.f32.mrf.mxu3  ;;  %v302_v12 = vpop.f32.mrf.mxu1 }
  0xb3   :  { %v275_v40 = vpop.f32.mrf.mxu0  ;;  %v558_v43 = vadd.f32 %v557_v39, %v414_v41  ;;  %v303_v25 = vadd.f32 %v302_v12, %v3861_v4 }
  0xb4   :  { %v3850_v42 = vadd.f32 %v275_v40, %v3846_v38  ;;  %v3434_v40 = vld [vmem:[#allocation7 + $0x58] sm:$0xf0] }
  0xb5   :  { %v587_v47 = vadd.f32 %v558_v43, %v274_v44  ;;  %v2716_v43 = vor.u32 %v3429_v31, %v2713_v32  ;;  %v2732_v50 = vor.u32 %v3434_v40, %v2731_v22 }
  0xb7   :  { %v2683_v52 = vmul.f32 -1.442695, %v587_v47  ;;  %v3426_v47 = vld [vmem:[#allocation7 + $0x1c] sm:$0xf]  ;;  %825 = vmatpush.bf16.msrb.mxu2 %v2716_v43  ;;  %837 = vmatpush.bf16.msra.mxu3 %v2732_v50 }
  0xb8   :  { %v2704_v58 = vor.u32 %v3426_v47, %v2701_v51 }
  0xb9   :  { %3598 = vpow2.f32 %v2683_v52  ;;  %v2719_v52 = vld [vmem:[#allocation7 + $0x38] sm:$0xf] }
  0xba   :  { %v559_v45 = vpop.f32.mrf.mxu3  ;;  %v2720_v59 = vor.u32 %v3431_v53, %v2719_v52 }
  0xbb   :  { %v278_v46 = vpop.f32.mrf.mxu0  ;;  %v2699_v45 = vld [vmem:[#allocation7 + $0x18] sm:$0xf]  ;;  %826 = vmatpush.bf16.msrb.mxu2 %v2704_v58 }
  0xbc   :  { %v3854_v48 = vadd.f32 %v278_v46, %v3846_v38  ;;  %v3427_v46 = vld [vmem:[#allocation7 + $0x20] sm:$0xf0]  ;;  %838 = vmatpush.bf16.msra.mxu3 %v2720_v59 }
  0xbd   :  { %v2700_v56 = vor.u32 %v3427_v46, %v2699_v45 }
  0xbe   :  { %v3859_v2 = vpop.f32.mrf.mxu2 }
  0xbf   :  { %v3599_v5 = vpop.eup %3598  ;;  %813 = vmatpush.bf16.msrb.mxu1 %v2700_v56 }
  0xc0   :  { %v3867_v23 = vadd.f32 1.0, %v3599_v5  ;;  %v2689_v5 = vld [vmem:[#allocation7 + $0xc] sm:$0xf0]  ;;  %839 = vmatpush.bf16.msra.mxu3 %v2708_v10 }
  0xc2   :  { %3600 = vrcp.f32 %v3867_v23  ;;  %v603_v31 = vand.u32 2147483648, %v3867_v23  ;;  %vm597_vm1 = vweird.f32 %v3867_v23 }
  0xc3   :  { %v280_v55 = vpop.f32.mrf.mxu0  ;;  %814 = vmatpush.bf16.msrb.mxu1 %v2688_v6 }
  0xc4   :  { %v3857_v57 = vadd.f32 %v280_v55, %v3846_v38  ;;  %840 = vmatpush.bf16.msra.mxu3 %v2696_v20  ;;  %v604_v40 = vor.u32 1.1754944e-38, %v603_v31  ;;  %v3470_v20 = vld [vmem:[#allocation7 + $0xb8] sm:$0xf0]  ;;  %v3465_v31 = vld [vmem:[#allocation7 + $0x94] sm:$0xf] }
  0xc6   :  { %v333_v39 = vpop.f32.mrf.mxu2 }
  0xc7   :  { %v3874_v44 = vadd.f32 %v333_v39, %v3869_v8 }
  0xc8   :  { %v3601_v63 = vpop.eup %3600 }
  0xc9   :  { %v593_v7 = vmul.f32 %v3601_v63, %v3867_v23  ;;  %vm598_vm0 = vweird.f32 %v3601_v63 }
  0xca   :  { %vm599_vm2 = vmor %vm597_vm1, %vm598_vm0 }
  0xcb   :  { %v283_v11 = vpop.f32.mrf.mxu0  ;;  %v594_v19 = vsub.f32 1.0, %v593_v7 }
  0xcc   :  { %v3864_v17 = vadd.f32 %v283_v11, %v3846_v38  ;;  %v2692_v11 = vor.u32 %v3423_v3, %v2689_v5  ;;  %v3912_v5 = vpop.f32.mrf.mxu1 }
  0xce   :  { %827 = vmatpush.bf16.msrb.mxu2 %v2692_v11  ;;  %v336_v21 = vpop.f32.mrf.mxu2 }
  0xcf   :  { %v3884_v24 = vadd.f32 %v336_v21, %v3869_v8 }
  0xd2   :  { %v570_v30 = vpop.f32.mrf.mxu3 }
  0xd3   :  { %v571_v34 = vadd.f32 %v570_v30, %v415_v18  ;;  %v285_v49 = vpop.f32.mrf.mxu0 }
  0xd4   :  { %v3877_v55 = vadd.f32 %v285_v49, %v3846_v38  ;;  %v3914_v6 = vpop.f32.mrf.mxu1 }
  0xd5   :  { %v607_v41 = vadd.f32 %v571_v34, %v303_v25  ;;  %v595_v25 = vmul.f32 %v3601_v63, %v594_v19  ;;  %v601_v34 = vand.u32 2147483647, %v3867_v23  ;;  %v2877_v19 = vld [vmem:[#allocation7 + $0xb0] sm:$0xf] }
  0xd6   :  { %v338_v35 = vpop.f32.mrf.mxu2 }
  0xd7   :  { %v2684_v54 = vmul.f32 -1.442695, %v607_v41  ;;  %v596_v30 = vadd.f32 %v3601_v63, %v595_v25  ;;  %v3894_v36 = vadd.f32 %v338_v35, %v3869_v8  ;;  %v332_v41 = vadd.f32 %v3859_v2, %v3869_v8  ;;  %v3467_v35 = vld [vmem:[#allocation7 + $0xa0] sm:$0xf0] }
  0xd8   :  { %vm602_vm3 = vcmp.eq.f32.partialorder %v601_v34, 8.507059e+37  ;;  %v2878_v25 = vor.u32 %v3470_v20, %v2877_v19  ;;  %v2865_v34 = vld [vmem:[#allocation7 + $0x98] sm:$0xf] }
  0xd9   :  { %3602 = vpow2.f32 %v2684_v54  ;;  %v600_v39 = vsel %vm599_vm2, %v3601_v63, %v596_v30  ;;  %v3466_v30 = vld [vmem:[#allocation7 + $0x98] sm:$0xf0] }
  0xda   :  { %v572_v0 = vpop.f32.mrf.mxu3  ;;  %v605_v37 = vsel %vm602_vm3, %v604_v40, %v600_v39  ;;  %1092 = vmatpush.bf16.msra.mxu2 %v2878_v25  ;;  %v2866_v39 = vor.u32 %v3467_v35, %v2865_v34  ;;  %v2845_v40 = vld [vmem:[#allocation7 + $0x78] sm:$0xf]  ;;  %v2829_v25 = vld [vmem:[#allocation7 + $0x50] sm:$0xf] }
  0xdb   :  { %v288_v12 = vpop.f32.mrf.mxu0 }
  0xdc   :  { %v3881_v16 = vadd.f32 %v288_v12, %v3846_v38  ;;  %v2869_v12 = vld [vmem:[#allocation7 + $0xa8] sm:$0xf] }
  0xde   :  { %v341_v50 = vpop.f32.mrf.mxu2  ;;  %1093 = vmatpush.bf16.msra.mxu2 %v2866_v39 }
  0xdf   :  { %v3603_v15 = vpop.eup %3602  ;;  %v3899_v52 = vadd.f32 %v341_v50, %v3869_v8 }
  0xe0   :  { %v611_v18 = vadd.f32 1.0, %v3603_v15  ;;  %v2870_v15 = vor.u32 %v3469_v13, %v2869_v12 }
  0xe2   :  { %3604 = vrcp.f32 %v611_v18  ;;  %vm617_vm4 = vweird.f32 %v611_v18  ;;  %v623_v23 = vand.u32 2147483648, %v611_v18  ;;  %v621_v47 = vand.u32 2147483647, %v611_v18  ;;  %1066 = vmatpush.bf16.msra.mxu0 %v2870_v15  ;;  %v3457_v15 = vld [vmem:[#allocation7 + $0x50] sm:$0xf0] }
  0xe3   :  { %v290_v26 = vpop.f32.mrf.mxu0 }
  0xe4   :  { %v3887_v27 = vadd.f32 %v290_v26, %v3846_v38  ;;  %v624_v53 = vor.u32 1.1754944e-38, %v623_v23  ;;  %vm622_vm7 = vcmp.eq.f32.partialorder %v621_v47, 8.507059e+37  ;;  %v3927_v26 = vld [vmem:[%s4074_s4] sm:$0x7]  ;;  %v3464_v23 = vld [vmem:[#allocation7 + $0x88] sm:$0xf0] }
  0xe5   :  { %v674_v13 = vperm.slane %v3927_v26, 1 }
  0xe6   :  { %v343_v59 = vpop.f32.mrf.mxu2 }
  0xe7   :  { %v3903_v62 = vadd.f32 %v343_v59, %v3869_v8  ;;  %v2835_v59 = vld [vmem:[#allocation7 + $0x6c] sm:$0xf0] }
  0xe8   :  { %v3605_v28 = vpop.eup %3604 }
  0xe9   :  { %v613_v29 = vmul.f32 %v3605_v28, %v611_v18  ;;  %vm618_vm5 = vweird.f32 %v3605_v28  ;;  %v2871_v18 = vld [vmem:[#allocation7 + $0xb4] sm:$0xf0] }
  0xea   :  { %vm619_vm6 = vmor %vm617_vm4, %vm618_vm5  ;;  %v2874_v21 = vor.u32 %v3468_v14, %v2871_v18  ;;  %v2821_v14 = vld [vmem:[#allocation7 + $0x48] sm:$0xf]  ;;  %v3456_v18 = vld [vmem:[#allocation7 + $0x4c] sm:$0xf] }
  0xeb   :  { %v614_v32 = vsub.f32 1.0, %v613_v29  ;;  %v583_v22 = vpop.f32.mrf.mxu0  ;;  %v2857_v29 = vld [vmem:[#allocation7 + $0x90] sm:$0xf]  ;;  %v2822_v20 = vor.u32 %v3457_v15, %v2821_v14  ;;  %v2793_v15 = vld [vmem:[#allocation7 + $0x8] sm:$0xf] }
  0xec   :  { %v584_v43 = vadd.f32 %v583_v22, %v416_v33  ;;  %1079 = vmatpush.bf16.msra.mxu1 %v2874_v21  ;;  %v2859_v33 = vld [vmem:[#allocation7 + $0x9c] sm:$0xf0]  ;;  %v673_v22 = vperm.slane %v3927_v26, 0  ;;  %v2823_v21 = vld [vmem:[#allocation7 + $0x54] sm:$0xf0] }
  0xed   :  { %v615_v38 = vmul.f32 %v3605_v28, %v614_v32  ;;  %v2858_v32 = vor.u32 %v3466_v30, %v2857_v29  ;;  %v305_v29 = vadd.f32 %v3912_v5, %v3861_v4  ;;  %v2797_v5 = vld [vmem:[#allocation7 + $0x18] sm:$0xf] }
  0xee   :  { %v627_v46 = vmul.f32 %v605_v37, %v584_v43  ;;  %v346_v1 = vpop.f32.mrf.mxu2  ;;  %v3462_v43 = vld [vmem:[#allocation7 + $0x7c] sm:$0xf] }
  0xef   :  { %v616_v45 = vadd.f32 %v3605_v28, %v615_v38  ;;  %v3910_v3 = vadd.f32 %v346_v1, %v3869_v8  ;;  %v2862_v38 = vor.u32 %v3465_v31, %v2859_v33  ;;  %1067 = vmatpush.bf16.msra.mxu0 %v2858_v32  ;;  %v2826_v31 = vor.u32 %v3456_v18, %v2823_v21  ;;  %v3458_v32 = vld [vmem:[#allocation7 + $0x58] sm:$0xf0]  ;;  %v2809_v33 = vld [vmem:[#allocation7 + $0x30] sm:$0xf]  ;;  %v3449_v18 = vld [vmem:[#allocation7 + $0x10] sm:$0xf0] }
  0xf0   :  { %v628_v49 = vadd.f32 %v627_v46, %v332_v41  ;;  %v3463_v41 = vld [vmem:[#allocation7 + $0x80] sm:$0xf0]  ;;  %v2853_v46 = vld [vmem:[#allocation7 + $0x80] sm:$0xf] }
  0xf1   :  { %v620_v51 = vsel %vm619_vm6, %v3605_v28, %v616_v45  ;;  %1080 = vmatpush.bf16.msra.mxu1 %v2862_v38  ;;  %v2846_v37 = vor.u32 %v3463_v41, %v2845_v40  ;;  %v2847_v45 = vld [vmem:[#allocation7 + $0x84] sm:$0xf0]  ;;  %v2854_v50 = vor.u32 %v3464_v23, %v2853_v46  ;;  %v2830_v38 = vor.u32 %v3458_v32, %v2829_v25  ;;  %v2811_v40 = vld [vmem:[#allocation7 + $0x3c] sm:$0xf0]  ;;  %v2817_v41 = vld [vmem:[#allocation7 + $0x38] sm:$0xf] }
  0xf2   :  { %3606 = vtanh.f32 %v628_v49  ;;  %v625_v2 = vsel %vm622_vm7, %v624_v53, %v620_v51  ;;  %v2850_v49 = vor.u32 %v3462_v43, %v2847_v45  ;;  %v2833_v53 = vld [vmem:[#allocation7 + $0x60] sm:$0xf]  ;;  %v3455_v45 = vld [vmem:[#allocation7 + $0x40] sm:$0xf0]  ;;  %v2794_v25 = vor.u32 %v3449_v18, %v2793_v15  ;;  %v2975_v15 = vld [vmem:[#allocation7 + $0xb0] sm:$0xf] }
  0xf3   :  { %v585_v54 = vpop.f32.mrf.mxu0  ;;  %v630_v56 = vsub.f32 1.0, %v625_v2  ;;  %v632_v61 = vmul.f32 %v625_v2, %v3817_v9  ;;  %v3916_v9 = vpop.f32.mrf.mxu1  ;;  %1068 = vmatpush.bf16.msra.mxu0 %v2846_v37  ;;  %1094 = vmatpush.bf16.msra.mxu2 %v2854_v50  ;;  %v3459_v2 = vld [vmem:[#allocation7 + $0x64] sm:$0xf]  ;;  %v3450_v50 = vld [vmem:[#allocation7 + $0x1c] sm:$0xf] }
  0xf4   :  { %v3460_v54 = vld [vmem:[#allocation7 + $0x68] sm:$0xf0]  ;;  %v3451_v46 = vld [vmem:[#allocation7 + $0x20] sm:$0xf0]  ;;  %v3494_v18 = vld [vmem:[#allocation7 + $0xb8] sm:$0xf0] }
  0xf5   :  { %1081 = vmatpush.bf16.msra.mxu1 %v2850_v49  ;;  %v2818_v49 = vor.u32 %v3455_v45, %v2817_v41 }
  0xf6   :  { %v3932_v47 = vpop.f32.mrf.mxu2 }
  0xf8   :  { %v3607_v58 = vpop.eup %3606 }
  0xf9   :  { %v631_v60 = vmul.f32 %v3607_v58, %v630_v56  ;;  %v2834_v58 = vor.u32 %v3460_v54, %v2833_v53  ;;  %v2805_v53 = vld [vmem:[#allocation7 + $0x20] sm:$0xf]  ;;  %v3452_v54 = vld [vmem:[#allocation7 + $0x28] sm:$0xf0] }
  0xfb   :  { %v3905_v63 = vadd.f32 %v632_v61, %v631_v60  ;;  %v3918_v7 = vpop.f32.mrf.mxu1  ;;  %v2841_v60 = vld [vmem:[#allocation7 + $0x68] sm:$0xf]  ;;  %v3461_v61 = vld [vmem:[#allocation7 + $0x70] sm:$0xf0]  ;;  %1069 = vmatpush.bf16.msra.mxu0 %v2834_v58 }
  0xfc   :  { %v2842_v1 = vor.u32 %v3461_v61, %v2841_v60  ;;  %v3448_v60 = vld [vmem:[#allocation7 + $0x8] sm:$0xf0] }
  0xfd   :  { %v634_v0 = vpack.c.bf16 %v3905_v63, %v3905_v63 }
  0xfe   :  { %1095 = vmatpush.bf16.msra.mxu2 %v2842_v1  ;;  %v3447_v1 = vld [vmem:[#allocation7 + $0x4] sm:$0xf] }
  0xff   :  { %635 = vst [vmem:[#allocation9] sm:$0xf] %v634_v0  ;;  %815 = vmatmul.bf16.vlgmr.msrb.gmra.mxu1 %v634_v0  ;;  %828 = vmatmul.bf16.vlgmr.msrb.gmra.mxu2 %v634_v0 }
 0x100   :  { %841 = vmatmul.bf16.vlgmr.msra.gmra.mxu3 %v634_v0  ;;  %v2838_v0 = vor.u32 %v3459_v2, %v2835_v59  ;;  %1070 = vmatpush.bf16.msra.mxu0 %v2822_v20  ;;  %v2785_v59 = vld [vmem:[#allocation7] sm:$0xf] }
 0x101   :  { %v2786_v20 = vor.u32 %v3448_v60, %v2785_v59 }
 0x102   :  { %1082 = vmatpush.bf16.msra.mxu1 %v2838_v0  ;;  %1096 = vmatpush.bf16.msra.mxu2 %v2830_v38  ;;  %v2806_v0 = vor.u32 %v3452_v54, %v2805_v53 }
 0x103   :  { %v3920_v10 = vpop.f32.mrf.mxu1 }
 0x106   :  { %1083 = vmatpush.bf16.msra.mxu1 %v2826_v31  ;;  %1097 = vmatpush.bf16.msra.mxu2 %v2818_v49 }
 0x10a   :  { %1098 = vmatpush.bf16.msra.mxu2 %v2806_v0 }
 0x10b   :  { %v3922_v11 = vpop.f32.mrf.mxu1 }
 0x10e   :  { %1099 = vmatpush.bf16.msra.mxu2 %v2794_v25  ;;  %v3490_v25 = vld [vmem:[#allocation7 + $0x98] sm:$0xf0] }
 0x113   :  { %v3929_v28 = vpop.f32.mrf.mxu1 }
 0x17c   :  { %v816_v51 = vpop.f32.mrf.mxu1 }
 0x17d   :  { %v817_v56 = vadd.f32 %v816_v51, %v673_v22  ;;  %v3453_v22 = vld [vmem:[#allocation7 + $0x34] sm:$0xf]  ;;  %v2799_v51 = vld [vmem:[#allocation7 + $0x24] sm:$0xf0] }
 0x17e   :  { %v2814_v37 = vor.u32 %v3453_v22, %v2811_v40  ;;  %v2802_v58 = vor.u32 %v3450_v50, %v2799_v51 }
 0x17f   :  { %v846_v12 = vadd.f32 %v817_v56, %v3850_v42  ;;  %v3454_v42 = vld [vmem:[#allocation7 + $0x38] sm:$0xf0]  ;;  %v2798_v56 = vor.u32 %v3451_v46, %v2797_v5 }
 0x180   :  { %v2810_v39 = vor.u32 %v3454_v42, %v2809_v33  ;;  %1084 = vmatpush.bf16.msra.mxu1 %v2814_v37 }
 0x181   :  { %v2781_v19 = vmul.f32 -1.442695, %v846_v12  ;;  %v2787_v12 = vld [vmem:[#allocation7 + $0xc] sm:$0xf0] }
 0x182   :  { %v829_v30 = vpop.f32.mrf.mxu2  ;;  %1071 = vmatpush.bf16.msra.mxu0 %v2810_v39  ;;  %v2790_v21 = vor.u32 %v3447_v1, %v2787_v12  ;;  %v3493_v1 = vld [vmem:[#allocation7 + $0xb0] sm:$0xf0]  ;;  %v3492_v12 = vld [vmem:[#allocation7 + $0xac] sm:$0xf] }
 0x183   :  { %3608 = vpow2.f32 %v2781_v19  ;;  %v830_v34 = vadd.f32 %v829_v30, %v674_v13  ;;  %v3938_v35 = vpop.f32.mrf.mxu3 }
 0x184   :  { %v818_v43 = vpop.f32.mrf.mxu1  ;;  %1085 = vmatpush.bf16.msra.mxu1 %v2802_v58 }
 0x185   :  { %v866_v23 = vadd.f32 %v830_v34, %v305_v29  ;;  %v675_v34 = vperm.slane %v3927_v26, 2 }
 0x186   :  { %1072 = vmatpush.bf16.msra.mxu0 %v2798_v56 }
 0x187   :  { %v2782_v2 = vmul.f32 -1.442695, %v866_v23  ;;  %v843_v45 = vadd.f32 %v3938_v35, %v675_v34 }
 0x188   :  { %1086 = vmatpush.bf16.msra.mxu1 %v2790_v21  ;;  %v2955_v21 = vld [vmem:[#allocation7 + $0x90] sm:$0xf] }
 0x189   :  { %v3609_v61 = vpop.eup %3608  ;;  %3610 = vpow2.f32 %v2782_v2 }
 0x18a   :  { %v850_v13 = vadd.f32 1.0, %v3609_v61  ;;  %v831_v14 = vpop.f32.mrf.mxu2  ;;  %1073 = vmatpush.bf16.msra.mxu0 %v2786_v20  ;;  %v2976_v20 = vor.u32 %v3494_v18, %v2975_v15  ;;  %v3480_v15 = vld [vmem:[#allocation7 + $0x4c] sm:$0xf] }
 0x18b   :  { %v844_v19 = vpop.f32.mrf.mxu3  ;;  %v2969_v14 = vld [vmem:[#allocation7 + $0xb4] sm:$0xf0] }
 0x18c   :  { %3612 = vrcp.f32 %v850_v13  ;;  %v862_v42 = vand.u32 2147483648, %v850_v13  ;;  %v860_v39 = vand.u32 2147483647, %v850_v13  ;;  %vm856_vm9 = vweird.f32 %v850_v13  ;;  %1351 = vmatpush.bf16.msrb.mxu1 %v2976_v20  ;;  %v2921_v20 = vld [vmem:[#allocation7 + $0x54] sm:$0xf0] }
 0x18d   :  { %v2972_v19 = vor.u32 %v3492_v12, %v2969_v14  ;;  %v3481_v14 = vld [vmem:[#allocation7 + $0x50] sm:$0xf0] }
 0x18e   :  { %v863_v43 = vor.u32 1.1754944e-38, %v862_v42  ;;  %vm861_vm11 = vcmp.eq.f32.partialorder %v860_v39, 8.507059e+37 }
 0x18f   :  { %v3611_v29 = vpop.eup %3610  ;;  %1338 = vmatpush.bf16.msrb.mxu0 %v2972_v19 }
 0x190   :  { %v870_v30 = vadd.f32 1.0, %v3611_v29  ;;  %v3489_v29 = vld [vmem:[#allocation7 + $0x94] sm:$0xf] }
 0x192   :  { %v3613_v31 = vpop.eup %3612  ;;  %3614 = vrcp.f32 %v870_v30  ;;  %v882_v50 = vand.u32 2147483648, %v870_v30  ;;  %v880_v26 = vand.u32 2147483647, %v870_v30  ;;  %vm876_vm13 = vweird.f32 %v870_v30 }
 0x193   :  { %v852_v32 = vmul.f32 %v3613_v31, %v850_v13  ;;  %vm857_vm8 = vweird.f32 %v3613_v31 }
 0x194   :  { %vm858_vm10 = vmor %vm856_vm9, %vm857_vm8  ;;  %v883_v2 = vor.u32 1.1754944e-38, %v882_v50  ;;  %vm881_vm15 = vcmp.eq.f32.partialorder %v880_v26, 8.507059e+37  ;;  %v2931_v26 = vld [vmem:[#allocation7 + $0x60] sm:$0xf] }
 0x195   :  { %v853_v33 = vsub.f32 1.0, %v852_v32  ;;  %v2963_v32 = vld [vmem:[#allocation7 + $0x98] sm:$0xf] }
 0x197   :  { %v854_v38 = vmul.f32 %v3613_v31, %v853_v33  ;;  %v3491_v33 = vld [vmem:[#allocation7 + $0xa0] sm:$0xf0] }
 0x198   :  { %v3615_v22 = vpop.eup %3614  ;;  %v2964_v34 = vor.u32 %v3491_v33, %v2963_v32  ;;  %v3478_v32 = vld [vmem:[#allocation7 + $0x38] sm:$0xf0]  ;;  %v3477_v33 = vld [vmem:[#allocation7 + $0x34] sm:$0xf] }
 0x199   :  { %v872_v40 = vmul.f32 %v3615_v22, %v870_v30  ;;  %v855_v41 = vadd.f32 %v3613_v31, %v854_v38  ;;  %vm877_vm12 = vweird.f32 %v3615_v22  ;;  %v2956_v30 = vor.u32 %v3490_v25, %v2955_v21  ;;  %v2927_v25 = vld [vmem:[#allocation7 + $0x50] sm:$0xf] }
 0x19a   :  { %vm878_vm14 = vmor %vm876_vm13, %vm877_vm12  ;;  %1352 = vmatpush.bf16.msrb.mxu1 %v2964_v34  ;;  %v2924_v21 = vor.u32 %v3480_v15, %v2921_v20 }
 0x19b   :  { %v873_v37 = vsub.f32 1.0, %v872_v40  ;;  %v859_v5 = vsel %vm858_vm10, %v3613_v31, %v855_v41  ;;  %v2957_v31 = vld [vmem:[#allocation7 + $0x9c] sm:$0xf0]  ;;  %v3487_v40 = vld [vmem:[#allocation7 + $0x80] sm:$0xf0] }
 0x19c   :  { %v864_v46 = vsel %vm861_vm11, %v863_v43, %v859_v5  ;;  %v2960_v42 = vor.u32 %v3489_v29, %v2957_v31  ;;  %v3486_v41 = vld [vmem:[#allocation7 + $0x7c] sm:$0xf]  ;;  %v3488_v5 = vld [vmem:[#allocation7 + $0x88] sm:$0xf0] }
 0x19d   :  { %v874_v23 = vmul.f32 %v3615_v22, %v873_v37  ;;  %v886_v49 = vmul.f32 %v864_v46, %v843_v45  ;;  %v2945_v37 = vld [vmem:[#allocation7 + $0x84] sm:$0xf0]  ;;  %v2951_v45 = vld [vmem:[#allocation7 + $0x80] sm:$0xf]  ;;  %v3482_v29 = vld [vmem:[#allocation7 + $0x58] sm:$0xf0] }
 0x19e   :  { %1339 = vmatpush.bf16.msrb.mxu0 %v2960_v42  ;;  %v2948_v46 = vor.u32 %v3486_v41, %v2945_v37  ;;  %v2909_v42 = vld [vmem:[#allocation7 + $0x3c] sm:$0xf0]  ;;  %v3479_v41 = vld [vmem:[#allocation7 + $0x40] sm:$0xf0] }
 0x19f   :  { %v887_v51 = vadd.f32 %v886_v49, %v3874_v44  ;;  %v875_v53 = vadd.f32 %v3615_v22, %v874_v23  ;;  %v2967_v44 = vld [vmem:[#allocation7 + $0xa8] sm:$0xf]  ;;  %v2952_v23 = vor.u32 %v3488_v5, %v2951_v45  ;;  %v3475_v45 = vld [vmem:[#allocation7 + $0x20] sm:$0xf0]  ;;  %v3474_v5 = vld [vmem:[#allocation7 + $0x1c] sm:$0xf] }
 0x1a0   :  { %v2968_v13 = vor.u32 %v3493_v1, %v2967_v44 }
 0x1a1   :  { %3616 = vtanh.f32 %v887_v51  ;;  %v879_v54 = vsel %vm878_vm14, %v3615_v22, %v875_v53  ;;  %v2943_v22 = vld [vmem:[#allocation7 + $0x78] sm:$0xf]  ;;  %1353 = vmatpush.bf16.msrb.mxu1 %v2952_v23  ;;  %v3484_v51 = vld [vmem:[#allocation7 + $0x68] sm:$0xf0]  ;;  %v3483_v53 = vld [vmem:[#allocation7 + $0x64] sm:$0xf] }
 0x1a2   :  { %v884_v56 = vsel %vm881_vm15, %v883_v2, %v879_v54  ;;  %1325 = vmatpush.bf16.msrb.mxu3 %v2968_v13  ;;  %v2944_v43 = vor.u32 %v3487_v40, %v2943_v22  ;;  %1340 = vmatpush.bf16.msrb.mxu0 %v2948_v46  ;;  %v308_v54 = vadd.f32 %v3914_v6, %v3861_v4  ;;  %v2919_v13 = vld [vmem:[#allocation7 + $0x48] sm:$0xf]  ;;  %v2915_v40 = vld [vmem:[#allocation7 + $0x38] sm:$0xf]  ;;  %v2903_v23 = vld [vmem:[#allocation7 + $0x20] sm:$0xf] }
 0x1a3   :  { %v889_v58 = vsub.f32 1.0, %v884_v56  ;;  %v891_v60 = vmul.f32 %v884_v56, %v3905_v63  ;;  %v3951_v63 = vld [vmem:[%s4074_s4] sm:$0x7]  ;;  %v2920_v6 = vor.u32 %v3481_v14, %v2919_v13  ;;  %v2912_v22 = vor.u32 %v3477_v33, %v2909_v42  ;;  %v2897_v46 = vld [vmem:[#allocation7 + $0x24] sm:$0xf0] }
 0x1a4   :  { %v932_v38 = vperm.slane %v3951_v63, 0  ;;  %v933_v39 = vperm.slane %v3951_v63, 1  ;;  %v2916_v37 = vor.u32 %v3479_v41, %v2915_v40 }
 0x1a6   :  { %1326 = vmatpush.bf16.msrb.mxu3 %v2956_v30  ;;  %v2907_v30 = vld [vmem:[#allocation7 + $0x30] sm:$0xf] }
 0x1a7   :  { %v3617_v35 = vpop.eup %3616 }
 0x1a8   :  { %v890_v59 = vmul.f32 %v3617_v35, %v889_v58  ;;  %v2932_v58 = vor.u32 %v3484_v51, %v2931_v26  ;;  %v2933_v35 = vld [vmem:[#allocation7 + $0x6c] sm:$0xf0]  ;;  %v2900_v26 = vor.u32 %v3474_v5, %v2897_v46  ;;  %v2883_v51 = vld [vmem:[#allocation7] sm:$0xf] }
 0x1aa   :  { %v3944_v61 = vadd.f32 %v891_v60, %v890_v59  ;;  %1327 = vmatpush.bf16.msrb.mxu3 %v2944_v43  ;;  %v2939_v59 = vld [vmem:[#allocation7 + $0x68] sm:$0xf]  ;;  %v3485_v60 = vld [vmem:[#allocation7 + $0x70] sm:$0xf0]  ;;  %v2895_v43 = vld [vmem:[#allocation7 + $0x18] sm:$0xf] }
 0x1ab   :  { %v2940_v44 = vor.u32 %v3485_v60, %v2939_v59  ;;  %v2891_v60 = vld [vmem:[#allocation7 + $0x8] sm:$0xf] }
 0x1ac   :  { %v893_v0 = vpack.c.bf16 %v3944_v61, %v3944_v61 }
 0x1ad   :  { %1354 = vmatpush.bf16.msrb.mxu1 %v2940_v44 }
 0x1ae   :  { %894 = vst [vmem:[#allocation9 + $0x4] sm:$0xf] %v893_v0  ;;  %1074 = vmatmul.bf16.vlgmr.msra.gmra.mxu0 %v893_v0  ;;  %1087 = vmatmul.bf16.vlgmr.msra.gmra.mxu1 %v893_v0 }
 0x1af   :  { %1100 = vmatmul.bf16.vlgmr.msra.gmra.mxu2 %v893_v0  ;;  %v2936_v0 = vor.u32 %v3483_v53, %v2933_v35  ;;  %1328 = vmatpush.bf16.msrb.mxu3 %v2932_v58  ;;  %v3472_v53 = vld [vmem:[#allocation7 + $0x8] sm:$0xf0]  ;;  %v2885_v58 = vld [vmem:[#allocation7 + $0xc] sm:$0xf0] }
 0x1b1   :  { %1341 = vmatpush.bf16.msrb.mxu0 %v2936_v0  ;;  %v3473_v0 = vld [vmem:[#allocation7 + $0x10] sm:$0xf0] }
 0x1b2   :  { %v2892_v14 = vor.u32 %v3473_v0, %v2891_v60  ;;  %v3053_v0 = vld [vmem:[#allocation7 + $0x90] sm:$0xf] }
 0x1b3   :  { %1329 = vmatpush.bf16.msrb.mxu3 %v2920_v6 }
 0x1b5   :  { %1342 = vmatpush.bf16.msrb.mxu0 %v2924_v21 }
 0x1b9   :  { %1343 = vmatpush.bf16.msrb.mxu0 %v2912_v22 }
 0x1bd   :  { %1344 = vmatpush.bf16.msrb.mxu0 %v2900_v26 }
 0x22b   :  { %v1075_v49 = vpop.f32.mrf.mxu0  ;;  %v1088_v50 = vpop.f32.mrf.mxu1 }
 0x22c   :  { %v1076_v2 = vadd.f32 %v1075_v49, %v932_v38  ;;  %v1089_v56 = vadd.f32 %v1088_v50, %v933_v39  ;;  %v2908_v39 = vor.u32 %v3478_v32, %v2907_v30  ;;  %v3476_v49 = vld [vmem:[#allocation7 + $0x28] sm:$0xf0]  ;;  %v2896_v50 = vor.u32 %v3475_v45, %v2895_v43 }
 0x22e   :  { %v1105_v1 = vadd.f32 %v1076_v2, %v3854_v48  ;;  %v1125_v12 = vadd.f32 %v1089_v56, %v308_v54  ;;  %v2928_v48 = vor.u32 %v3482_v29, %v2927_v25  ;;  %1330 = vmatpush.bf16.msrb.mxu3 %v2908_v39  ;;  %v2904_v2 = vor.u32 %v3476_v49, %v2903_v23  ;;  %v3471_v56 = vld [vmem:[#allocation7 + $0x4] sm:$0xf] }
 0x22f   :  { %v2888_v13 = vor.u32 %v3471_v56, %v2885_v58  ;;  %v934_v29 = vperm.slane %v3951_v63, 2  ;;  %v3067_v56 = vld [vmem:[#allocation7 + $0xb4] sm:$0xf0]  ;;  %v3518_v58 = vld [vmem:[#allocation7 + $0xb8] sm:$0xf0] }
 0x230   :  { %v2879_v18 = vmul.f32 -1.442695, %v1105_v1  ;;  %v2880_v19 = vmul.f32 -1.442695, %v1125_v12  ;;  %1355 = vmatpush.bf16.msrb.mxu1 %v2928_v48  ;;  %v2884_v12 = vor.u32 %v3472_v53, %v2883_v51  ;;  %v3065_v51 = vld [vmem:[#allocation7 + $0xa8] sm:$0xf] }
 0x231   :  { %1345 = vmatpush.bf16.msrb.mxu0 %v2888_v13  ;;  %v3517_v53 = vld [vmem:[#allocation7 + $0xb0] sm:$0xf0]  ;;  %v3055_v13 = vld [vmem:[#allocation7 + $0x9c] sm:$0xf0] }
 0x232   :  { %3618 = vpow2.f32 %v2879_v18  ;;  %v3958_v31 = vpop.f32.mrf.mxu2  ;;  %1331 = vmatpush.bf16.msrb.mxu3 %v2896_v50 }
 0x233   :  { %3620 = vpow2.f32 %v2880_v19  ;;  %v1077_v34 = vpop.f32.mrf.mxu0  ;;  %v1090_v38 = vpop.f32.mrf.mxu1 }
 0x234   :  { %1356 = vmatpush.bf16.msrb.mxu1 %v2916_v37  ;;  %v1102_v34 = vadd.f32 %v3958_v31, %v934_v29 }
 0x236   :  { %1332 = vmatpush.bf16.msrb.mxu3 %v2884_v12 }
 0x238   :  { %v3619_v54 = vpop.eup %3618  ;;  %1357 = vmatpush.bf16.msrb.mxu1 %v2904_v2  ;;  %v3066_v2 = vor.u32 %v3517_v53, %v3065_v51  ;;  %v3017_v53 = vld [vmem:[#allocation7 + $0x48] sm:$0xf] }
 0x239   :  { %v3621_v35 = vpop.eup %3620  ;;  %v1109_v59 = vadd.f32 1.0, %v3619_v54  ;;  %v3516_v54 = vld [vmem:[#allocation7 + $0xac] sm:$0xf] }
 0x23a   :  { %v1129_v44 = vadd.f32 1.0, %v3621_v35  ;;  %v1103_v1 = vpop.f32.mrf.mxu2  ;;  %v3070_v35 = vor.u32 %v3516_v54, %v3067_v56  ;;  %1584 = vmatpush.bf16.msrb.mxu2 %v3066_v2  ;;  %v3505_v54 = vld [vmem:[#allocation7 + $0x50] sm:$0xf0]  ;;  %v3504_v2 = vld [vmem:[#allocation7 + $0x4c] sm:$0xf] }
 0x23b   :  { %3622 = vrcp.f32 %v1109_v59  ;;  %v1121_v25 = vand.u32 2147483648, %v1109_v59  ;;  %v1119_v48 = vand.u32 2147483647, %v1109_v59  ;;  %vm1115_vm1 = vweird.f32 %v1109_v59  ;;  %v3513_v1 = vld [vmem:[#allocation7 + $0x94] sm:$0xf] }
 0x23c   :  { %3624 = vrcp.f32 %v1129_v44  ;;  %1358 = vmatpush.bf16.msrb.mxu1 %v2892_v14  ;;  %v1141_v41 = vand.u32 2147483648, %v1129_v44  ;;  %vm1135_vm5 = vweird.f32 %v1129_v44  ;;  %v1139_v43 = vand.u32 2147483647, %v1129_v44  ;;  %1597 = vmatpush.bf16.msra.mxu3 %v3070_v35  ;;  %v3061_v14 = vld [vmem:[#allocation7 + $0x98] sm:$0xf] }
 0x23d   :  { %v1122_v42 = vor.u32 1.1754944e-38, %v1121_v25  ;;  %vm1120_vm3 = vcmp.eq.f32.partialorder %v1119_v48, 8.507059e+37  ;;  %v3511_v48 = vld [vmem:[#allocation7 + $0x80] sm:$0xf0]  ;;  %v3019_v35 = vld [vmem:[#allocation7 + $0x54] sm:$0xf0] }
 0x23e   :  { %v1142_v45 = vor.u32 1.1754944e-38, %v1141_v41  ;;  %vm1140_vm7 = vcmp.eq.f32.partialorder %v1139_v43, 8.507059e+37  ;;  %v3029_v43 = vld [vmem:[#allocation7 + $0x60] sm:$0xf] }
 0x241   :  { %v3623_v15 = vpop.eup %3622 }
 0x242   :  { %v3625_v18 = vpop.eup %3624  ;;  %v1111_v19 = vmul.f32 %v3623_v15, %v1109_v59  ;;  %vm1116_vm0 = vweird.f32 %v3623_v15 }
 0x243   :  { %v1131_v6 = vmul.f32 %v3625_v18, %v1129_v44  ;;  %vm1117_vm2 = vmor %vm1115_vm1, %vm1116_vm0  ;;  %vm1136_vm4 = vweird.f32 %v3625_v18  ;;  %v3514_v44 = vld [vmem:[#allocation7 + $0x98] sm:$0xf0] }
 0x244   :  { %v1112_v20 = vsub.f32 1.0, %v1111_v19  ;;  %vm1137_vm6 = vmor %vm1135_vm5, %vm1136_vm4  ;;  %v3054_v12 = vor.u32 %v3514_v44, %v3053_v0  ;;  %v3058_v19 = vor.u32 %v3513_v1, %v3055_v13  ;;  %v3022_v0 = vor.u32 %v3504_v2, %v3019_v35  ;;  %v3005_v1 = vld [vmem:[#allocation7 + $0x30] sm:$0xf]  ;;  %v3501_v13 = vld [vmem:[#allocation7 + $0x34] sm:$0xf] }
 0x245   :  { %v1132_v21 = vsub.f32 1.0, %v1131_v6 }
 0x246   :  { %v1113_v30 = vmul.f32 %v3623_v15, %v1112_v20  ;;  %v310_v20 = vadd.f32 %v3916_v9, %v3861_v4  ;;  %1585 = vmatpush.bf16.msrb.mxu2 %v3054_v12  ;;  %1598 = vmatpush.bf16.msra.mxu3 %v3058_v19  ;;  %v3502_v12 = vld [vmem:[#allocation7 + $0x38] sm:$0xf0]  ;;  %v3503_v19 = vld [vmem:[#allocation7 + $0x40] sm:$0xf0] }
 0x247   :  { %v1133_v32 = vmul.f32 %v3625_v18, %v1132_v21 }
 0x248   :  { %v1114_v33 = vadd.f32 %v3623_v15, %v1113_v30  ;;  %v3041_v30 = vld [vmem:[#allocation7 + $0x78] sm:$0xf] }
 0x249   :  { %v1134_v22 = vadd.f32 %v3625_v18, %v1133_v32  ;;  %v3510_v32 = vld [vmem:[#allocation7 + $0x7c] sm:$0xf] }
 0x24a   :  { %v1118_v38 = vsel %vm1117_vm2, %v3623_v15, %v1114_v33  ;;  %v3515_v15 = vld [vmem:[#allocation7 + $0xa0] sm:$0xf0] }
 0x24b   :  { %v1123_v39 = vsel %vm1120_vm3, %v1122_v42, %v1118_v38  ;;  %v1138_v37 = vsel %vm1137_vm6, %v3625_v18, %v1134_v22  ;;  %v3062_v6 = vor.u32 %v3515_v15, %v3061_v14  ;;  %v3042_v42 = vor.u32 %v3511_v48, %v3041_v30  ;;  %v3049_v38 = vld [vmem:[#allocation7 + $0x80] sm:$0xf] }
 0x24c   :  { %v1145_v40 = vmul.f32 %v1123_v39, %v1102_v34  ;;  %v1143_v5 = vsel %vm1140_vm7, %v1142_v45, %v1138_v37  ;;  %v3043_v34 = vld [vmem:[#allocation7 + $0x84] sm:$0xf0]  ;;  %v3512_v39 = vld [vmem:[#allocation7 + $0x88] sm:$0xf0]  ;;  %v3507_v37 = vld [vmem:[#allocation7 + $0x64] sm:$0xf] }
 0x24d   :  { %v1148_v46 = vsub.f32 1.0, %v1143_v5  ;;  %v1150_v49 = vmul.f32 %v1143_v5, %v3944_v61  ;;  %v3073_v61 = vld [vmem:[#allocation7 + $0xb0] sm:$0xf]  ;;  %v3046_v22 = vor.u32 %v3510_v32, %v3043_v34  ;;  %1586 = vmatpush.bf16.msrb.mxu2 %v3042_v42  ;;  %v3007_v15 = vld [vmem:[#allocation7 + $0x3c] sm:$0xf0] }
 0x24e   :  { %v1146_v63 = vadd.f32 %v1145_v40, %v3884_v24  ;;  %v3971_v24 = vld [vmem:[%s4074_s4] sm:$0x7]  ;;  %v3074_v59 = vor.u32 %v3518_v58, %v3073_v61  ;;  %v3050_v40 = vor.u32 %v3512_v39, %v3049_v38  ;;  %v3018_v58 = vor.u32 %v3505_v54, %v3017_v53  ;;  %v3499_v32 = vld [vmem:[#allocation7 + $0x20] sm:$0xf0]  ;;  %v2995_v42 = vld [vmem:[#allocation7 + $0x24] sm:$0xf0] }
 0x24f   :  { %v1192_v60 = vperm.slane %v3971_v24, 1  ;;  %v1191_v29 = vperm.slane %v3971_v24, 0  ;;  %1599 = vmatpush.bf16.msra.mxu3 %v3046_v22  ;;  %v3010_v30 = vor.u32 %v3501_v13, %v3007_v15  ;;  %v3001_v34 = vld [vmem:[#allocation7 + $0x20] sm:$0xf]  ;;  %v3500_v38 = vld [vmem:[#allocation7 + $0x28] sm:$0xf0] }
 0x250   :  { %3626 = vtanh.f32 %v1146_v63  ;;  %1610 = vmatpush.bf16.msra.mxu0 %v3074_v59  ;;  %v3508_v63 = vld [vmem:[#allocation7 + $0x68] sm:$0xf0]  ;;  %v3025_v59 = vld [vmem:[#allocation7 + $0x50] sm:$0xf] }
 0x251   :  { %v3030_v5 = vor.u32 %v3508_v63, %v3029_v43  ;;  %v3495_v43 = vld [vmem:[#allocation7 + $0x4] sm:$0xf] }
 0x253   :  { %1587 = vmatpush.bf16.msrb.mxu2 %v3030_v5  ;;  %v3497_v5 = vld [vmem:[#allocation7 + $0x10] sm:$0xf0] }
 0x254   :  { %1611 = vmatpush.bf16.msra.mxu0 %v3062_v6 }
 0x256   :  { %v3627_v23 = vpop.eup %3626 }
 0x257   :  { %v1149_v31 = vmul.f32 %v3627_v23, %v1148_v46  ;;  %v3031_v46 = vld [vmem:[#allocation7 + $0x6c] sm:$0xf0]  ;;  %v3037_v23 = vld [vmem:[#allocation7 + $0x68] sm:$0xf]  ;;  %1588 = vmatpush.bf16.msrb.mxu2 %v3018_v58  ;;  %v1193_v58 = vperm.slane %v3971_v24, 2 }
 0x258   :  { %1612 = vmatpush.bf16.msra.mxu0 %v3050_v40  ;;  %v3002_v40 = vor.u32 %v3500_v38, %v3001_v34  ;;  %v3165_v38 = vld [vmem:[#allocation7 + $0xb4] sm:$0xf0] }
 0x259   :  { %v3964_v50 = vadd.f32 %v1150_v49, %v1149_v31  ;;  %v3509_v31 = vld [vmem:[#allocation7 + $0x70] sm:$0xf0] }
 0x25a   :  { %v3038_v51 = vor.u32 %v3509_v31, %v3037_v23 }
 0x25b   :  { %v1152_v26 = vpack.c.bf16 %v3964_v50, %v3964_v50 }
 0x25c   :  { %1613 = vmatpush.bf16.msra.mxu0 %v3038_v51 }
 0x25d   :  { %1153 = vst [vmem:[#allocation9 + $0x8] sm:$0xf] %v1152_v26  ;;  %1333 = vmatmul.bf16.vlgmr.msrb.gmra.mxu3 %v1152_v26  ;;  %1346 = vmatmul.bf16.vlgmr.msrb.gmra.mxu0 %v1152_v26 }
 0x25e   :  { %1359 = vmatmul.bf16.vlgmr.msrb.gmra.mxu1 %v1152_v26  ;;  %v3034_v26 = vor.u32 %v3507_v37, %v3031_v46  ;;  %v2983_v37 = vld [vmem:[#allocation7 + $0xc] sm:$0xf0] }
 0x25f   :  { %v2986_v31 = vor.u32 %v3495_v43, %v2983_v37  ;;  %v3537_v43 = vld [vmem:[#allocation7 + $0x94] sm:$0xf]  ;;  %v3153_v37 = vld [vmem:[#allocation7 + $0x9c] sm:$0xf0] }
 0x260   :  { %1600 = vmatpush.bf16.msra.mxu3 %v3034_v26 }
 0x264   :  { %1601 = vmatpush.bf16.msra.mxu3 %v3022_v0 }
 0x268   :  { %1602 = vmatpush.bf16.msra.mxu3 %v3010_v30 }
 0x2da   :  { %v1347_v18 = vpop.f32.mrf.mxu0 }
 0x2db   :  { %v1348_v21 = vadd.f32 %v1347_v18, %v1192_v60  ;;  %v3976_v25 = vpop.f32.mrf.mxu1  ;;  %v3506_v60 = vld [vmem:[#allocation7 + $0x58] sm:$0xf0]  ;;  %v3013_v18 = vld [vmem:[#allocation7 + $0x38] sm:$0xf] }
 0x2dc   :  { %v3026_v44 = vor.u32 %v3506_v60, %v3025_v59  ;;  %v3014_v48 = vor.u32 %v3503_v19, %v3013_v18 }
 0x2dd   :  { %v1384_v33 = vadd.f32 %v1348_v21, %v310_v20  ;;  %v2993_v20 = vld [vmem:[#allocation7 + $0x18] sm:$0xf] }
 0x2de   :  { %1614 = vmatpush.bf16.msra.mxu0 %v3026_v44  ;;  %v2994_v39 = vor.u32 %v3499_v32, %v2993_v20 }
 0x2df   :  { %v2978_v41 = vmul.f32 -1.442695, %v1384_v33  ;;  %v3498_v33 = vld [vmem:[#allocation7 + $0x1c] sm:$0xf] }
 0x2e0   :  { %v1334_v9 = vpop.f32.mrf.mxu3  ;;  %v2998_v22 = vor.u32 %v3498_v33, %v2995_v42  ;;  %v3540_v42 = vld [vmem:[#allocation7 + $0xac] sm:$0xf] }
 0x2e1   :  { %3628 = vpow2.f32 %v2978_v41  ;;  %v1335_v45 = vadd.f32 %v1334_v9, %v1191_v29  ;;  %v2981_v41 = vld [vmem:[#allocation7] sm:$0xf]  ;;  %v3496_v9 = vld [vmem:[#allocation7 + $0x8] sm:$0xf0] }
 0x2e2   :  { %v1349_v49 = vpop.f32.mrf.mxu0  ;;  %1615 = vmatpush.bf16.msra.mxu0 %v3014_v48  ;;  %v2982_v23 = vor.u32 %v3496_v9, %v2981_v41  ;;  %1603 = vmatpush.bf16.msra.mxu3 %v2998_v22  ;;  %v3542_v22 = vld [vmem:[#allocation7 + $0xb8] sm:$0xf0] }
 0x2e3   :  { %v1364_v56 = vadd.f32 %v1335_v45, %v3857_v57  ;;  %v1362_v61 = vpop.f32.mrf.mxu1  ;;  %v3006_v57 = vor.u32 %v3502_v12, %v3005_v1  ;;  %v2989_v45 = vld [vmem:[#allocation7 + $0x8] sm:$0xf]  ;;  %v1361_v1 = vadd.f32 %v3976_v25, %v1193_v58  ;;  %v3538_v9 = vld [vmem:[#allocation7 + $0x98] sm:$0xf0]  ;;  %v3147_v58 = vld [vmem:[#allocation7 + $0x80] sm:$0xf] }
 0x2e4   :  { %v2990_v49 = vor.u32 %v3497_v5, %v2989_v45  ;;  %v3159_v45 = vld [vmem:[#allocation7 + $0x98] sm:$0xf]  ;;  %v3539_v5 = vld [vmem:[#allocation7 + $0xa0] sm:$0xf0] }
 0x2e5   :  { %v2977_v14 = vmul.f32 -1.442695, %v1364_v56  ;;  %1589 = vmatpush.bf16.msrb.mxu2 %v3006_v57 }
 0x2e6   :  { %1616 = vmatpush.bf16.msra.mxu0 %v3002_v40  ;;  %1604 = vmatpush.bf16.msra.mxu3 %v2986_v31  ;;  %v3168_v40 = vor.u32 %v3540_v42, %v3165_v38  ;;  %v3160_v31 = vor.u32 %v3539_v5, %v3159_v45  ;;  %v3123_v38 = vld [vmem:[#allocation7 + $0x50] sm:$0xf]  ;;  %v3527_v45 = vld [vmem:[#allocation7 + $0x40] sm:$0xf0] }
 0x2e7   :  { %v3629_v6 = vpop.eup %3628  ;;  %3630 = vpow2.f32 %v2977_v14 }
 0x2e8   :  { %v3980_v21 = vadd.f32 1.0, %v3629_v6  ;;  %v1336_v29 = vpop.f32.mrf.mxu3 }
 0x2e9   :  { %1590 = vmatpush.bf16.msrb.mxu2 %v2994_v39  ;;  %v3171_v39 = vld [vmem:[#allocation7 + $0xb0] sm:$0xf] }
 0x2ea   :  { %3632 = vrcp.f32 %v3980_v21  ;;  %1617 = vmatpush.bf16.msra.mxu0 %v2990_v49  ;;  %v1400_v15 = vand.u32 2147483648, %v3980_v21  ;;  %vm1394_vm13 = vweird.f32 %v3980_v21  ;;  %v1398_v24 = vand.u32 2147483647, %v3980_v21 }
 0x2eb   :  { %v3172_v41 = vor.u32 %v3542_v22, %v3171_v39 }
 0x2ec   :  { %v1401_v57 = vor.u32 1.1754944e-38, %v1400_v15  ;;  %vm1399_vm15 = vcmp.eq.f32.partialorder %v1398_v24, 8.507059e+37 }
 0x2ed   :  { %v3631_v63 = vpop.eup %3630  ;;  %1591 = vmatpush.bf16.msrb.mxu2 %v2982_v23  ;;  %1869 = vmatpush.bf16.msrb.mxu3 %v3172_v41  ;;  %v3156_v23 = vor.u32 %v3537_v43, %v3153_v37  ;;  %v3526_v41 = vld [vmem:[#allocation7 + $0x38] sm:$0xf0]  ;;  %v3111_v37 = vld [vmem:[#allocation7 + $0x38] sm:$0xf] }
 0x2ee   :  { %v1368_v46 = vadd.f32 1.0, %v3631_v63 }
 0x2f0   :  { %3634 = vrcp.f32 %v1368_v46  ;;  %v3633_v26 = vpop.eup %3632  ;;  %v1380_v61 = vand.u32 2147483648, %v1368_v46  ;;  %v1378_v59 = vand.u32 2147483647, %v1368_v46  ;;  %vm1374_vm9 = vweird.f32 %v1368_v46 }
 0x2f1   :  { %v1390_v51 = vmul.f32 %v3633_v26, %v3980_v21  ;;  %vm1395_vm12 = vweird.f32 %v3633_v26  ;;  %v3541_v21 = vld [vmem:[#allocation7 + $0xb0] sm:$0xf0]  ;;  %1856 = vmatpush.bf16.msra.mxu2 %v3168_v40  ;;  %1870 = vmatpush.bf16.msrb.mxu3 %v3160_v31  ;;  %v3103_v40 = vld [vmem:[#allocation7 + $0x30] sm:$0xf] }
 0x2f2   :  { %v1381_v44 = vor.u32 1.1754944e-38, %v1380_v61  ;;  %vm1379_vm11 = vcmp.eq.f32.partialorder %v1378_v59, 8.507059e+37  ;;  %vm1396_vm14 = vmor %vm1394_vm13, %vm1395_vm12  ;;  %v3141_v61 = vld [vmem:[#allocation7 + $0x84] sm:$0xf0] }
 0x2f3   :  { %v1391_v2 = vsub.f32 1.0, %v1390_v51 }
 0x2f5   :  { %v1392_v60 = vmul.f32 %v3633_v26, %v1391_v2  ;;  %1857 = vmatpush.bf16.msra.mxu2 %v3156_v23  ;;  %v3534_v2 = vld [vmem:[#allocation7 + $0x7c] sm:$0xf] }
 0x2f6   :  { %v3635_v53 = vpop.eup %3634  ;;  %v3144_v59 = vor.u32 %v3534_v2, %v3141_v61  ;;  %v3093_v2 = vld [vmem:[#allocation7 + $0x24] sm:$0xf0]  ;;  %v3524_v61 = vld [vmem:[#allocation7 + $0x28] sm:$0xf0] }
 0x2f7   :  { %v1370_v54 = vmul.f32 %v3635_v53, %v1368_v46  ;;  %vm1375_vm8 = vweird.f32 %v3635_v53  ;;  %v1393_v14 = vadd.f32 %v3633_v26, %v1392_v60  ;;  %v3998_v46 = vld [vmem:[%s4074_s4] sm:$0x7] }
 0x2f8   :  { %vm1376_vm10 = vmor %vm1374_vm9, %vm1375_vm8  ;;  %v1451_v51 = vperm.slane %v3998_v46, 1 }
 0x2f9   :  { %v1371_v56 = vsub.f32 1.0, %v1370_v54  ;;  %v1397_v6 = vsel %vm1396_vm14, %v3633_v26, %v1393_v14  ;;  %v1450_v26 = vperm.slane %v3998_v46, 0  ;;  %v3535_v54 = vld [vmem:[#allocation7 + $0x80] sm:$0xf0]  ;;  %1858 = vmatpush.bf16.msra.mxu2 %v3144_v59  ;;  %v313_v14 = vadd.f32 %v3918_v7, %v3861_v4  ;;  %v3530_v7 = vld [vmem:[#allocation7 + $0x58] sm:$0xf0] }
 0x2fa   :  { %v1402_v25 = vsel %vm1399_vm15, %v1401_v57, %v1397_v6  ;;  %v3135_v6 = vld [vmem:[#allocation7 + $0x68] sm:$0xf]  ;;  %v3533_v57 = vld [vmem:[#allocation7 + $0x70] sm:$0xf0]  ;;  %v3124_v22 = vor.u32 %v3530_v7, %v3123_v38 }
 0x2fb   :  { %v1372_v35 = vmul.f32 %v3635_v53, %v1371_v56  ;;  %v1407_v20 = vsub.f32 1.0, %v1402_v25  ;;  %v1409_v48 = vmul.f32 %v1402_v25, %v3964_v50  ;;  %v3151_v50 = vld [vmem:[#allocation7 + $0x90] sm:$0xf] }
 0x2fc   :  { %v3152_v63 = vor.u32 %v3538_v9, %v3151_v50  ;;  %v3525_v50 = vld [vmem:[#allocation7 + $0x34] sm:$0xf] }
 0x2fd   :  { %v1373_v0 = vadd.f32 %v3635_v53, %v1372_v35  ;;  %v3536_v35 = vld [vmem:[#allocation7 + $0x88] sm:$0xf0] }
 0x2fe   :  { %v3148_v60 = vor.u32 %v3536_v35, %v3147_v58 }
 0x2ff   :  { %v1377_v12 = vsel %vm1376_vm10, %v3635_v53, %v1373_v0  ;;  %v3139_v53 = vld [vmem:[#allocation7 + $0x78] sm:$0xf] }
 0x300   :  { %v1382_v13 = vsel %vm1379_vm11, %v1381_v44, %v1377_v12  ;;  %v3140_v56 = vor.u32 %v3535_v54, %v3139_v53  ;;  %1871 = vmatpush.bf16.msrb.mxu3 %v3148_v60  ;;  %v3532_v12 = vld [vmem:[#allocation7 + $0x68] sm:$0xf0]  ;;  %v3523_v53 = vld [vmem:[#allocation7 + $0x20] sm:$0xf0]  ;;  %v3522_v54 = vld [vmem:[#allocation7 + $0x1c] sm:$0xf] }
 0x301   :  { %v1404_v18 = vmul.f32 %v1382_v13, %v1361_v1  ;;  %v3127_v1 = vld [vmem:[#allocation7 + $0x60] sm:$0xf]  ;;  %v3531_v13 = vld [vmem:[#allocation7 + $0x64] sm:$0xf]  ;;  %v3096_v35 = vor.u32 %v3522_v54, %v3093_v2  ;;  %v3564_v54 = vld [vmem:[#allocation7 + $0xac] sm:$0xf] }
 0x302   :  { %v3128_v24 = vor.u32 %v3532_v12, %v3127_v1  ;;  %v3079_v60 = vld [vmem:[#allocation7] sm:$0xf]  ;;  %v3081_v12 = vld [vmem:[#allocation7 + $0xc] sm:$0xf0] }
 0x303   :  { %v1405_v19 = vadd.f32 %v1404_v18, %v3894_v36  ;;  %v3163_v36 = vld [vmem:[#allocation7 + $0xa8] sm:$0xf] }
 0x304   :  { %v3164_v34 = vor.u32 %v3541_v21, %v3163_v36 }
 0x305   :  { %3636 = vtanh.f32 %v1405_v19  ;;  %v3129_v19 = vld [vmem:[#allocation7 + $0x6c] sm:$0xf0] }
 0x306   :  { %1843 = vmatpush.bf16.msra.mxu1 %v3164_v34  ;;  %v3132_v25 = vor.u32 %v3531_v13, %v3129_v19  ;;  %v3117_v34 = vld [vmem:[#allocation7 + $0x54] sm:$0xf0]  ;;  %v3087_v13 = vld [vmem:[#allocation7 + $0x8] sm:$0xf] }
 0x308   :  { %1859 = vmatpush.bf16.msra.mxu2 %v3132_v25 }
 0x30a   :  { %1844 = vmatpush.bf16.msra.mxu1 %v3152_v63  ;;  %v3105_v63 = vld [vmem:[#allocation7 + $0x3c] sm:$0xf0] }
 0x30b   :  { %v3637_v29 = vpop.eup %3636  ;;  %v3108_v31 = vor.u32 %v3525_v50, %v3105_v63 }
 0x30c   :  { %v1408_v30 = vmul.f32 %v3637_v29, %v1407_v20  ;;  %v3136_v20 = vor.u32 %v3533_v57, %v3135_v6  ;;  %v3115_v29 = vld [vmem:[#allocation7 + $0x48] sm:$0xf] }
 0x30e   :  { %v3991_v32 = vadd.f32 %v1409_v48, %v1408_v30  ;;  %1845 = vmatpush.bf16.msra.mxu1 %v3140_v56  ;;  %v3529_v30 = vld [vmem:[#allocation7 + $0x50] sm:$0xf0]  ;;  %v3528_v48 = vld [vmem:[#allocation7 + $0x4c] sm:$0xf]  ;;  %1872 = vmatpush.bf16.msrb.mxu3 %v3136_v20  ;;  %v3099_v56 = vld [vmem:[#allocation7 + $0x20] sm:$0xf] }
 0x30f   :  { %v3116_v42 = vor.u32 %v3529_v30, %v3115_v29  ;;  %v3120_v39 = vor.u32 %v3528_v48, %v3117_v34  ;;  %v3100_v59 = vor.u32 %v3524_v61, %v3099_v56  ;;  %v3263_v56 = vld [vmem:[#allocation7 + $0xb4] sm:$0xf0]  ;;  %v3269_v61 = vld [vmem:[#allocation7 + $0xb0] sm:$0xf] }
 0x310   :  { %v1411_v33 = vpack.c.bf16 %v3991_v32, %v3991_v32 }
 0x311   :  { %1860 = vmatpush.bf16.msra.mxu2 %v3120_v39 }
 0x312   :  { %1412 = vst [vmem:[#allocation9 + $0xc] sm:$0xf] %v1411_v33  ;;  %1592 = vmatmul.bf16.vlgmr.msrb.gmra.mxu2 %v1411_v33  ;;  %1605 = vmatmul.bf16.vlgmr.msra.gmra.mxu3 %v1411_v33 }
 0x313   :  { %1618 = vmatmul.bf16.vlgmr.msra.gmra.mxu0 %v1411_v33  ;;  %1846 = vmatpush.bf16.msra.mxu1 %v3128_v24 }
 0x314   :  { %1873 = vmatpush.bf16.msrb.mxu3 %v3124_v22 }
 0x315   :  { %1861 = vmatpush.bf16.msra.mxu2 %v3108_v31 }
 0x317   :  { %1847 = vmatpush.bf16.msra.mxu1 %v3116_v42 }
 0x319   :  { %1862 = vmatpush.bf16.msra.mxu2 %v3096_v35  ;;  %v3266_v35 = vor.u32 %v3564_v54, %v3263_v56 }
 0x390   :  { %v4000_v49 = vpop.f32.mrf.mxu0 }
 0x395   :  { %v1593_v0 = vpop.f32.mrf.mxu2  ;;  %v1606_v44 = vpop.f32.mrf.mxu3 }
 0x396   :  { %v1594_v15 = vadd.f32 %v1593_v0, %v1450_v26  ;;  %v1607_v18 = vadd.f32 %v1606_v44, %v1451_v51  ;;  %v3112_v26 = vor.u32 %v3527_v45, %v3111_v37  ;;  %v3091_v51 = vld [vmem:[#allocation7 + $0x18] sm:$0xf]  ;;  %v3520_v0 = vld [vmem:[#allocation7 + $0x8] sm:$0xf0]  ;;  %v3519_v44 = vld [vmem:[#allocation7 + $0x4] sm:$0xf] }
 0x397   :  { %v3092_v58 = vor.u32 %v3523_v53, %v3091_v51  ;;  %v3080_v19 = vor.u32 %v3520_v0, %v3079_v60  ;;  %v3084_v6 = vor.u32 %v3519_v44, %v3081_v12  ;;  %v3565_v53 = vld [vmem:[#allocation7 + $0xb0] sm:$0xf0]  ;;  %v3249_v60 = vld [vmem:[#allocation7 + $0x90] sm:$0xf]  ;;  %v3562_v0 = vld [vmem:[#allocation7 + $0x98] sm:$0xf0] }
 0x398   :  { %v1623_v33 = vadd.f32 %v1594_v15, %v3864_v17  ;;  %v1643_v36 = vadd.f32 %v1607_v18, %v313_v14  ;;  %v1621_v21 = vpop.f32.mrf.mxu0  ;;  %v3104_v17 = vor.u32 %v3526_v41, %v3103_v40  ;;  %1874 = vmatpush.bf16.msrb.mxu3 %v3112_v26  ;;  %v3521_v14 = vld [vmem:[#allocation7 + $0x10] sm:$0xf0]  ;;  %v3251_v12 = vld [vmem:[#allocation7 + $0x9c] sm:$0xf0] }
 0x399   :  { %v3088_v57 = vor.u32 %v3521_v14, %v3087_v13  ;;  %1863 = vmatpush.bf16.msra.mxu2 %v3084_v6  ;;  %v1452_v21 = vperm.slane %v3998_v46, 2  ;;  %v3561_v44 = vld [vmem:[#allocation7 + $0x94] sm:$0xf]  ;;  %v3257_v13 = vld [vmem:[#allocation7 + $0x98] sm:$0xf] }
 0x39a   :  { %v3075_v9 = vmul.f32 -1.442695, %v1623_v33  ;;  %v3076_v43 = vmul.f32 -1.442695, %v1643_v36  ;;  %1848 = vmatpush.bf16.msra.mxu1 %v3104_v17  ;;  %v3563_v14 = vld [vmem:[#allocation7 + $0xa0] sm:$0xf0] }
 0x39b   :  { %v1620_v22 = vadd.f32 %v4000_v49, %v1452_v21  ;;  %v3559_v6 = vld [vmem:[#allocation7 + $0x80] sm:$0xf0]  ;;  %v3225_v21 = vld [vmem:[#allocation7 + $0x60] sm:$0xf] }
 0x39c   :  { %3638 = vpow2.f32 %v3075_v9  ;;  %1875 = vmatpush.bf16.msrb.mxu3 %v3100_v59 }
 0x39d   :  { %3640 = vpow2.f32 %v3076_v43  ;;  %v1595_v5 = vpop.f32.mrf.mxu2  ;;  %v1608_v23 = vpop.f32.mrf.mxu3 }
 0x39e   :  { %1849 = vmatpush.bf16.msra.mxu1 %v3092_v58  ;;  %v3566_v58 = vld [vmem:[#allocation7 + $0xb8] sm:$0xf0] }
 0x39f   :  { %v3270_v59 = vor.u32 %v3566_v58, %v3269_v61  ;;  %v3549_v58 = vld [vmem:[#allocation7 + $0x34] sm:$0xf] }
 0x3a0   :  { %1876 = vmatpush.bf16.msrb.mxu3 %v3088_v57  ;;  %v3558_v57 = vld [vmem:[#allocation7 + $0x7c] sm:$0xf] }
 0x3a1   :  { %2128 = vmatpush.bf16.msrb.mxu2 %v3270_v59  ;;  %v3209_v59 = vld [vmem:[#allocation7 + $0x38] sm:$0xf] }
 0x3a2   :  { %v3639_v1 = vpop.eup %3638  ;;  %1850 = vmatpush.bf16.msra.mxu1 %v3080_v19  ;;  %v3237_v19 = vld [vmem:[#allocation7 + $0x78] sm:$0xf] }
 0x3a3   :  { %v3641_v15 = vpop.eup %3640  ;;  %v1627_v18 = vadd.f32 1.0, %v3639_v1  ;;  %v3250_v1 = vor.u32 %v3562_v0, %v3249_v60 }
 0x3a4   :  { %v1647_v24 = vadd.f32 1.0, %v3641_v15  ;;  %v3254_v15 = vor.u32 %v3561_v44, %v3251_v12  ;;  %v3551_v44 = vld [vmem:[#allocation7 + $0x40] sm:$0xf0] }
 0x3a5   :  { %3642 = vrcp.f32 %v1627_v18  ;;  %v1639_v33 = vand.u32 2147483648, %v1627_v18  ;;  %v1637_v34 = vand.u32 2147483647, %v1627_v18  ;;  %vm1633_vm1 = vweird.f32 %v1627_v18 }
 0x3a6   :  { %3644 = vrcp.f32 %v1647_v24  ;;  %v1659_v9 = vand.u32 2147483648, %v1647_v24  ;;  %vm1653_vm5 = vweird.f32 %v1647_v24  ;;  %v1657_v63 = vand.u32 2147483647, %v1647_v24  ;;  %2115 = vmatpush.bf16.msrb.mxu1 %v3266_v35  ;;  %v3203_v35 = vld [vmem:[#allocation7 + $0x3c] sm:$0xf0] }
 0x3a7   :  { %v1640_v39 = vor.u32 1.1754944e-38, %v1639_v33  ;;  %vm1638_vm3 = vcmp.eq.f32.partialorder %v1637_v34, 8.507059e+37  ;;  %v3555_v34 = vld [vmem:[#allocation7 + $0x64] sm:$0xf]  ;;  %v3206_v0 = vor.u32 %v3549_v58, %v3203_v35 }
 0x3a8   :  { %v1660_v45 = vor.u32 1.1754944e-38, %v1659_v9  ;;  %vm1658_vm7 = vcmp.eq.f32.partialorder %v1657_v63, 8.507059e+37  ;;  %v3213_v63 = vld [vmem:[#allocation7 + $0x48] sm:$0xf] }
 0x3aa   :  { %2116 = vmatpush.bf16.msrb.mxu1 %v3254_v15  ;;  %v3191_v15 = vld [vmem:[#allocation7 + $0x24] sm:$0xf0] }
 0x3ab   :  { %v3643_v25 = vpop.eup %3642 }
 0x3ac   :  { %v3645_v20 = vpop.eup %3644  ;;  %v1629_v29 = vmul.f32 %v3643_v25, %v1627_v18  ;;  %vm1634_vm0 = vweird.f32 %v3643_v25  ;;  %v3258_v18 = vor.u32 %v3563_v14, %v3257_v13  ;;  %v3210_v13 = vor.u32 %v3551_v44, %v3209_v59  ;;  %v3546_v14 = vld [vmem:[#allocation7 + $0x1c] sm:$0xf] }
 0x3ad   :  { %v1649_v30 = vmul.f32 %v3645_v20, %v1647_v24  ;;  %vm1635_vm2 = vmor %vm1633_vm1, %vm1634_vm0  ;;  %vm1654_vm4 = vweird.f32 %v3645_v20 }
 0x3ae   :  { %v1630_v48 = vsub.f32 1.0, %v1629_v29  ;;  %vm1655_vm6 = vmor %vm1653_vm5, %vm1654_vm4  ;;  %2129 = vmatpush.bf16.msrb.mxu2 %v3258_v18  ;;  %v3245_v29 = vld [vmem:[#allocation7 + $0x80] sm:$0xf] }
 0x3af   :  { %v1650_v36 = vsub.f32 1.0, %v1649_v30  ;;  %v3560_v30 = vld [vmem:[#allocation7 + $0x88] sm:$0xf0]  ;;  %v3197_v18 = vld [vmem:[#allocation7 + $0x20] sm:$0xf] }
 0x3b0   :  { %v1631_v42 = vmul.f32 %v3643_v25, %v1630_v48  ;;  %v3246_v33 = vor.u32 %v3560_v30, %v3245_v29 }
 0x3b1   :  { %v1651_v38 = vmul.f32 %v3645_v20, %v1650_v36 }
 0x3b2   :  { %v1632_v7 = vadd.f32 %v3643_v25, %v1631_v42  ;;  %2130 = vmatpush.bf16.msrb.mxu2 %v3246_v33  ;;  %v3556_v42 = vld [vmem:[#allocation7 + $0x68] sm:$0xf0]  ;;  %v3179_v33 = vld [vmem:[#allocation7 + $0xc] sm:$0xf0] }
 0x3b3   :  { %v1652_v50 = vadd.f32 %v3645_v20, %v1651_v38 }
 0x3b4   :  { %v1636_v40 = vsel %vm1635_vm2, %v3643_v25, %v1632_v7  ;;  %v3238_v25 = vor.u32 %v3559_v6, %v3237_v19  ;;  %v3226_v7 = vor.u32 %v3556_v42, %v3225_v21  ;;  %v3185_v42 = vld [vmem:[#allocation7 + $0x8] sm:$0xf] }
 0x3b5   :  { %v1641_v41 = vsel %vm1638_vm3, %v1640_v39, %v1636_v40  ;;  %v1656_v37 = vsel %vm1655_vm6, %v3645_v20, %v1652_v50  ;;  %v3239_v20 = vld [vmem:[#allocation7 + $0x84] sm:$0xf0]  ;;  %v3227_v39 = vld [vmem:[#allocation7 + $0x6c] sm:$0xf0]  ;;  %v3557_v40 = vld [vmem:[#allocation7 + $0x70] sm:$0xf0] }
 0x3b6   :  { %v1663_v43 = vmul.f32 %v1641_v41, %v1620_v22  ;;  %v1661_v17 = vsel %vm1658_vm7, %v1660_v45, %v1656_v37  ;;  %v3242_v48 = vor.u32 %v3558_v57, %v3239_v20  ;;  %v3233_v22 = vld [vmem:[#allocation7 + $0x68] sm:$0xf]  ;;  %v3230_v41 = vor.u32 %v3555_v34, %v3227_v39  ;;  %v3552_v37 = vld [vmem:[#allocation7 + $0x4c] sm:$0xf]  ;;  %v3545_v34 = vld [vmem:[#allocation7 + $0x10] sm:$0xf0] }
 0x3b7   :  { %v1666_v5 = vsub.f32 1.0, %v1661_v17  ;;  %v1668_v31 = vmul.f32 %v1661_v17, %v3991_v32  ;;  %v4018_v32 = vld [vmem:[%s4074_s4] sm:$0x7]  ;;  %v3234_v50 = vor.u32 %v3557_v40, %v3233_v22  ;;  %v3194_v57 = vor.u32 %v3546_v14, %v3191_v15  ;;  %v3544_v20 = vld [vmem:[#allocation7 + $0x8] sm:$0xf0] }
 0x3b8   :  { %v1664_v46 = vadd.f32 %v1663_v43, %v3899_v52  ;;  %v3261_v52 = vld [vmem:[#allocation7 + $0xa8] sm:$0xf]  ;;  %v1709_v24 = vperm.slane %v4018_v32, 0  ;;  %2117 = vmatpush.bf16.msrb.mxu1 %v3242_v48  ;;  %v1710_v43 = vperm.slane %v4018_v32, 1  ;;  %v3543_v48 = vld [vmem:[#allocation7 + $0x4] sm:$0xf]  ;;  %v3186_v22 = vor.u32 %v3545_v34, %v3185_v42 }
 0x3b9   :  { %v3262_v2 = vor.u32 %v3565_v53, %v3261_v52  ;;  %2131 = vmatpush.bf16.msrb.mxu2 %v3234_v50  ;;  %v3554_v52 = vld [vmem:[#allocation7 + $0x58] sm:$0xf0]  ;;  %v3201_v53 = vld [vmem:[#allocation7 + $0x30] sm:$0xf]  ;;  %v3182_v39 = vor.u32 %v3543_v48, %v3179_v33  ;;  %v3588_v14 = vld [vmem:[#allocation7 + $0xac] sm:$0xf] }
 0x3ba   :  { %3646 = vtanh.f32 %v1664_v46  ;;  %v3553_v46 = vld [vmem:[#allocation7 + $0x50] sm:$0xf0]  ;;  %v3349_v48 = vld [vmem:[#allocation7 + $0x9c] sm:$0xf0]  ;;  %v3355_v33 = vld [vmem:[#allocation7 + $0x98] sm:$0xf] }
 0x3bb   :  { %2102 = vmatpush.bf16.msrb.mxu0 %v3262_v2  ;;  %v3214_v17 = vor.u32 %v3553_v46, %v3213_v63  ;;  %v1711_v46 = vperm.slane %v4018_v32, 2 }
 0x3bc   :  { %2118 = vmatpush.bf16.msrb.mxu1 %v3230_v41 }
 0x3bf   :  { %2103 = vmatpush.bf16.msrb.mxu0 %v3250_v1  ;;  %v3547_v1 = vld [vmem:[#allocation7 + $0x20] sm:$0xf0] }
 0x3c0   :  { %v3647_v23 = vpop.eup %3646 }
 0x3c1   :  { %v1667_v49 = vmul.f32 %v3647_v23, %v1666_v5  ;;  %v3215_v5 = vld [vmem:[#allocation7 + $0x54] sm:$0xf0]  ;;  %v3221_v23 = vld [vmem:[#allocation7 + $0x50] sm:$0xf] }
 0x3c2   :  { %v3222_v56 = vor.u32 %v3554_v52, %v3221_v23 }
 0x3c3   :  { %v4011_v26 = vadd.f32 %v1668_v31, %v1667_v49  ;;  %2104 = vmatpush.bf16.msrb.mxu0 %v3238_v25  ;;  %v315_v49 = vadd.f32 %v3920_v10, %v3861_v4  ;;  %v3189_v10 = vld [vmem:[#allocation7 + $0x18] sm:$0xf]  ;;  %v3177_v25 = vld [vmem:[#allocation7] sm:$0xf] }
 0x3c4   :  { %2132 = vmatpush.bf16.msrb.mxu2 %v3222_v56  ;;  %v3190_v6 = vor.u32 %v3547_v1, %v3189_v10 }
 0x3c5   :  { %v1670_v51 = vpack.c.bf16 %v4011_v26, %v4011_v26 }
 0x3c7   :  { %1671 = vst [vmem:[#allocation9 + $0x10] sm:$0xf] %v1670_v51  ;;  %1851 = vmatmul.bf16.vlgmr.msra.gmra.mxu1 %v1670_v51  ;;  %1864 = vmatmul.bf16.vlgmr.msra.gmra.mxu2 %v1670_v51 }
 0x3c8   :  { %1877 = vmatmul.bf16.vlgmr.msrb.gmra.mxu3 %v1670_v51  ;;  %2105 = vmatpush.bf16.msrb.mxu0 %v3226_v7  ;;  %v3218_v51 = vor.u32 %v3552_v37, %v3215_v5  ;;  %v3178_v7 = vor.u32 %v3544_v20, %v3177_v25  ;;  %v3347_v25 = vld [vmem:[#allocation7 + $0x90] sm:$0xf]  ;;  %v3586_v20 = vld [vmem:[#allocation7 + $0x98] sm:$0xf0] }
 0x3c9   :  { %2133 = vmatpush.bf16.msrb.mxu2 %v3210_v13  ;;  %v3589_v13 = vld [vmem:[#allocation7 + $0xb0] sm:$0xf0] }
 0x3ca   :  { %2119 = vmatpush.bf16.msrb.mxu1 %v3218_v51 }
 0x3cc   :  { %2106 = vmatpush.bf16.msrb.mxu0 %v3214_v17 }
 0x3ce   :  { %2120 = vmatpush.bf16.msrb.mxu1 %v3206_v0 }
 0x3d2   :  { %2121 = vmatpush.bf16.msrb.mxu1 %v3194_v57 }
 0x3d6   :  { %2122 = vmatpush.bf16.msrb.mxu1 %v3182_v39  ;;  %v3583_v39 = vld [vmem:[#allocation7 + $0x80] sm:$0xf0] }
 0x444   :  { %v1852_v36 = vpop.f32.mrf.mxu1 }
 0x445   :  { %v1853_v38 = vadd.f32 %v1852_v36, %v1709_v24  ;;  %v3548_v24 = vld [vmem:[#allocation7 + $0x28] sm:$0xf0] }
 0x446   :  { %v3198_v30 = vor.u32 %v3548_v24, %v3197_v18  ;;  %v3361_v18 = vld [vmem:[#allocation7 + $0xb4] sm:$0xf0]  ;;  %v3367_v24 = vld [vmem:[#allocation7 + $0xb0] sm:$0xf] }
 0x447   :  { %v1882_v9 = vadd.f32 %v1853_v38, %v3877_v55  ;;  %v3550_v55 = vld [vmem:[#allocation7 + $0x38] sm:$0xf0] }
 0x448   :  { %v3202_v61 = vor.u32 %v3550_v55, %v3201_v53  ;;  %2134 = vmatpush.bf16.msrb.mxu2 %v3198_v30  ;;  %v3348_v30 = vor.u32 %v3586_v20, %v3347_v25  ;;  %v3307_v25 = vld [vmem:[#allocation7 + $0x38] sm:$0xf]  ;;  %v3575_v20 = vld [vmem:[#allocation7 + $0x40] sm:$0xf0] }
 0x449   :  { %v3173_v45 = vmul.f32 -1.442695, %v1882_v9 }
 0x44a   :  { %v1865_v31 = vpop.f32.mrf.mxu2  ;;  %2107 = vmatpush.bf16.msrb.mxu0 %v3202_v61 }
 0x44b   :  { %3648 = vpow2.f32 %v3173_v45  ;;  %v1866_v54 = vadd.f32 %v1865_v31, %v1710_v43  ;;  %v4025_v2 = vpop.f32.mrf.mxu3 }
 0x44c   :  { %v1854_v60 = vpop.f32.mrf.mxu1  ;;  %2135 = vmatpush.bf16.msrb.mxu2 %v3186_v22  ;;  %v1879_v51 = vadd.f32 %v4025_v2, %v1711_v46  ;;  %v3582_v22 = vld [vmem:[#allocation7 + $0x7c] sm:$0xf] }
 0x44d   :  { %v1902_v12 = vadd.f32 %v1866_v54, %v315_v49 }
 0x44e   :  { %2108 = vmatpush.bf16.msrb.mxu0 %v3190_v6  ;;  %v3364_v6 = vor.u32 %v3588_v14, %v3361_v18  ;;  %v3574_v14 = vld [vmem:[#allocation7 + $0x38] sm:$0xf0]  ;;  %v3301_v18 = vld [vmem:[#allocation7 + $0x3c] sm:$0xf0] }
 0x44f   :  { %v3174_v19 = vmul.f32 -1.442695, %v1902_v12 }
 0x451   :  { %v3649_v29 = vpop.eup %3648  ;;  %3650 = vpow2.f32 %v3174_v19  ;;  %v3590_v19 = vld [vmem:[#allocation7 + $0xb8] sm:$0xf0] }
 0x452   :  { %v1886_v36 = vadd.f32 1.0, %v3649_v29  ;;  %v1867_v21 = vpop.f32.mrf.mxu2  ;;  %2109 = vmatpush.bf16.msrb.mxu0 %v3178_v7  ;;  %v3368_v57 = vor.u32 %v3590_v19, %v3367_v24  ;;  %v3585_v29 = vld [vmem:[#allocation7 + $0x94] sm:$0xf]  ;;  %v3335_v7 = vld [vmem:[#allocation7 + $0x78] sm:$0xf] }
 0x453   :  { %v1880_v38 = vpop.f32.mrf.mxu3  ;;  %v3352_v21 = vor.u32 %v3585_v29, %v3349_v48  ;;  %v3287_v29 = vld [vmem:[#allocation7 + $0x18] sm:$0xf]  ;;  %v3571_v48 = vld [vmem:[#allocation7 + $0x20] sm:$0xf0] }
 0x454   :  { %3652 = vrcp.f32 %v1886_v36  ;;  %v1898_v63 = vand.u32 2147483648, %v1886_v36  ;;  %v1896_v45 = vand.u32 2147483647, %v1886_v36  ;;  %vm1892_vm9 = vweird.f32 %v1886_v36  ;;  %2387 = vmatpush.bf16.msra.mxu1 %v3368_v57 }
 0x456   :  { %v1899_v49 = vor.u32 1.1754944e-38, %v1898_v63  ;;  %vm1897_vm11 = vcmp.eq.f32.partialorder %v1896_v45, 8.507059e+37  ;;  %2374 = vmatpush.bf16.msra.mxu0 %v3364_v6  ;;  %v3323_v45 = vld [vmem:[#allocation7 + $0x60] sm:$0xf] }
 0x457   :  { %v3651_v40 = vpop.eup %3650 }
 0x458   :  { %v1906_v41 = vadd.f32 1.0, %v3651_v40  ;;  %v3336_v40 = vor.u32 %v3583_v39, %v3335_v7  ;;  %v3275_v7 = vld [vmem:[#allocation7] sm:$0xf]  ;;  %v3568_v39 = vld [vmem:[#allocation7 + $0x8] sm:$0xf0] }
 0x45a   :  { %v3653_v50 = vpop.eup %3652  ;;  %3654 = vrcp.f32 %v1906_v41  ;;  %v1918_v56 = vand.u32 2147483648, %v1906_v41  ;;  %v1916_v32 = vand.u32 2147483647, %v1906_v41  ;;  %vm1912_vm13 = vweird.f32 %v1906_v41  ;;  %2375 = vmatpush.bf16.msra.mxu0 %v3352_v21  ;;  %v3295_v21 = vld [vmem:[#allocation7 + $0x20] sm:$0xf] }
 0x45b   :  { %v1888_v9 = vmul.f32 %v3653_v50, %v1886_v36  ;;  %vm1893_vm8 = vweird.f32 %v3653_v50  ;;  %v3587_v36 = vld [vmem:[#allocation7 + $0xa0] sm:$0xf0] }
 0x45c   :  { %vm1894_vm10 = vmor %vm1892_vm9, %vm1893_vm8  ;;  %v1919_v59 = vor.u32 1.1754944e-38, %v1918_v56  ;;  %vm1917_vm15 = vcmp.eq.f32.partialorder %v1916_v32, 8.507059e+37  ;;  %v3356_v42 = vor.u32 %v3587_v36, %v3355_v33  ;;  %v3570_v33 = vld [vmem:[#allocation7 + $0x1c] sm:$0xf]  ;;  %v3289_v36 = vld [vmem:[#allocation7 + $0x24] sm:$0xf0] }
 0x45d   :  { %v1889_v43 = vsub.f32 1.0, %v1888_v9  ;;  %v3584_v9 = vld [vmem:[#allocation7 + $0x88] sm:$0xf0] }
 0x45e   :  { %2388 = vmatpush.bf16.msra.mxu1 %v3356_v42  ;;  %v3572_v42 = vld [vmem:[#allocation7 + $0x28] sm:$0xf0] }
 0x45f   :  { %v1890_v37 = vmul.f32 %v3653_v50, %v1889_v43 }
 0x460   :  { %v3655_v17 = vpop.eup %3654 }
 0x461   :  { %v1908_v5 = vmul.f32 %v3655_v17, %v1906_v41  ;;  %v1891_v23 = vadd.f32 %v3653_v50, %v1890_v37  ;;  %vm1913_vm12 = vweird.f32 %v3655_v17  ;;  %v3337_v41 = vld [vmem:[#allocation7 + $0x84] sm:$0xf0] }
 0x462   :  { %vm1914_vm14 = vmor %vm1912_vm13, %vm1913_vm12  ;;  %v3340_v43 = vor.u32 %v3582_v22, %v3337_v41  ;;  %v3567_v41 = vld [vmem:[#allocation7 + $0x4] sm:$0xf] }
 0x463   :  { %v1909_v31 = vsub.f32 1.0, %v1908_v5  ;;  %v1895_v52 = vsel %vm1894_vm10, %v3653_v50, %v1891_v23  ;;  %v3343_v50 = vld [vmem:[#allocation7 + $0x80] sm:$0xf]  ;;  %v3579_v5 = vld [vmem:[#allocation7 + $0x64] sm:$0xf]  ;;  %v318_v23 = vadd.f32 %v3922_v11, %v3861_v4 }
 0x464   :  { %v1900_v53 = vsel %vm1897_vm11, %v1899_v49, %v1895_v52  ;;  %v3344_v63 = vor.u32 %v3584_v9, %v3343_v50  ;;  %2376 = vmatpush.bf16.msra.mxu0 %v3340_v43  ;;  %v3325_v52 = vld [vmem:[#allocation7 + $0x6c] sm:$0xf0] }
 0x465   :  { %v1910_v55 = vmul.f32 %v3655_v17, %v1909_v31  ;;  %v1922_v54 = vmul.f32 %v1900_v53, %v1879_v51  ;;  %v3331_v53 = vld [vmem:[#allocation7 + $0x68] sm:$0xf]  ;;  %v3277_v50 = vld [vmem:[#allocation7 + $0xc] sm:$0xf0] }
 0x466   :  { %2389 = vmatpush.bf16.msra.mxu1 %v3344_v63  ;;  %v3283_v63 = vld [vmem:[#allocation7 + $0x8] sm:$0xf] }
 0x467   :  { %v1923_v61 = vadd.f32 %v1922_v54, %v3903_v62  ;;  %v1911_v58 = vadd.f32 %v3655_v17, %v1910_v55  ;;  %v3359_v62 = vld [vmem:[#allocation7 + $0xa8] sm:$0xf]  ;;  %v3581_v55 = vld [vmem:[#allocation7 + $0x70] sm:$0xf0]  ;;  %v3328_v54 = vor.u32 %v3579_v5, %v3325_v52  ;;  %v3280_v5 = vor.u32 %v3567_v41, %v3277_v50 }
 0x468   :  { %v3360_v15 = vor.u32 %v3589_v13, %v3359_v62  ;;  %v3332_v56 = vor.u32 %v3581_v55, %v3331_v53  ;;  %v3299_v62 = vld [vmem:[#allocation7 + $0x30] sm:$0xf] }
 0x469   :  { %3656 = vtanh.f32 %v1923_v61  ;;  %v1915_v35 = vsel %vm1914_vm14, %v3655_v17, %v1911_v58  ;;  %v3580_v17 = vld [vmem:[#allocation7 + $0x68] sm:$0xf0]  ;;  %2377 = vmatpush.bf16.msra.mxu0 %v3328_v54  ;;  %v3311_v58 = vld [vmem:[#allocation7 + $0x48] sm:$0xf]  ;;  %v3300_v6 = vor.u32 %v3574_v14, %v3299_v62 }
 0x46a   :  { %v1920_v60 = vsel %vm1917_vm15, %v1919_v59, %v1915_v35  ;;  %2361 = vmatpush.bf16.msra.mxu3 %v3360_v15  ;;  %v3324_v51 = vor.u32 %v3580_v17, %v3323_v45  ;;  %2390 = vmatpush.bf16.msra.mxu1 %v3332_v56  ;;  %v3577_v35 = vld [vmem:[#allocation7 + $0x50] sm:$0xf0]  ;;  %v3576_v59 = vld [vmem:[#allocation7 + $0x4c] sm:$0xf]  ;;  %v3276_v17 = vor.u32 %v3568_v39, %v3275_v7 }
 0x46b   :  { %v1925_v0 = vsub.f32 1.0, %v1920_v60  ;;  %v1927_v10 = vmul.f32 %v1920_v60, %v4011_v26  ;;  %v4038_v26 = vld [vmem:[%s4074_s4] sm:$0x7]  ;;  %v3312_v11 = vor.u32 %v3577_v35, %v3311_v58  ;;  %v3573_v15 = vld [vmem:[#allocation7 + $0x34] sm:$0xf] }
 0x46c   :  { %v1968_v34 = vperm.slane %v4038_v26, 0  ;;  %v1969_v38 = vperm.slane %v4038_v26, 1  ;;  %v3304_v57 = vor.u32 %v3573_v15, %v3301_v18  ;;  %v1970_v56 = vperm.slane %v4038_v26, 2 }
 0x46e   :  { %2362 = vmatpush.bf16.msra.mxu3 %v3348_v30  ;;  %v3308_v30 = vor.u32 %v3575_v20, %v3307_v25  ;;  %v320_v20 = vadd.f32 %v3929_v28, %v3861_v4 }
 0x46f   :  { %v3657_v2 = vpop.eup %3656 }
 0x470   :  { %v1926_v44 = vmul.f32 %v3657_v2, %v1925_v0  ;;  %v3313_v2 = vld [vmem:[#allocation7 + $0x54] sm:$0xf0] }
 0x472   :  { %v4031_v1 = vadd.f32 %v1927_v10, %v1926_v44  ;;  %2363 = vmatpush.bf16.msra.mxu3 %v3336_v40  ;;  %v3316_v44 = vor.u32 %v3576_v59, %v3313_v2  ;;  %v3319_v10 = vld [vmem:[#allocation7 + $0x50] sm:$0xf]  ;;  %v3296_v40 = vor.u32 %v3572_v42, %v3295_v21 }
 0x474   :  { %v1929_v12 = vpack.c.bf16 %v4031_v1, %v4031_v1  ;;  %2378 = vmatpush.bf16.msra.mxu0 %v3316_v44 }
 0x476   :  { %1930 = vst [vmem:[#allocation9 + $0x14] sm:$0xf] %v1929_v12  ;;  %2110 = vmatmul.bf16.vlgmr.msrb.gmra.mxu0 %v1929_v12  ;;  %2123 = vmatmul.bf16.vlgmr.msrb.gmra.mxu1 %v1929_v12 }
 0x477   :  { %2136 = vmatmul.bf16.vlgmr.msrb.gmra.mxu2 %v1929_v12  ;;  %2364 = vmatpush.bf16.msra.mxu3 %v3324_v51  ;;  %v3578_v12 = vld [vmem:[#allocation7 + $0x58] sm:$0xf0] }
 0x478   :  { %2379 = vmatpush.bf16.msra.mxu0 %v3304_v57 }
 0x47b   :  { %2365 = vmatpush.bf16.msra.mxu3 %v3312_v11 }
 0x47f   :  { %2366 = vmatpush.bf16.msra.mxu3 %v3300_v6 }
 0x4f3   :  { %v2111_v46 = vpop.f32.mrf.mxu0  ;;  %v2124_v37 = vpop.f32.mrf.mxu1 }
 0x4f4   :  { %v2112_v49 = vadd.f32 %v2111_v46, %v1968_v34  ;;  %v2125_v31 = vadd.f32 %v2124_v37, %v1969_v38  ;;  %v3288_v34 = vor.u32 %v3571_v48, %v3287_v29  ;;  %v3292_v38 = vor.u32 %v3570_v33, %v3289_v36  ;;  %v3569_v46 = vld [vmem:[#allocation7 + $0x10] sm:$0xf0] }
 0x4f6   :  { %v2141_v32 = vadd.f32 %v2112_v49, %v3881_v16  ;;  %v2161_v61 = vadd.f32 %v2125_v31, %v318_v23  ;;  %v3320_v16 = vor.u32 %v3578_v12, %v3319_v10  ;;  %2367 = vmatpush.bf16.msra.mxu3 %v3288_v34  ;;  %2380 = vmatpush.bf16.msra.mxu0 %v3292_v38 }
 0x4f7   :  { %v3284_v23 = vor.u32 %v3569_v46, %v3283_v63 }
 0x4f8   :  { %v3271_v60 = vmul.f32 -1.442695, %v2141_v32  ;;  %v3272_v0 = vmul.f32 -1.442695, %v2161_v61  ;;  %2391 = vmatpush.bf16.msra.mxu1 %v3320_v16 }
 0x4fa   :  { %3658 = vpow2.f32 %v3271_v60  ;;  %v4045_v13 = vpop.f32.mrf.mxu2  ;;  %2368 = vmatpush.bf16.msra.mxu3 %v3276_v17  ;;  %2381 = vmatpush.bf16.msra.mxu0 %v3280_v5 }
 0x4fb   :  { %3660 = vpow2.f32 %v3272_v0  ;;  %v2113_v24 = vpop.f32.mrf.mxu0  ;;  %v2126_v19 = vpop.f32.mrf.mxu1  ;;  %v2138_v60 = vadd.f32 %v4045_v13, %v1970_v56 }
 0x4fc   :  { %2392 = vmatpush.bf16.msra.mxu1 %v3308_v30 }
 0x500   :  { %v3659_v22 = vpop.eup %3658  ;;  %2393 = vmatpush.bf16.msra.mxu1 %v3296_v40 }
 0x501   :  { %v3661_v9 = vpop.eup %3660  ;;  %v2145_v43 = vadd.f32 1.0, %v3659_v22 }
 0x502   :  { %v2165_v37 = vadd.f32 1.0, %v3661_v9  ;;  %v2139_v45 = vpop.f32.mrf.mxu2 }
 0x503   :  { %3662 = vrcp.f32 %v2145_v43  ;;  %v2157_v54 = vand.u32 2147483648, %v2145_v43  ;;  %v2155_v61 = vand.u32 2147483647, %v2145_v43  ;;  %vm2151_vm1 = vweird.f32 %v2145_v43 }
 0x504   :  { %3664 = vrcp.f32 %v2165_v37  ;;  %2394 = vmatpush.bf16.msra.mxu1 %v3284_v23  ;;  %v2177_v10 = vand.u32 2147483648, %v2165_v37  ;;  %vm2171_vm5 = vweird.f32 %v2165_v37  ;;  %v2175_v12 = vand.u32 2147483647, %v2165_v37 }
 0x505   :  { %v2158_v59 = vor.u32 1.1754944e-38, %v2157_v54  ;;  %vm2156_vm3 = vcmp.eq.f32.partialorder %v2155_v61, 8.507059e+37 }
 0x506   :  { %v2178_v16 = vor.u32 1.1754944e-38, %v2177_v10  ;;  %vm2176_vm7 = vcmp.eq.f32.partialorder %v2175_v12, 8.507059e+37 }
 0x509   :  { %v3663_v49 = vpop.eup %3662 }
 0x50a   :  { %v3665_v31 = vpop.eup %3664  ;;  %v2147_v51 = vmul.f32 %v3663_v49, %v2145_v43  ;;  %vm2152_vm0 = vweird.f32 %v3663_v49 }
 0x50b   :  { %v2167_v52 = vmul.f32 %v3665_v31, %v2165_v37  ;;  %vm2153_vm2 = vmor %vm2151_vm1, %vm2152_vm0  ;;  %vm2172_vm4 = vweird.f32 %v3665_v31 }
 0x50c   :  { %v2148_v53 = vsub.f32 1.0, %v2147_v51  ;;  %vm2173_vm6 = vmor %vm2171_vm5, %vm2172_vm4 }
 0x50d   :  { %v2168_v55 = vsub.f32 1.0, %v2167_v52 }
 0x50e   :  { %v2149_v32 = vmul.f32 %v3663_v49, %v2148_v53 }
 0x50f   :  { %v2169_v58 = vmul.f32 %v3665_v31, %v2168_v55  ;;  %v349_v55 = vadd.f32 %v3932_v47, %v3869_v8 }
 0x510   :  { %v2150_v35 = vadd.f32 %v3663_v49, %v2149_v32 }
 0x511   :  { %v2170_v2 = vadd.f32 %v3665_v31, %v2169_v58 }
 0x512   :  { %v2154_v0 = vsel %vm2153_vm2, %v3663_v49, %v2150_v35 }
 0x513   :  { %v2159_v11 = vsel %vm2156_vm3, %v2158_v59, %v2154_v0  ;;  %v2174_v62 = vsel %vm2173_vm6, %v3665_v31, %v2170_v2 }
 0x514   :  { %v2181_v44 = vmul.f32 %v2159_v11, %v2138_v60  ;;  %v2179_v14 = vsel %vm2176_vm7, %v2178_v16, %v2174_v62 }
 0x515   :  { %v2184_v15 = vsub.f32 1.0, %v2179_v14  ;;  %v2186_v24 = vmul.f32 %v2179_v14, %v4031_v1 }
 0x516   :  { %v2182_v26 = vadd.f32 %v2181_v44, %v3910_v3  ;;  %v2225_v3 = vld [vmem:[%s4074_s4] sm:$0x7]  ;;  %s3760_s4 = smov [#allocation9]  }
 0x517   :  { %v2228_v57 = vperm.slane %v2225_v3, 1  ;;  %v2227_v48 = vperm.slane %v2225_v3, 0  ;;  %v2229_v45 = vperm.slane %v2225_v3, 2  ;;  %s2455_s1 = sshll.u32 %s3760_s4, 4  ;;  %s2456_s1 = int_to_ptr.vmem [resolvable:$true] %s2455_s1 }
 0x518   :  { %3666 = vtanh.f32 %v2182_v26 }
 0x51e   :  { %v3667_v18 = vpop.eup %3666 }
 0x51f   :  { %v2185_v13 = vmul.f32 %v3667_v18, %v2184_v15 }
 0x521   :  { %v4051_v19 = vadd.f32 %v2186_v24, %v2185_v13 }
 0x523   :  { %v2188_v6 = vpack.c.bf16 %v4051_v19, %v4051_v19 }
 0x525   :  { %2189 = vst [vmem:[#allocation9 + $0x18] sm:$0xf] %v2188_v6  ;;  %2369 = vmatmul.bf16.vlgmr.msra.gmra.mxu3 %v2188_v6  ;;  %2382 = vmatmul.bf16.vlgmr.msra.gmra.mxu0 %v2188_v6 }
 0x526   :  { %2395 = vmatmul.bf16.vlgmr.msra.gmra.mxu1 %v2188_v6 }
 0x5a2   :  { %v2383_v25 = vpop.f32.mrf.mxu0 }
 0x5a3   :  { %v2384_v29 = vadd.f32 %v2383_v25, %v2228_v57  ;;  %v2396_v1 = vpop.f32.mrf.mxu1 }
 0x5a4   :  { %v2397_v31 = vadd.f32 %v2396_v1, %v2229_v45 }
 0x5a5   :  { %v2420_v30 = vadd.f32 %v2384_v29, %v320_v20 }
 0x5a7   :  { %v3370_v33 = vmul.f32 -1.442695, %v2420_v30 }
 0x5a8   :  { %v2370_v36 = vpop.f32.mrf.mxu3 }
 0x5a9   :  { %3668 = vpow2.f32 %v3370_v33  ;;  %v2371_v21 = vadd.f32 %v2370_v36, %v2227_v48 }
 0x5aa   :  { %v2385_v42 = vpop.f32.mrf.mxu0 }
 0x5ab   :  { %v2400_v34 = vadd.f32 %v2371_v21, %v3887_v27  ;;  %v2398_v38 = vpop.f32.mrf.mxu1 }
 0x5ad   :  { %v3369_v7 = vmul.f32 -1.442695, %v2400_v34 }
 0x5af   :  { %v3669_v39 = vpop.eup %3668  ;;  %3670 = vpow2.f32 %v3369_v7 }
 0x5b0   :  { %v2424_v22 = vadd.f32 1.0, %v3669_v39  ;;  %v2372_v40 = vpop.f32.mrf.mxu3 }
 0x5b2   :  { %3672 = vrcp.f32 %v2424_v22  ;;  %v2436_v54 = vand.u32 2147483648, %v2424_v22  ;;  %vm2430_vm13 = vweird.f32 %v2424_v22  ;;  %v2434_v32 = vand.u32 2147483647, %v2424_v22 }
 0x5b4   :  { %v2437_v35 = vor.u32 1.1754944e-38, %v2436_v54  ;;  %vm2435_vm15 = vcmp.eq.f32.partialorder %v2434_v32, 8.507059e+37 }
 0x5b5   :  { %v3671_v41 = vpop.eup %3670 }
 0x5b6   :  { %v2404_v4 = vadd.f32 1.0, %v3671_v41 }
 0x5b8   :  { %3674 = vrcp.f32 %v2404_v4  ;;  %v3673_v28 = vpop.eup %3672  ;;  %v2416_v37 = vand.u32 2147483648, %v2404_v4  ;;  %v2414_v27 = vand.u32 2147483647, %v2404_v4  ;;  %vm2410_vm9 = vweird.f32 %v2404_v4 }
 0x5b9   :  { %v2426_v50 = vmul.f32 %v3673_v28, %v2424_v22  ;;  %vm2431_vm12 = vweird.f32 %v3673_v28 }
 0x5ba   :  { %v2417_v49 = vor.u32 1.1754944e-38, %v2416_v37  ;;  %vm2415_vm11 = vcmp.eq.f32.partialorder %v2414_v27, 8.507059e+37  ;;  %vm2432_vm14 = vmor %vm2430_vm13, %vm2431_vm12 }
 0x5bb   :  { %v2427_v63 = vsub.f32 1.0, %v2426_v50 }
 0x5bd   :  { %v2428_v5 = vmul.f32 %v3673_v28, %v2427_v63 }
 0x5be   :  { %v3675_v9 = vpop.eup %3674 }
 0x5bf   :  { %v2406_v43 = vmul.f32 %v3675_v9, %v2404_v4  ;;  %vm2411_vm8 = vweird.f32 %v3675_v9  ;;  %v2429_v52 = vadd.f32 %v3673_v28, %v2428_v5 }
 0x5c0   :  { %vm2412_vm10 = vmor %vm2410_vm9, %vm2411_vm8 }
 0x5c1   :  { %v2407_v46 = vsub.f32 1.0, %v2406_v43  ;;  %v2433_v58 = vsel %vm2432_vm14, %v3673_v28, %v2429_v52 }
 0x5c2   :  { %v2438_v59 = vsel %vm2435_vm15, %v2437_v35, %v2433_v58 }
 0x5c3   :  { %v2408_v17 = vmul.f32 %v3675_v9, %v2407_v46  ;;  %v2443_v60 = vsub.f32 1.0, %v2438_v59  ;;  %v2445_v11 = vmul.f32 %v2438_v59, %v4051_v19 }
 0x5c5   :  { %v2409_v23 = vadd.f32 %v3675_v9, %v2408_v17 }
 0x5c7   :  { %v2413_v51 = vsel %vm2412_vm10, %v3675_v9, %v2409_v23 }
 0x5c8   :  { %v2418_v53 = vsel %vm2415_vm11, %v2417_v49, %v2413_v51 }
 0x5c9   :  { %v2440_v56 = vmul.f32 %v2418_v53, %v2397_v31 }
 0x5cb   :  { %v2441_v61 = vadd.f32 %v2440_v56, %v349_v55 }
 0x5cd   :  { %3676 = vtanh.f32 %v2441_v61 }
 0x5d3   :  { %v3677_v0 = vpop.eup %3676 }
 0x5d4   :  { %v2444_v2 = vmul.f32 %v3677_v0, %v2443_v60 }
 0x5d6   :  { %v2446_v8 = vadd.f32 %v2445_v11, %v2444_v2 }
 0x5d8   :  { %v2447_v47 = vpack.c.bf16 %v2446_v8, %v2446_v8  ;;  %2450 = vst [vmem:[%s4077_s7] sm:$0xff] %v2446_v8 }
 0x5da   :  { %2448 = vst [vmem:[#allocation9 + $0x1c] sm:$0xf] %v2447_v47 }
 0x5db   :  { %2463 = dma.vmem_to_hbm [thread:$0]  %s2456_s1, 512, %s2458_s14, [#allocation6], %s3761_s16, %s3761_s16, %s3762_s17  }
 0x5dc   :  { %3754 = dma.done.wait [#allocation6], 512  }
 0x5dd   :  { %3755 = vsyncadd [#allocation6], 4294966784 }
 0x5de   :  { %2472 = vsyncpa [#allocation5], 1 }
 0x5df   :  { %2473 = vsyncpa [#allocation8], 1 }
 0x5e0   :  { %2474 = vsyncpa [#allocation6], 1 }

</bundles_post_ra>
